<compile_context>
chip_gen: v6e
topology: v6e:2x2x1
jax: 0.10.0
libtpu: 0.0.40
codegen_flags: <defaults>
</compile_context>

<pallas_src>
import functools
import math

import jax
import jax.numpy as jnp
from jax.experimental import pallas as pl
from jax.experimental.pallas import tpu as pltpu

# ---------------- architecture config (static, scaled down) ----------------
IN_C = 4
STEM_C = 8
WIDTHS = (8, 16, 32, 64)
BLOCKS = (3, 4, 6, 3)        # true ResNet-50 block counts
EXPANSION = 4                # bottleneck expansion -> final feature dim 256


def _pick_tm(M):
    """Row-tile size: divides M exactly (no pad/slice), prefers >=2 grid tiles."""
    for tm in (512, 256, 128, 64):
        if M % tm == 0 and M // tm >= 2:
            return tm
    for tm in (1024, 512, 256, 128):
        if M % tm == 0:
            return tm
    return M  # small M: single full block (no (8,128) constraint when full-dim)


# ---------------- Pallas kernels ----------------
def _mm_bias_act_kernel(x_ref, w_ref, b_ref, o_ref, *, relu):
    # (tm, K) @ (K, N) on the MXU; BN already folded into w; f32 bias epilogue.
    acc = jnp.dot(x_ref[...], w_ref[...], preferred_element_type=jnp.float32)
    y = acc + b_ref[...]
    if relu:
        y = jnp.maximum(y, 0.0)
    o_ref[...] = y.astype(o_ref.dtype)


def _tail_kernel(p_ref, w2_ref, b2_ref, w3_ref, b3_ref, id_ref, o_ref):
    # fused: conv2(3x3 via im2col rows) -> ReLU -> conv3(1x1) + residual -> ReLU
    h = jnp.dot(p_ref[...], w2_ref[...], preferred_element_type=jnp.float32)
    h = jnp.maximum(h + b2_ref[...], 0.0).astype(w3_ref.dtype)
    y = jnp.dot(h, w3_ref[...], preferred_element_type=jnp.float32)
    y = jnp.maximum(y + b3_ref[...] + id_ref[...].astype(jnp.float32), 0.0)
    o_ref[...] = y.astype(o_ref.dtype)


def _tail_ds_kernel(p_ref, w2_ref, b2_ref, w3_ref, b3_ref,
                    xd_ref, wd_ref, bd_ref, o_ref):
    # same as _tail_kernel but the 1x1 downsample conv is fused in as well
    ident = jnp.dot(xd_ref[...], wd_ref[...],
                    preferred_element_type=jnp.float32) + bd_ref[...]
    h = jnp.dot(p_ref[...], w2_ref[...], preferred_element_type=jnp.float32)
    h = jnp.maximum(h + b2_ref[...], 0.0).astype(w3_ref.dtype)
    y = jnp.dot(h, w3_ref[...], preferred_element_type=jnp.float32)
    y = jnp.maximum(y + b3_ref[...] + ident, 0.0)
    o_ref[...] = y.astype(o_ref.dtype)


def _maxpool_kernel(x_ref, o_ref, *, k, s, pad):
    # x_ref: (1, H, W, C), o_ref: (1, OH, OW, C). Window bounds clamped statically
    # (implicit -inf padding), windows read in-kernel -> input touched once.
    _, H, W, C = x_ref.shape
    _, OH, OW, _ = o_ref.shape
    xv = x_ref[0].astype(jnp.float32)          # (H, W, C)
    for oh in range(OH):
        h0 = max(0, oh * s - pad)
        h1 = min(H, oh * s - pad + k)
        for ow in range(OW):
            w0 = max(0, ow * s - pad)
            w1 = min(W, ow * s - pad + k)
            win = xv[h0:h1, w0:w1, :]
            m = jnp.max(jnp.max(win, axis=0), axis=0)          # (C,)
            o_ref[0, oh, ow:ow + 1, :] = m.reshape(1, C).astype(o_ref.dtype)


def _avgpool_kernel(x_ref, o_ref):
    # x: (N, H*W, C) -> mean over spatial axis, f32 out
    o_ref[...] = jnp.mean(x_ref[...].astype(jnp.float32), axis=1)


# ---------------- Pallas wrappers ----------------
def matmul_bias_act(x2d, w2d, bias, relu):
    M, K = x2d.shape
    N = w2d.shape[1]
    tm = _pick_tm(M)
    return pl.pallas_call(
        functools.partial(_mm_bias_act_kernel, relu=relu),
        out_shape=jax.ShapeDtypeStruct((M, N), jnp.bfloat16),
        grid_spec=pltpu.PrefetchScalarGridSpec(
            num_scalar_prefetch=0,
            grid=(M // tm,),
            in_specs=[
                pl.BlockSpec((tm, K), lambda i: (i, 0)),
                pl.BlockSpec((K, N), lambda i: (0, 0)),
                pl.BlockSpec((1, N), lambda i: (0, 0)),
            ],
            out_specs=pl.BlockSpec((tm, N), lambda i: (i, 0)),
        ),
        compiler_params=pltpu.CompilerParams(
            dimension_semantics=("parallel",)),
    )(x2d, w2d, bias)


def bottleneck_tail(patches2d, w2, b2, w3, b3, res2d, ds_w=None, ds_b=None):
    """Fused conv2(3x3) -> conv3(1x1) [+ fused 1x1 downsample] + residual + ReLU."""
    M, K2 = patches2d.shape
    width = w2.shape[1]
    cout = w3.shape[1]
    tm = _pick_tm(M)

    def row(i):
        return (i, 0)

    def const(i):
        return (0, 0)

    in_specs = [
        pl.BlockSpec((tm, K2), row),
        pl.BlockSpec((K2, width), const),
        pl.BlockSpec((1, width), const),
        pl.BlockSpec((width, cout), const),
        pl.BlockSpec((1, cout), const),
        pl.BlockSpec((tm, res2d.shape[1]), row),
    ]
    args = [patches2d, w2, b2, w3, b3, res2d]
    if ds_w is not None:
        kernel = _tail_ds_kernel
        in_specs += [pl.BlockSpec(ds_w.shape, const),
                     pl.BlockSpec((1, cout), const)]
        args += [ds_w, ds_b]
    else:
        kernel = _tail_kernel

    return pl.pallas_call(
        kernel,
        out_shape=jax.ShapeDtypeStruct((M, cout), jnp.bfloat16),
        grid_spec=pltpu.PrefetchScalarGridSpec(
            num_scalar_prefetch=0,
            grid=(M // tm,),
            in_specs=in_specs,
            out_specs=pl.BlockSpec((tm, cout), row),
        ),
        compiler_params=pltpu.CompilerParams(
            dimension_semantics=("parallel",)),
    )(*args)


def maxpool_3x3_s2_p1(x):
    Nb, H, W, C = x.shape
    k, s, pad = 3, 2, 1
    OH = (H + 2 * pad - k) // s + 1
    OW = (W + 2 * pad - k) // s + 1
    return pl.pallas_call(
        functools.partial(_maxpool_kernel, k=k, s=s, pad=pad),
        out_shape=jax.ShapeDtypeStruct((Nb, OH, OW, C), x.dtype),
        grid_spec=pltpu.PrefetchScalarGridSpec(
            num_scalar_prefetch=0,
            grid=(Nb,),
            in_specs=[pl.BlockSpec((1, H, W, C), lambda n: (n, 0, 0, 0))],
            out_specs=pl.BlockSpec((1, OH, OW, C), lambda n: (n, 0, 0, 0)),
        ),
        compiler_params=pltpu.CompilerParams(
            dimension_semantics=("parallel",)),
    )(x)


def global_avgpool(x):
    Nb, H, W, C = x.shape
    x3 = x.reshape(Nb, H * W, C)
    return pl.pallas_call(
        _avgpool_kernel,
        out_shape=jax.ShapeDtypeStruct((Nb, C), jnp.float32),
    )(x3)


# ---------------- glue: im2col for spatial (non-1x1) convolutions only ----------------
def _im2col(x, kh, kw, stride, pad):
    Nb, H, W, C = x.shape
    xp = jnp.pad(x, ((0, 0), (pad, pad), (pad, pad), (0, 0)))
    OH = (H + 2 * pad - kh) // stride + 1
    OW = (W + 2 * pad - kw) // stride + 1
    cols = []
    for i in range(kh):
        for j in range(kw):
            cols.append(xp[:, i:i + stride * OH:stride,
                           j:j + stride * OW:stride, :])
    patches = jnp.stack(cols, axis=3)  # (Nb, OH, OW, kh*kw, C)
    return patches.reshape(Nb * OH * OW, kh * kw * C), OH, OW


# ---------------- parameters (deterministic, synthetic; BN folded into w/bias) ------
def _init_conv_bn(key, kh, kw, cin, cout):
    k1, k2, k3, k4, k5 = jax.random.split(key, 5)
    w = jax.random.normal(k1, (kh, kw, cin, cout), jnp.float32)
    w = w * (1.0 / math.sqrt(kh * kw * cin))
    gamma = 1.0 + 0.1 * jax.random.normal(k2, (cout,), jnp.float32)
    beta = 0.1 * jax.random.normal(k3, (cout,), jnp.float32)
    mean = 0.1 * jax.random.normal(k4, (cout,), jnp.float32)
    var = 1.0 + 0.1 * jnp.abs(jax.random.normal(k5, (cout,), jnp.float32))
    scale = gamma / jnp.sqrt(var + 1e-5)            # frozen BN
    bias = (beta - mean * scale).reshape(1, cout)   # stays f32 for the epilogue
    # fold BN scale into the weight columns, store as 2D bf16 (MXU-native)
    w2d = (w.reshape(kh * kw * cin, cout) * scale[None, :]).astype(jnp.bfloat16)
    return {'w': w2d, 'bias': bias}


def init_params(key):
    keys = iter(jax.random.split(key, 256))
    params = {'stem': _init_conv_bn(next(keys), 7, 7, IN_C, STEM_C)}
    layers = []
    cprev = STEM_C
    for li, (w, nb) in enumerate(zip(WIDTHS, BLOCKS)):
        layer = []
        for bi in range(nb):
            stride = 2 if (li > 0 and bi == 0) else 1
            cout = w * EXPANSION
            block = {
                'conv1': _init_conv_bn(next(keys), 1, 1, cprev, w),
                'conv2': _init_conv_bn(next(keys), 3, 3, w, w),
                'conv3': _init_conv_bn(next(keys), 1, 1, w, cout),
            }
            if stride != 1 or cprev != cout:
                block['downsample'] = _init_conv_bn(next(keys), 1, 1,
                                                    cprev, cout)
            layer.append(block)
            cprev = cout
        layers.append(layer)
    params['layers'] = layers
    return params


# ---------------- forward (matches PlacesCNN.forward semantics) ----------------
def forward(params, x_nchw):
    Nb = x_nchw.shape[0]
    # NCHW (PyTorch) -> NHWC, bf16 activations throughout (f32 accumulation in-kernel)
    x = jnp.transpose(x_nchw, (0, 2, 3, 1)).astype(jnp.bfloat16)

    # stem: conv7x7/s2 + BN + ReLU (im2col + fused matmul), then maxpool3x3/s2
    x2d, OH, OW = _im2col(x, 7, 7, stride=2, pad=3)
    x = matmul_bias_act(x2d, params['stem']['w'], params['stem']['bias'],
                        relu=True).reshape(Nb, OH, OW, STEM_C)
    x = maxpool_3x3_s2_p1(x)

    # 4 bottleneck stages
    for li, nb in enumerate(BLOCKS):
        for bi in range(nb):
            p = params['layers'][li][bi]
            stride = 2 if (li > 0 and bi == 0) else 1
            _, H, W, Cin = x.shape
            width = p['conv1']['w'].shape[1]
            cout = p['conv3']['w'].shape[1]

            # conv1: 1x1 / stride 1 -> pure reshape + fused matmul (no im2col)
            h1 = matmul_bias_act(x.reshape(Nb * H * W, Cin),
                                 p['conv1']['w'], p['conv1']['bias'],
                                 relu=True).reshape(Nb, H, W, width)

            # conv2 patches (3x3, stride s, pad 1) via XLA im2col on the narrow map
            p2d, OH2, OW2 = _im2col(h1, 3, 3, stride=stride, pad=1)
            M2 = Nb * OH2 * OW2

            if 'downsample' in p:
                xd = x if stride == 1 else x[:, ::stride, ::stride, :]
                res2d = xd.reshape(M2, Cin)
                y2d = bottleneck_tail(p2d, p['conv2']['w'], p['conv2']['bias'],
                                      p['conv3']['w'], p['conv3']['bias'],
                                      res2d,
                                      p['downsample']['w'],
                                      p['downsample']['bias'])
            else:
                res2d = x.reshape(M2, cout)
                y2d = bottleneck_tail(p2d, p['conv2']['w'], p['conv2']['bias'],
                                      p['conv3']['w'], p['conv3']['bias'],
                                      res2d)
            x = y2d.reshape(Nb, OH2, OW2, cout)

    # global average pool + flatten  == backbone(x).view(N, -1)
    feats = global_avgpool(x)
    return feats.reshape(feats.shape[0], -1)


if __name__ == "__main__":
    key = jax.random.PRNGKey(0)
    pkey, xkey = jax.random.split(key)
    params = init_params(pkey)
    # PyTorch-style NCHW input: batch=2, channels=4, spatial=16x16
    x = jax.random.normal(xkey, (2, IN_C, 16, 16), jnp.float32)

    feats = jax.jit(forward)(params, x)
    feats = jax.block_until_ready(feats)

    assert feats.shape == (2, WIDTHS[-1] * EXPANSION), feats.shape
    assert bool(jnp.all(jnp.isfinite(feats)))
    print("KERNEL_OK")
</pallas_src>

<mosaic_0001>
module attributes {stable_mosaic.version = 11 : i64} {
  func.func @_mm_bias_act_kernel(%arg0: i32, %arg1: memref<64x196xbf16, #tpu.memory_space<vmem>>, %arg2: memref<196x8xbf16, #tpu.memory_space<vmem>>, %arg3: memref<1x8xf32, #tpu.memory_space<vmem>>, %arg4: memref<64x8xbf16, #tpu.memory_space<vmem>>) attributes {dimension_semantics = [#tpu.dimension_semantics<parallel>], iteration_bounds = array<i64: 2>, scalar_prefetch = 0 : i64, scratch_operands = 0 : i64, tpu.core_type = #tpu.core_type<tc>, window_params = [{transform_indices = @transform_0, window_bounds = array<i64: 64, 196>}, {pipeline_mode = #tpu.pipeline_mode<synchronous>, transform_indices = @transform_1, window_bounds = array<i64: 196, 8>}, {pipeline_mode = #tpu.pipeline_mode<synchronous>, transform_indices = @transform_2, window_bounds = array<i64: 1, 8>}, {transform_indices = @transform_3, window_bounds = array<i64: 64, 8>}]} {
    %c0 = arith.constant 0 : index
    %c0_0 = arith.constant 0 : index
    %0 = vector.load %arg1[%c0, %c0_0] : memref<64x196xbf16, #tpu.memory_space<vmem>>, vector<64x196xbf16>
    %c0_1 = arith.constant 0 : index
    %c0_2 = arith.constant 0 : index
    %1 = vector.load %arg2[%c0_1, %c0_2] : memref<196x8xbf16, #tpu.memory_space<vmem>>, vector<196x8xbf16>
    %cst = arith.constant dense<0.000000e+00> : vector<64x8xf32>
    %2 = tpu.matmul %0, %1, %cst {dimension_numbers = #tpu.dot_dimension_numbers<[1], [0], [0], [1], [0, 0, 1, 1], [], []>} : vector<64x196xbf16>, vector<196x8xbf16>, vector<64x8xf32> -> vector<64x8xf32>
    %c0_3 = arith.constant 0 : index
    %c0_4 = arith.constant 0 : index
    %3 = vector.load %arg3[%c0_3, %c0_4] : memref<1x8xf32, #tpu.memory_space<vmem>>, vector<1x8xf32>
    %4 = vector.broadcast %3 : vector<1x8xf32> to vector<64x8xf32>
    %5 = arith.addf %2, %4 : vector<64x8xf32>
    %cst_5 = arith.constant 0.000000e+00 : f32
    %6 = vector.broadcast %cst_5 : f32 to vector<64x8xf32>
    %7 = arith.maximumf %5, %6 : vector<64x8xf32>
    %8 = arith.truncf %7 : vector<64x8xf32> to vector<64x8xbf16>
    %c0_6 = arith.constant 0 : index
    %c0_7 = arith.constant 0 : index
    %9 = vector.load %arg4[%c0_6, %c0_7] : memref<64x8xbf16, #tpu.memory_space<vmem>>, vector<64x8xbf16>
    tpu.vector_store %arg4[%c0_6, %c0_7], %8 {strides = array<i32>} : memref<64x8xbf16, #tpu.memory_space<vmem>>, vector<64x8xbf16>,
    return
  }
  func.func @transform_0(%arg0: i32) -> (i32, i32) {
    %c0_i32 = arith.constant 0 : i32
    %c0_i32_0 = arith.constant 0 : i32
    return %arg0, %c0_i32 : i32, i32
  }
  func.func @transform_1(%arg0: i32) -> (i32, i32) {
    %c0_i32 = arith.constant 0 : i32
    %c0_i32_0 = arith.constant 0 : i32
    %c0_i32_1 = arith.constant 0 : i32
    return %c0_i32, %c0_i32_0 : i32, i32
  }
  func.func @transform_2(%arg0: i32) -> (i32, i32) {
    %c0_i32 = arith.constant 0 : i32
    %c0_i32_0 = arith.constant 0 : i32
    %c0_i32_1 = arith.constant 0 : i32
    return %c0_i32, %c0_i32_0 : i32, i32
  }
  func.func @transform_3(%arg0: i32) -> (i32, i32) {
    %c0_i32 = arith.constant 0 : i32
    %c0_i32_0 = arith.constant 0 : i32
    return %arg0, %c0_i32 : i32, i32
  }
}

module attributes {stable_mosaic.version = 11 : i64} {
  func.func @_mm_bias_act_kernel(%arg0: i32, %arg1: memref<32x8xbf16, #tpu.memory_space<vmem>>, %arg2: memref<8x8xbf16, #tpu.memory_space<vmem>>, %arg3: memref<1x8xf32, #tpu.memory_space<vmem>>, %arg4: memref<32x8xbf16, #tpu.memory_space<vmem>>) attributes {dimension_semantics = [#tpu.dimension_semantics<parallel>], iteration_bounds = array<i64: 1>, scalar_prefetch = 0 : i64, scratch_operands = 0 : i64, tpu.core_type = #tpu.core_type<tc>, window_params = [{transform_indices = @transform_0, window_bounds = array<i64: 32, 8>}, {pipeline_mode = #tpu.pipeline_mode<synchronous>, transform_indices = @transform_1, window_bounds = array<i64: 8, 8>}, {pipeline_mode = #tpu.pipeline_mode<synchronous>, transform_indices = @transform_2, window_bounds = array<i64: 1, 8>}, {transform_indices = @transform_3, window_bounds = array<i64: 32, 8>}]} {
    %c0 = arith.constant 0 : index
    %c0_0 = arith.constant 0 : index
    %0 = vector.load %arg1[%c0, %c0_0] : memref<32x8xbf16, #tpu.memory_space<vmem>>, vector<32x8xbf16>
    %c0_1 = arith.constant 0 : index
    %c0_2 = arith.constant 0 : index
    %1 = vector.load %arg2[%c0_1, %c0_2] : memref<8x8xbf16, #tpu.memory_space<vmem>>, vector<8x8xbf16>
    %cst = arith.constant dense<0.000000e+00> : vector<32x8xf32>
    %2 = tpu.matmul %0, %1, %cst {dimension_numbers = #tpu.dot_dimension_numbers<[1], [0], [0], [1], [0, 0, 1, 1], [], []>} : vector<32x8xbf16>, vector<8x8xbf16>, vector<32x8xf32> -> vector<32x8xf32>
    %c0_3 = arith.constant 0 : index
    %c0_4 = arith.constant 0 : index
    %3 = vector.load %arg3[%c0_3, %c0_4] : memref<1x8xf32, #tpu.memory_space<vmem>>, vector<1x8xf32>
    %4 = vector.broadcast %3 : vector<1x8xf32> to vector<32x8xf32>
    %5 = arith.addf %2, %4 : vector<32x8xf32>
    %cst_5 = arith.constant 0.000000e+00 : f32
    %6 = vector.broadcast %cst_5 : f32 to vector<32x8xf32>
    %7 = arith.maximumf %5, %6 : vector<32x8xf32>
    %8 = arith.truncf %7 : vector<32x8xf32> to vector<32x8xbf16>
    %c0_6 = arith.constant 0 : index
    %c0_7 = arith.constant 0 : index
    %9 = vector.load %arg4[%c0_6, %c0_7] : memref<32x8xbf16, #tpu.memory_space<vmem>>, vector<32x8xbf16>
    tpu.vector_store %arg4[%c0_6, %c0_7], %8 {strides = array<i32>} : memref<32x8xbf16, #tpu.memory_space<vmem>>, vector<32x8xbf16>,
    return
  }
  func.func @transform_0(%arg0: i32) -> (i32, i32) {
    %c0_i32 = arith.constant 0 : i32
    %c0_i32_0 = arith.constant 0 : i32
    return %arg0, %c0_i32 : i32, i32
  }
  func.func @transform_1(%arg0: i32) -> (i32, i32) {
    %c0_i32 = arith.constant 0 : i32
    %c0_i32_0 = arith.constant 0 : i32
    %c0_i32_1 = arith.constant 0 : i32
    return %c0_i32, %c0_i32_0 : i32, i32
  }
  func.func @transform_2(%arg0: i32) -> (i32, i32) {
    %c0_i32 = arith.constant 0 : i32
    %c0_i32_0 = arith.constant 0 : i32
    %c0_i32_1 = arith.constant 0 : i32
    return %c0_i32, %c0_i32_0 : i32, i32
  }
  func.func @transform_3(%arg0: i32) -> (i32, i32) {
    %c0_i32 = arith.constant 0 : i32
    %c0_i32_0 = arith.constant 0 : i32
    return %arg0, %c0_i32 : i32, i32
  }
}

module attributes {stable_mosaic.version = 11 : i64} {
  func.func @_maxpool_kernel(%arg0: i32, %arg1: memref<1x8x8x8xbf16, #tpu.memory_space<vmem>>, %arg2: memref<1x4x4x8xbf16, #tpu.memory_space<vmem>>) attributes {dimension_semantics = [#tpu.dimension_semantics<parallel>], iteration_bounds = array<i64: 2>, scalar_prefetch = 0 : i64, scratch_operands = 0 : i64, tpu.core_type = #tpu.core_type<tc>, window_params = [{transform_indices = @transform_0, window_bounds = array<i64: 1, 8, 8, 8>}, {transform_indices = @transform_1, window_bounds = array<i64: 1, 4, 4, 8>}]} {
    %c0 = arith.constant 0 : index
    %c0_0 = arith.constant 0 : index
    %c0_1 = arith.constant 0 : index
    %c0_2 = arith.constant 0 : index
    %0 = vector.load %arg1[%c0, %c0_0, %c0_1, %c0_2] : memref<1x8x8x8xbf16, #tpu.memory_space<vmem>>, vector<1x8x8x8xbf16>
    %1 = vector.shape_cast %0 : vector<1x8x8x8xbf16> to vector<8x8x8xbf16>
    %2 = arith.extf %1 : vector<8x8x8xbf16> to vector<8x8x8xf32>
    %3 = vector.extract_strided_slice %2 {offsets = [0, 0, 0], sizes = [2, 2, 8], strides = [1, 1, 1]} : vector<8x8x8xf32> to vector<2x2x8xf32>
    %cst = arith.constant dense<0xFF800000> : vector<2x8xf32>
    %4 = vector.multi_reduction <maximumf>, %3, %cst [0] : vector<2x2x8xf32> to vector<2x8xf32>
    %cst_3 = arith.constant dense<0xFF800000> : vector<8xf32>
    %5 = vector.multi_reduction <maximumf>, %4, %cst_3 [0] : vector<2x8xf32> to vector<8xf32>
    %6 = vector.shape_cast %5 : vector<8xf32> to vector<1x8xf32>
    %7 = arith.truncf %6 : vector<1x8xf32> to vector<1x8xbf16>
    %c0_4 = arith.constant 0 : index
    %c0_5 = arith.constant 0 : index
    %c0_6 = arith.constant 0 : index
    %c0_7 = arith.constant 0 : index
    %8 = vector.load %arg2[%c0_4, %c0_5, %c0_6, %c0_7] : memref<1x4x4x8xbf16, #tpu.memory_space<vmem>>, vector<1x1x1x8xbf16>
    %9 = vector.shape_cast %8 : vector<1x1x1x8xbf16> to vector<1x8xbf16>
    %10 = vector.shape_cast %7 : vector<1x8xbf16> to vector<1x1x1x8xbf16>
    tpu.vector_store %arg2[%c0_4, %c0_5, %c0_6, %c0_7], %10 {strides = array<i32>} : memref<1x4x4x8xbf16, #tpu.memory_space<vmem>>, vector<1x1x1x8xbf16>,
    %11 = vector.extract_strided_slice %2 {offsets = [0, 1, 0], sizes = [2, 3, 8], strides = [1, 1, 1]} : vector<8x8x8xf32> to vector<2x3x8xf32>
    %cst_8 = arith.constant dense<0xFF800000> : vector<3x8xf32>
    %12 = vector.multi_reduction <maximumf>, %11, %cst_8 [0] : vector<2x3x8xf32> to vector<3x8xf32>
    %cst_9 = arith.constant dense<0xFF800000> : vector<8xf32>
    %13 = vector.multi_reduction <maximumf>, %12, %cst_9 [0] : vector<3x8xf32> to vector<8xf32>
    %14 = vector.shape_cast %13 : vector<8xf32> to vector<1x8xf32>
    %15 = arith.truncf %14 : vector<1x8xf32> to vector<1x8xbf16>
    %c0_10 = arith.constant 0 : index
    %c0_11 = arith.constant 0 : index
    %c1 = arith.constant 1 : index
    %c0_12 = arith.constant 0 : index
    %16 = vector.load %arg2[%c0_10, %c0_11, %c1, %c0_12] : memref<1x4x4x8xbf16, #tpu.memory_space<vmem>>, vector<1x1x1x8xbf16>
    %17 = vector.shape_cast %16 : vector<1x1x1x8xbf16> to vector<1x8xbf16>
    %18 = vector.shape_cast %15 : vector<1x8xbf16> to vector<1x1x1x8xbf16>
    tpu.vector_store %arg2[%c0_10, %c0_11, %c1, %c0_12], %18 {strides = array<i32>} : memref<1x4x4x8xbf16, #tpu.memory_space<vmem>>, vector<1x1x1x8xbf16>,
    %19 = vector.extract_strided_slice %2 {offsets = [0, 3, 0], sizes = [2, 3, 8], strides = [1, 1, 1]} : vector<8x8x8xf32> to vector<2x3x8xf32>
    %cst_13 = arith.constant dense<0xFF800000> : vector<3x8xf32>
    %20 = vector.multi_reduction <maximumf>, %19, %cst_13 [0] : vector<2x3x8xf32> to vector<3x8xf32>
    %cst_14 = arith.constant dense<0xFF800000> : vector<8xf32>
    %21 = vector.multi_reduction <maximumf>, %20, %cst_14 [0] : vector<3x8xf32> to vector<8xf32>
    %22 = vector.shape_cast %21 : vector<8xf32> to vector<1x8xf32>
    %23 = arith.truncf %22 : vector<1x8xf32> to vector<1x8xbf16>
    %c0_15 = arith.constant 0 : index
    %c0_16 = arith.constant 0 : index
    %c2 = arith.constant 2 : index
    %c0_17 = arith.constant 0 : index
    %24 = vector.load %arg2[%c0_15, %c0_16, %c2, %c0_17] : memref<1x4x4x8xbf16, #tpu.memory_space<vmem>>, vector<1x1x1x8xbf16>
    %25 = vector.shape_cast %24 : vector<1x1x1x8xbf16> to vector<1x8xbf16>
    %26 = vector.shape_cast %23 : vector<1x8xbf16> to vector<1x1x1x8xbf16>
    tpu.vector_store %arg2[%c0_15, %c0_16, %c2, %c0_17], %26 {strides = array<i32>} : memref<1x4x4x8xbf16, #tpu.memory_space<vmem>>, vector<1x1x1x8xbf16>,
    %27 = vector.extract_strided_slice %2 {offsets = [0, 5, 0], sizes = [2, 3, 8], strides = [1, 1, 1]} : vector<8x8x8xf32> to vector<2x3x8xf32>
    %cst_18 = arith.constant dense<0xFF800000> : vector<3x8xf32>
    %28 = vector.multi_reduction <maximumf>, %27, %cst_18 [0] : vector<2x3x8xf32> to vector<3x8xf32>
    %cst_19 = arith.constant dense<0xFF800000> : vector<8xf32>
    %29 = vector.multi_reduction <maximumf>, %28, %cst_19 [0] : vector<3x8xf32> to vector<8xf32>
    %30 = vector.shape_cast %29 : vector<8xf32> to vector<1x8xf32>
    %31 = arith.truncf %30 : vector<1x8xf32> to vector<1x8xbf16>
    %c0_20 = arith.constant 0 : index
    %c0_21 = arith.constant 0 : index
    %c3 = arith.constant 3 : index
    %c0_22 = arith.constant 0 : index
    %32 = vector.load %arg2[%c0_20, %c0_21, %c3, %c0_22] : memref<1x4x4x8xbf16, #tpu.memory_space<vmem>>, vector<1x1x1x8xbf16>
    %33 = vector.shape_cast %32 : vector<1x1x1x8xbf16> to vector<1x8xbf16>
    %34 = vector.shape_cast %31 : vector<1x8xbf16> to vector<1x1x1x8xbf16>
    tpu.vector_store %arg2[%c0_20, %c0_21, %c3, %c0_22], %34 {strides = array<i32>} : memref<1x4x4x8xbf16, #tpu.memory_space<vmem>>, vector<1x1x1x8xbf16>,
    %35 = vector.extract_strided_slice %2 {offsets = [1, 0, 0], sizes = [3, 2, 8], strides = [1, 1, 1]} : vector<8x8x8xf32> to vector<3x2x8xf32>
    %cst_23 = arith.constant dense<0xFF800000> : vector<2x8xf32>
    %36 = vector.multi_reduction <maximumf>, %35, %cst_23 [0] : vector<3x2x8xf32> to vector<2x8xf32>
    %cst_24 = arith.constant dense<0xFF800000> : vector<8xf32>
    %37 = vector.multi_reduction <maximumf>, %36, %cst_24 [0] : vector<2x8xf32> to vector<8xf32>
    %38 = vector.shape_cast %37 : vector<8xf32> to vector<1x8xf32>
    %39 = arith.truncf %38 : vector<1x8xf32> to vector<1x8xbf16>
    %c0_25 = arith.constant 0 : index
    %c1_26 = arith.constant 1 : index
    %c0_27 = arith.constant 0 : index
    %c0_28 = arith.constant 0 : index
    %40 = vector.load %arg2[%c0_25, %c1_26, %c0_27, %c0_28] : memref<1x4x4x8xbf16, #tpu.memory_space<vmem>>, vector<1x1x1x8xbf16>
    %41 = vector.shape_cast %40 : vector<1x1x1x8xbf16> to vector<1x8xbf16>
    %42 = vector.shape_cast %39 : vector<1x8xbf16> to vector<1x1x1x8xbf16>
    tpu.vector_store %arg2[%c0_25, %c1_26, %c0_27, %c0_28], %42 {strides = array<i32>} : memref<1x4x4x8xbf16, #tpu.memory_space<vmem>>, vector<1x1x1x8xbf16>,
    %43 = vector.extract_strided_slice %2 {offsets = [1, 1, 0], sizes = [3, 3, 8], strides = [1, 1, 1]} : vector<8x8x8xf32> to vector<3x3x8xf32>
    %cst_29 = arith.constant dense<0xFF800000> : vector<3x8xf32>
    %44 = vector.multi_reduction <maximumf>, %43, %cst_29 [0] : vector<3x3x8xf32> to vector<3x8xf32>
    %cst_30 = arith.constant dense<0xFF800000> : vector<8xf32>
    %45 = vector.multi_reduction <maximumf>, %44, %cst_30 [0] : vector<3x8xf32> to vector<8xf32>
    %46 = vector.shape_cast %45 : vector<8xf32> to vector<1x8xf32>
    %47 = arith.truncf %46 : vector<1x8xf32> to vector<1x8xbf16>
    %c0_31 = arith.constant 0 : index
    %c1_32 = arith.constant 1 : index
    %c1_33 = arith.constant 1 : index
    %c0_34 = arith.constant 0 : index
    %48 = vector.load %arg2[%c0_31, %c1_32, %c1_33, %c0_34] : memref<1x4x4x8xbf16, #tpu.memory_space<vmem>>, vector<1x1x1x8xbf16>
    %49 = vector.shape_cast %48 : vector<1x1x1x8xbf16> to vector<1x8xbf16>
    %50 = vector.shape_cast %47 : vector<1x8xbf16> to vector<1x1x1x8xbf16>
    tpu.vector_store %arg2[%c0_31, %c1_32, %c1_33, %c0_34], %50 {strides = array<i32>} : memref<1x4x4x8xbf16, #tpu.memory_space<vmem>>, vector<1x1x1x8xbf16>,
    %51 = vector.extract_strided_slice %2 {offsets = [1, 3, 0], sizes = [3, 3, 8], strides = [1, 1, 1]} : vector<8x8x8xf32> to vector<3x3x8xf32>
    %cst_35 = arith.constant dense<0xFF800000> : vector<3x8xf32>
    %52 = vector.multi_reduction <maximumf>, %51, %cst_35 [0] : vector<3x3x8xf32> to vector<3x8xf32>
    %cst_36 = arith.constant dense<0xFF800000> : vector<8xf32>
    %53 = vector.multi_reduction <maximumf>, %52, %cst_36 [0] : vector<3x8xf32> to vector<8xf32>
    %54 = vector.shape_cast %53 : vector<8xf32> to vector<1x8xf32>
    %55 = arith.truncf %54 : vector<1x8xf32> to vector<1x8xbf16>
    %c0_37 = arith.constant 0 : index
    %c1_38 = arith.constant 1 : index
    %c2_39 = arith.constant 2 : index
    %c0_40 = arith.constant 0 : index
    %56 = vector.load %arg2[%c0_37, %c1_38, %c2_39, %c0_40] : memref<1x4x4x8xbf16, #tpu.memory_space<vmem>>, vector<1x1x1x8xbf16>
    %57 = vector.shape_cast %56 : vector<1x1x1x8xbf16> to vector<1x8xbf16>
    %58 = vector.shape_cast %55 : vector<1x8xbf16> to vector<1x1x1x8xbf16>
    tpu.vector_store %arg2[%c0_37, %c1_38, %c2_39, %c0_40], %58 {strides = array<i32>} : memref<1x4x4x8xbf16, #tpu.memory_space<vmem>>, vector<1x1x1x8xbf16>,
    %59 = vector.extract_strided_slice %2 {offsets = [1, 5, 0], sizes = [3, 3, 8], strides = [1, 1, 1]} : vector<8x8x8xf32> to vector<3x3x8xf32>
    %cst_41 = arith.constant dense<0xFF800000> : vector<3x8xf32>
    %60 = vector.multi_reduction <maximumf>, %59, %cst_41 [0] : vector<3x3x8xf32> to vector<3x8xf32>
    %cst_42 = arith.constant dense<0xFF800000> : vector<8xf32>
    %61 = vector.multi_reduction <maximumf>, %60, %cst_42 [0] : vector<3x8xf32> to vector<8xf32>
    %62 = vector.shape_cast %61 : vector<8xf32> to vector<1x8xf32>
    %63 = arith.truncf %62 : vector<1x8xf32> to vector<1x8xbf16>
    %c0_43 = arith.constant 0 : index
    %c1_44 = arith.constant 1 : index
    %c3_45 = arith.constant 3 : index
    %c0_46 = arith.constant 0 : index
    %64 = vector.load %arg2[%c0_43, %c1_44, %c3_45, %c0_46] : memref<1x4x4x8xbf16, #tpu.memory_space<vmem>>, vector<1x1x1x8xbf16>
    %65 = vector.shape_cast %64 : vector<1x1x1x8xbf16> to vector<1x8xbf16>
    %66 = vector.shape_cast %63 : vector<1x8xbf16> to vector<1x1x1x8xbf16>
    tpu.vector_store %arg2[%c0_43, %c1_44, %c3_45, %c0_46], %66 {strides = array<i32>} : memref<1x4x4x8xbf16, #tpu.memory_space<vmem>>, vector<1x1x1x8xbf16>,
    %67 = vector.extract_strided_slice %2 {offsets = [3, 0, 0], sizes = [3, 2, 8], strides = [1, 1, 1]} : vector<8x8x8xf32> to vector<3x2x8xf32>
    %cst_47 = arith.constant dense<0xFF800000> : vector<2x8xf32>
    %68 = vector.multi_reduction <maximumf>, %67, %cst_47 [0] : vector<3x2x8xf32> to vector<2x8xf32>
    %cst_48 = arith.constant dense<0xFF800000> : vector<8xf32>
    %69 = vector.multi_reduction <maximumf>, %68, %cst_48 [0] : vector<2x8xf32> to vector<8xf32>
    %70 = vector.shape_cast %69 : vector<8xf32> to vector<1x8xf32>
    %71 = arith.truncf %70 : vector<1x8xf32> to vector<1x8xbf16>
    %c0_49 = arith.constant 0 : index
    %c2_50 = arith.constant 2 : index
    %c0_51 = arith.constant 0 : index
    %c0_52 = arith.constant 0 : index
    %72 = vector.load %arg2[%c0_49, %c2_50, %c0_51, %c0_52] : memref<1x4x4x8xbf16, #tpu.memory_space<vmem>>, vector<1x1x1x8xbf16>
    %73 = vector.shape_cast %72 : vector<1x1x1x8xbf16> to vector<1x8xbf16>
    %74 = vector.shape_cast %71 : vector<1x8xbf16> to vector<1x1x1x8xbf16>
    tpu.vector_store %arg2[%c0_49, %c2_50, %c0_51, %c0_52], %74 {strides = array<i32>} : memref<1x4x4x8xbf16, #tpu.memory_space<vmem>>, vector<1x1x1x8xbf16>,
    %75 = vector.extract_strided_slice %2 {offsets = [3, 1, 0], sizes = [3, 3, 8], strides = [1, 1, 1]} : vector<8x8x8xf32> to vector<3x3x8xf32>
    %cst_53 = arith.constant dense<0xFF800000> : vector<3x8xf32>
    %76 = vector.multi_reduction <maximumf>, %75, %cst_53 [0] : vector<3x3x8xf32> to vector<3x8xf32>
    %cst_54 = arith.constant dense<0xFF800000> : vector<8xf32>
    %77 = vector.multi_reduction <maximumf>, %76, %cst_54 [0] : vector<3x8xf32> to vector<8xf32>
    %78 = vector.shape_cast %77 : vector<8xf32> to vector<1x8xf32>
    %79 = arith.truncf %78 : vector<1x8xf32> to vector<1x8xbf16>
    %c0_55 = arith.constant 0 : index
    %c2_56 = arith.constant 2 : index
    %c1_57 = arith.constant 1 : index
    %c0_58 = arith.constant 0 : index
    %80 = vector.load %arg2[%c0_55, %c2_56, %c1_57, %c0_58] : memref<1x4x4x8xbf16, #tpu.memory_space<vmem>>, vector<1x1x1x8xbf16>
    %81 = vector.shape_cast %80 : vector<1x1x1x8xbf16> to vector<1x8xbf16>
    %82 = vector.shape_cast %79 : vector<1x8xbf16> to vector<1x1x1x8xbf16>
    tpu.vector_store %arg2[%c0_55, %c2_56, %c1_57, %c0_58], %82 {strides = array<i32>} : memref<1x4x4x8xbf16, #tpu.memory_space<vmem>>, vector<1x1x1x8xbf16>,
    %83 = vector.extract_strided_slice %2 {offsets = [3, 3, 0], sizes = [3, 3, 8], strides = [1, 1, 1]} : vector<8x8x8xf32> to vector<3x3x8xf32>
    %cst_59 = arith.constant dense<0xFF800000> : vector<3x8xf32>
    %84 = vector.multi_reduction <maximumf>, %83, %cst_59 [0] : vector<3x3x8xf32> to vector<3x8xf32>
    %cst_60 = arith.constant dense<0xFF800000> : vector<8xf32>
    %85 = vector.multi_reduction <maximumf>, %84, %cst_60 [0] : vector<3x8xf32> to vector<8xf32>
    %86 = vector.shape_cast %85 : vector<8xf32> to vector<1x8xf32>
    %87 = arith.truncf %86 : vector<1x8xf32> to vector<1x8xbf16>
    %c0_61 = arith.constant 0 : index
    %c2_62 = arith.constant 2 : index
    %c2_63 = arith.constant 2 : index
    %c0_64 = arith.constant 0 : index
    %88 = vector.load %arg2[%c0_61, %c2_62, %c2_63, %c0_64] : memref<1x4x4x8xbf16, #tpu.memory_space<vmem>>, vector<1x1x1x8xbf16>
    %89 = vector.shape_cast %88 : vector<1x1x1x8xbf16> to vector<1x8xbf16>
    %90 = vector.shape_cast %87 : vector<1x8xbf16> to vector<1x1x1x8xbf16>
    tpu.vector_store %arg2[%c0_61, %c2_62, %c2_63, %c0_64], %90 {strides = array<i32>} : memref<1x4x4x8xbf16, #tpu.memory_space<vmem>>, vector<1x1x1x8xbf16>,
    %91 = vector.extract_strided_slice %2 {offsets = [3, 5, 0], sizes = [3, 3, 8], strides = [1, 1, 1]} : vector<8x8x8xf32> to vector<3x3x8xf32>
    %cst_65 = arith.constant dense<0xFF800000> : vector<3x8xf32>
    %92 = vector.multi_reduction <maximumf>, %91, %cst_65 [0] : vector<3x3x8xf32> to vector<3x8xf32>
    %cst_66 = arith.constant dense<0xFF800000> : vector<8xf32>
    %93 = vector.multi_reduction <maximumf>, %92, %cst_66 [0] : vector<3x8xf32> to vector<8xf32>
    %94 = vector.shape_cast %93 : vector<8xf32> to vector<1x8xf32>
    %95 = arith.truncf %94 : vector<1x8xf32> to vector<1x8xbf16>
    %c0_67 = arith.constant 0 : index
    %c2_68 = arith.constant 2 : index
    %c3_69 = arith.constant 3 : index
    %c0_70 = arith.constant 0 : index
    %96 = vector.load %arg2[%c0_67, %c2_68, %c3_69, %c0_70] : memref<1x4x4x8xbf16, #tpu.memory_space<vmem>>, vector<1x1x1x8xbf16>
    %97 = vector.shape_cast %96 : vector<1x1x1x8xbf16> to vector<1x8xbf16>
    %98 = vector.shape_cast %95 : vector<1x8xbf16> to vector<1x1x1x8xbf16>
    tpu.vector_store %arg2[%c0_67, %c2_68, %c3_69, %c0_70], %98 {strides = array<i32>} : memref<1x4x4x8xbf16, #tpu.memory_space<vmem>>, vector<1x1x1x8xbf16>,
    %99 = vector.extract_strided_slice %2 {offsets = [5, 0, 0], sizes = [3, 2, 8], strides = [1, 1, 1]} : vector<8x8x8xf32> to vector<3x2x8xf32>
    %cst_71 = arith.constant dense<0xFF800000> : vector<2x8xf32>
    %100 = vector.multi_reduction <maximumf>, %99, %cst_71 [0] : vector<3x2x8xf32> to vector<2x8xf32>
    %cst_72 = arith.constant dense<0xFF800000> : vector<8xf32>
    %101 = vector.multi_reduction <maximumf>, %100, %cst_72 [0] : vector<2x8xf32> to vector<8xf32>
    %102 = vector.shape_cast %101 : vector<8xf32> to vector<1x8xf32>
    %103 = arith.truncf %102 : vector<1x8xf32> to vector<1x8xbf16>
    %c0_73 = arith.constant 0 : index
    %c3_74 = arith.constant 3 : index
    %c0_75 = arith.constant 0 : index
    %c0_76 = arith.constant 0 : index
    %104 = vector.load %arg2[%c0_73, %c3_74, %c0_75, %c0_76] : memref<1x4x4x8xbf16, #tpu.memory_space<vmem>>, vector<1x1x1x8xbf16>
    %105 = vector.shape_cast %104 : vector<1x1x1x8xbf16> to vector<1x8xbf16>
    %106 = vector.shape_cast %103 : vector<1x8xbf16> to vector<1x1x1x8xbf16>
    tpu.vector_store %arg2[%c0_73, %c3_74, %c0_75, %c0_76], %106 {strides = array<i32>} : memref<1x4x4x8xbf16, #tpu.memory_space<vmem>>, vector<1x1x1x8xbf16>,
    %107 = vector.extract_strided_slice %2 {offsets = [5, 1, 0], sizes = [3, 3, 8], strides = [1, 1, 1]} : vector<8x8x8xf32> to vector<3x3x8xf32>
    %cst_77 = arith.constant dense<0xFF800000> : vector<3x8xf32>
    %108 = vector.multi_reduction <maximumf>, %107, %cst_77 [0] : vector<3x3x8xf32> to vector<3x8xf32>
    %cst_78 = arith.constant dense<0xFF800000> : vector<8xf32>
    %109 = vector.multi_reduction <maximumf>, %108, %cst_78 [0] : vector<3x8xf32> to vector<8xf32>
    %110 = vector.shape_cast %109 : vector<8xf32> to vector<1x8xf32>
    %111 = arith.truncf %110 : vector<1x8xf32> to vector<1x8xbf16>
    %c0_79 = arith.constant 0 : index
    %c3_80 = arith.constant 3 : index
    %c1_81 = arith.constant 1 : index
    %c0_82 = arith.constant 0 : index
    %112 = vector.load %arg2[%c0_79, %c3_80, %c1_81, %c0_82] : memref<1x4x4x8xbf16, #tpu.memory_space<vmem>>, vector<1x1x1x8xbf16>
    %113 = vector.shape_cast %112 : vector<1x1x1x8xbf16> to vector<1x8xbf16>
    %114 = vector.shape_cast %111 : vector<1x8xbf16> to vector<1x1x1x8xbf16>
    tpu.vector_store %arg2[%c0_79, %c3_80, %c1_81, %c0_82], %114 {strides = array<i32>} : memref<1x4x4x8xbf16, #tpu.memory_space<vmem>>, vector<1x1x1x8xbf16>,
    %115 = vector.extract_strided_slice %2 {offsets = [5, 3, 0], sizes = [3, 3, 8], strides = [1, 1, 1]} : vector<8x8x8xf32> to vector<3x3x8xf32>
    %cst_83 = arith.constant dense<0xFF800000> : vector<3x8xf32>
    %116 = vector.multi_reduction <maximumf>, %115, %cst_83 [0] : vector<3x3x8xf32> to vector<3x8xf32>
    %cst_84 = arith.constant dense<0xFF800000> : vector<8xf32>
    %117 = vector.multi_reduction <maximumf>, %116, %cst_84 [0] : vector<3x8xf32> to vector<8xf32>
    %118 = vector.shape_cast %117 : vector<8xf32> to vector<1x8xf32>
    %119 = arith.truncf %118 : vector<1x8xf32> to vector<1x8xbf16>
    %c0_85 = arith.constant 0 : index
    %c3_86 = arith.constant 3 : index
    %c2_87 = arith.constant 2 : index
    %c0_88 = arith.constant 0 : index
    %120 = vector.load %arg2[%c0_85, %c3_86, %c2_87, %c0_88] : memref<1x4x4x8xbf16, #tpu.memory_space<vmem>>, vector<1x1x1x8xbf16>
    %121 = vector.shape_cast %120 : vector<1x1x1x8xbf16> to vector<1x8xbf16>
    %122 = vector.shape_cast %119 : vector<1x8xbf16> to vector<1x1x1x8xbf16>
    tpu.vector_store %arg2[%c0_85, %c3_86, %c2_87, %c0_88], %122 {strides = array<i32>} : memref<1x4x4x8xbf16, #tpu.memory_space<vmem>>, vector<1x1x1x8xbf16>,
    %123 = vector.extract_strided_slice %2 {offsets = [5, 5, 0], sizes = [3, 3, 8], strides = [1, 1, 1]} : vector<8x8x8xf32> to vector<3x3x8xf32>
    %cst_89 = arith.constant dense<0xFF800000> : vector<3x8xf32>
    %124 = vector.multi_reduction <maximumf>, %123, %cst_89 [0] : vector<3x3x8xf32> to vector<3x8xf32>
    %cst_90 = arith.constant dense<0xFF800000> : vector<8xf32>
    %125 = vector.multi_reduction <maximumf>, %124, %cst_90 [0] : vector<3x8xf32> to vector<8xf32>
    %126 = vector.shape_cast %125 : vector<8xf32> to vector<1x8xf32>
    %127 = arith.truncf %126 : vector<1x8xf32> to vector<1x8xbf16>
    %c0_91 = arith.constant 0 : index
    %c3_92 = arith.constant 3 : index
    %c3_93 = arith.constant 3 : index
    %c0_94 = arith.constant 0 : index
    %128 = vector.load %arg2[%c0_91, %c3_92, %c3_93, %c0_94] : memref<1x4x4x8xbf16, #tpu.memory_space<vmem>>, vector<1x1x1x8xbf16>
    %129 = vector.shape_cast %128 : vector<1x1x1x8xbf16> to vector<1x8xbf16>
    %130 = vector.shape_cast %127 : vector<1x8xbf16> to vector<1x1x1x8xbf16>
    tpu.vector_store %arg2[%c0_91, %c3_92, %c3_93, %c0_94], %130 {strides = array<i32>} : memref<1x4x4x8xbf16, #tpu.memory_space<vmem>>, vector<1x1x1x8xbf16>,
    return
  }
  func.func @transform_0(%arg0: i32) -> (i32, i32, i32, i32) {
    %c0_i32 = arith.constant 0 : i32
    %c0_i32_0 = arith.constant 0 : i32
    %c0_i32_1 = arith.constant 0 : i32
    %c0_i32_2 = arith.constant 0 : i32
    return %arg0, %c0_i32, %c0_i32_0, %c0_i32_1 : i32, i32, i32, i32
  }
  func.func @transform_1(%arg0: i32) -> (i32, i32, i32, i32) {
    %c0_i32 = arith.constant 0 : i32
    %c0_i32_0 = arith.constant 0 : i32
    %c0_i32_1 = arith.constant 0 : i32
    %c0_i32_2 = arith.constant 0 : i32
    return %arg0, %c0_i32, %c0_i32_0, %c0_i32_1 : i32, i32, i32, i32
  }
}

module attributes {stable_mosaic.version = 11 : i64} {
  func.func @_tail_ds_kernel(%arg0: i32, %arg1: memref<32x72xbf16, #tpu.memory_space<vmem>>, %arg2: memref<72x8xbf16, #tpu.memory_space<vmem>>, %arg3: memref<1x8xf32, #tpu.memory_space<vmem>>, %arg4: memref<8x32xbf16, #tpu.memory_space<vmem>>, %arg5: memref<1x32xf32, #tpu.memory_space<vmem>>, %arg6: memref<32x8xbf16, #tpu.memory_space<vmem>>, %arg7: memref<8x32xbf16, #tpu.memory_space<vmem>>, %arg8: memref<1x32xf32, #tpu.memory_space<vmem>>, %arg9: memref<32x32xbf16, #tpu.memory_space<vmem>>) attributes {dimension_semantics = [#tpu.dimension_semantics<parallel>], iteration_bounds = array<i64: 1>, scalar_prefetch = 0 : i64, scratch_operands = 0 : i64, tpu.core_type = #tpu.core_type<tc>, window_params = [{transform_indices = @transform_0, window_bounds = array<i64: 32, 72>}, {pipeline_mode = #tpu.pipeline_mode<synchronous>, transform_indices = @transform_1, window_bounds = array<i64: 72, 8>}, {pipeline_mode = #tpu.pipeline_mode<synchronous>, transform_indices = @transform_2, window_bounds = array<i64: 1, 8>}, {pipeline_mode = #tpu.pipeline_mode<synchronous>, transform_indices = @transform_3, window_bounds = array<i64: 8, 32>}, {pipeline_mode = #tpu.pipeline_mode<synchronous>, transform_indices = @transform_4, window_bounds = array<i64: 1, 32>}, {transform_indices = @transform_5, window_bounds = array<i64: 32, 8>}, {pipeline_mode = #tpu.pipeline_mode<synchronous>, transform_indices = @transform_6, window_bounds = array<i64: 8, 32>}, {pipeline_mode = #tpu.pipeline_mode<synchronous>, transform_indices = @transform_7, window_bounds = array<i64: 1, 32>}, {transform_indices = @transform_8, window_bounds = array<i64: 32, 32>}]} {
    %c0 = arith.constant 0 : index
    %c0_0 = arith.constant 0 : index
    %0 = vector.load %arg6[%c0, %c0_0] : memref<32x8xbf16, #tpu.memory_space<vmem>>, vector<32x8xbf16>
    %c0_1 = arith.constant 0 : index
    %c0_2 = arith.constant 0 : index
    %1 = vector.load %arg7[%c0_1, %c0_2] : memref<8x32xbf16, #tpu.memory_space<vmem>>, vector<8x32xbf16>
    %cst = arith.constant dense<0.000000e+00> : vector<32x32xf32>
    %2 = tpu.matmul %0, %1, %cst {dimension_numbers = #tpu.dot_dimension_numbers<[1], [0], [0], [1], [0, 0, 1, 1], [], []>} : vector<32x8xbf16>, vector<8x32xbf16>, vector<32x32xf32> -> vector<32x32xf32>
    %c0_3 = arith.constant 0 : index
    %c0_4 = arith.constant 0 : index
    %3 = vector.load %arg8[%c0_3, %c0_4] : memref<1x32xf32, #tpu.memory_space<vmem>>, vector<1x32xf32>
    %4 = vector.broadcast %3 : vector<1x32xf32> to vector<32x32xf32>
    %5 = arith.addf %2, %4 : vector<32x32xf32>
    %c0_5 = arith.constant 0 : index
    %c0_6 = arith.constant 0 : index
    %6 = vector.load %arg1[%c0_5, %c0_6] : memref<32x72xbf16, #tpu.memory_space<vmem>>, vector<32x72xbf16>
    %c0_7 = arith.constant 0 : index
    %c0_8 = arith.constant 0 : index
    %7 = vector.load %arg2[%c0_7, %c0_8] : memref<72x8xbf16, #tpu.memory_space<vmem>>, vector<72x8xbf16>
    %cst_9 = arith.constant dense<0.000000e+00> : vector<32x8xf32>
    %8 = tpu.matmul %6, %7, %cst_9 {dimension_numbers = #tpu.dot_dimension_numbers<[1], [0], [0], [1], [0, 0, 1, 1], [], []>} : vector<32x72xbf16>, vector<72x8xbf16>, vector<32x8xf32> -> vector<32x8xf32>
    %c0_10 = arith.constant 0 : index
    %c0_11 = arith.constant 0 : index
    %9 = vector.load %arg3[%c0_10, %c0_11] : memref<1x8xf32, #tpu.memory_space<vmem>>, vector<1x8xf32>
    %10 = vector.broadcast %9 : vector<1x8xf32> to vector<32x8xf32>
    %11 = arith.addf %8, %10 : vector<32x8xf32>
    %cst_12 = arith.constant 0.000000e+00 : f32
    %12 = vector.broadcast %cst_12 : f32 to vector<32x8xf32>
    %13 = arith.maximumf %11, %12 : vector<32x8xf32>
    %14 = arith.truncf %13 : vector<32x8xf32> to vector<32x8xbf16>
    %c0_13 = arith.constant 0 : index
    %c0_14 = arith.constant 0 : index
    %15 = vector.load %arg4[%c0_13, %c0_14] : memref<8x32xbf16, #tpu.memory_space<vmem>>, vector<8x32xbf16>
    %cst_15 = arith.constant dense<0.000000e+00> : vector<32x32xf32>
    %16 = tpu.matmul %14, %15, %cst_15 {dimension_numbers = #tpu.dot_dimension_numbers<[1], [0], [0], [1], [0, 0, 1, 1], [], []>} : vector<32x8xbf16>, vector<8x32xbf16>, vector<32x32xf32> -> vector<32x32xf32>
    %c0_16 = arith.constant 0 : index
    %c0_17 = arith.constant 0 : index
    %17 = vector.load %arg5[%c0_16, %c0_17] : memref<1x32xf32, #tpu.memory_space<vmem>>, vector<1x32xf32>
    %18 = vector.broadcast %17 : vector<1x32xf32> to vector<32x32xf32>
    %19 = arith.addf %16, %18 : vector<32x32xf32>
    %20 = arith.addf %19, %5 : vector<32x32xf32>
    %cst_18 = arith.constant 0.000000e+00 : f32
    %21 = vector.broadcast %cst_18 : f32 to vector<32x32xf32>
    %22 = arith.maximumf %20, %21 : vector<32x32xf32>
    %23 = arith.truncf %22 : vector<32x32xf32> to vector<32x32xbf16>
    %c0_19 = arith.constant 0 : index
    %c0_20 = arith.constant 0 : index
    %24 = vector.load %arg9[%c0_19, %c0_20] : memref<32x32xbf16, #tpu.memory_space<vmem>>, vector<32x32xbf16>
    tpu.vector_store %arg9[%c0_19, %c0_20], %23 {strides = array<i32>} : memref<32x32xbf16, #tpu.memory_space<vmem>>, vector<32x32xbf16>,
    return
  }
  func.func @transform_0(%arg0: i32) -> (i32, i32) {
    %c0_i32 = arith.constant 0 : i32
    %c0_i32_0 = arith.constant 0 : i32
    return %arg0, %c0_i32 : i32, i32
  }
  func.func @transform_1(%arg0: i32) -> (i32, i32) {
    %c0_i32 = arith.constant 0 : i32
    %c0_i32_0 = arith.constant 0 : i32
    %c0_i32_1 = arith.constant 0 : i32
    return %c0_i32, %c0_i32_0 : i32, i32
  }
  func.func @transform_2(%arg0: i32) -> (i32, i32) {
    %c0_i32 = arith.constant 0 : i32
    %c0_i32_0 = arith.constant 0 : i32
    %c0_i32_1 = arith.constant 0 : i32
    return %c0_i32, %c0_i32_0 : i32, i32
  }
  func.func @transform_3(%arg0: i32) -> (i32, i32) {
    %c0_i32 = arith.constant 0 : i32
    %c0_i32_0 = arith.constant 0 : i32
    %c0_i32_1 = arith.constant 0 : i32
    return %c0_i32, %c0_i32_0 : i32, i32
  }
  func.func @transform_4(%arg0: i32) -> (i32, i32) {
    %c0_i32 = arith.constant 0 : i32
    %c0_i32_0 = arith.constant 0 : i32
    %c0_i32_1 = arith.constant 0 : i32
    return %c0_i32, %c0_i32_0 : i32, i32
  }
  func.func @transform_5(%arg0: i32) -> (i32, i32) {
    %c0_i32 = arith.constant 0 : i32
    %c0_i32_0 = arith.constant 0 : i32
    return %arg0, %c0_i32 : i32, i32
  }
  func.func @transform_6(%arg0: i32) -> (i32, i32) {
    %c0_i32 = arith.constant 0 : i32
    %c0_i32_0 = arith.constant 0 : i32
    %c0_i32_1 = arith.constant 0 : i32
    return %c0_i32, %c0_i32_0 : i32, i32
  }
  func.func @transform_7(%arg0: i32) -> (i32, i32) {
    %c0_i32 = arith.constant 0 : i32
    %c0_i32_0 = arith.constant 0 : i32
    %c0_i32_1 = arith.constant 0 : i32
    return %c0_i32, %c0_i32_0 : i32, i32
  }
  func.func @transform_8(%arg0: i32) -> (i32, i32) {
    %c0_i32 = arith.constant 0 : i32
    %c0_i32_0 = arith.constant 0 : i32
    return %arg0, %c0_i32 : i32, i32
  }
}

module attributes {stable_mosaic.version = 11 : i64} {
  func.func @_mm_bias_act_kernel(%arg0: i32, %arg1: memref<32x32xbf16, #tpu.memory_space<vmem>>, %arg2: memref<32x8xbf16, #tpu.memory_space<vmem>>, %arg3: memref<1x8xf32, #tpu.memory_space<vmem>>, %arg4: memref<32x8xbf16, #tpu.memory_space<vmem>>) attributes {dimension_semantics = [#tpu.dimension_semantics<parallel>], iteration_bounds = array<i64: 1>, scalar_prefetch = 0 : i64, scratch_operands = 0 : i64, tpu.core_type = #tpu.core_type<tc>, window_params = [{transform_indices = @transform_0, window_bounds = array<i64: 32, 32>}, {pipeline_mode = #tpu.pipeline_mode<synchronous>, transform_indices = @transform_1, window_bounds = array<i64: 32, 8>}, {pipeline_mode = #tpu.pipeline_mode<synchronous>, transform_indices = @transform_2, window_bounds = array<i64: 1, 8>}, {transform_indices = @transform_3, window_bounds = array<i64: 32, 8>}]} {
    %c0 = arith.constant 0 : index
    %c0_0 = arith.constant 0 : index
    %0 = vector.load %arg1[%c0, %c0_0] : memref<32x32xbf16, #tpu.memory_space<vmem>>, vector<32x32xbf16>
    %c0_1 = arith.constant 0 : index
    %c0_2 = arith.constant 0 : index
    %1 = vector.load %arg2[%c0_1, %c0_2] : memref<32x8xbf16, #tpu.memory_space<vmem>>, vector<32x8xbf16>
    %cst = arith.constant dense<0.000000e+00> : vector<32x8xf32>
    %2 = tpu.matmul %0, %1, %cst {dimension_numbers = #tpu.dot_dimension_numbers<[1], [0], [0], [1], [0, 0, 1, 1], [], []>} : vector<32x32xbf16>, vector<32x8xbf16>, vector<32x8xf32> -> vector<32x8xf32>
    %c0_3 = arith.constant 0 : index
    %c0_4 = arith.constant 0 : index
    %3 = vector.load %arg3[%c0_3, %c0_4] : memref<1x8xf32, #tpu.memory_space<vmem>>, vector<1x8xf32>
    %4 = vector.broadcast %3 : vector<1x8xf32> to vector<32x8xf32>
    %5 = arith.addf %2, %4 : vector<32x8xf32>
    %cst_5 = arith.constant 0.000000e+00 : f32
    %6 = vector.broadcast %cst_5 : f32 to vector<32x8xf32>
    %7 = arith.maximumf %5, %6 : vector<32x8xf32>
    %8 = arith.truncf %7 : vector<32x8xf32> to vector<32x8xbf16>
    %c0_6 = arith.constant 0 : index
    %c0_7 = arith.constant 0 : index
    %9 = vector.load %arg4[%c0_6, %c0_7] : memref<32x8xbf16, #tpu.memory_space<vmem>>, vector<32x8xbf16>
    tpu.vector_store %arg4[%c0_6, %c0_7], %8 {strides = array<i32>} : memref<32x8xbf16, #tpu.memory_space<vmem>>, vector<32x8xbf16>,
    return
  }
  func.func @transform_0(%arg0: i32) -> (i32, i32) {
    %c0_i32 = arith.constant 0 : i32
    %c0_i32_0 = arith.constant 0 : i32
    return %arg0, %c0_i32 : i32, i32
  }
  func.func @transform_1(%arg0: i32) -> (i32, i32) {
    %c0_i32 = arith.constant 0 : i32
    %c0_i32_0 = arith.constant 0 : i32
    %c0_i32_1 = arith.constant 0 : i32
    return %c0_i32, %c0_i32_0 : i32, i32
  }
  func.func @transform_2(%arg0: i32) -> (i32, i32) {
    %c0_i32 = arith.constant 0 : i32
    %c0_i32_0 = arith.constant 0 : i32
    %c0_i32_1 = arith.constant 0 : i32
    return %c0_i32, %c0_i32_0 : i32, i32
  }
  func.func @transform_3(%arg0: i32) -> (i32, i32) {
    %c0_i32 = arith.constant 0 : i32
    %c0_i32_0 = arith.constant 0 : i32
    return %arg0, %c0_i32 : i32, i32
  }
}

module attributes {stable_mosaic.version = 11 : i64} {
  func.func @_tail_kernel(%arg0: i32, %arg1: memref<32x72xbf16, #tpu.memory_space<vmem>>, %arg2: memref<72x8xbf16, #tpu.memory_space<vmem>>, %arg3: memref<1x8xf32, #tpu.memory_space<vmem>>, %arg4: memref<8x32xbf16, #tpu.memory_space<vmem>>, %arg5: memref<1x32xf32, #tpu.memory_space<vmem>>, %arg6: memref<32x32xbf16, #tpu.memory_space<vmem>>, %arg7: memref<32x32xbf16, #tpu.memory_space<vmem>>) attributes {dimension_semantics = [#tpu.dimension_semantics<parallel>], iteration_bounds = array<i64: 1>, scalar_prefetch = 0 : i64, scratch_operands = 0 : i64, tpu.core_type = #tpu.core_type<tc>, window_params = [{transform_indices = @transform_0, window_bounds = array<i64: 32, 72>}, {pipeline_mode = #tpu.pipeline_mode<synchronous>, transform_indices = @transform_1, window_bounds = array<i64: 72, 8>}, {pipeline_mode = #tpu.pipeline_mode<synchronous>, transform_indices = @transform_2, window_bounds = array<i64: 1, 8>}, {pipeline_mode = #tpu.pipeline_mode<synchronous>, transform_indices = @transform_3, window_bounds = array<i64: 8, 32>}, {pipeline_mode = #tpu.pipeline_mode<synchronous>, transform_indices = @transform_4, window_bounds = array<i64: 1, 32>}, {transform_indices = @transform_5, window_bounds = array<i64: 32, 32>}, {transform_indices = @transform_6, window_bounds = array<i64: 32, 32>}]} {
    %c0 = arith.constant 0 : index
    %c0_0 = arith.constant 0 : index
    %0 = vector.load %arg1[%c0, %c0_0] : memref<32x72xbf16, #tpu.memory_space<vmem>>, vector<32x72xbf16>
    %c0_1 = arith.constant 0 : index
    %c0_2 = arith.constant 0 : index
    %1 = vector.load %arg2[%c0_1, %c0_2] : memref<72x8xbf16, #tpu.memory_space<vmem>>, vector<72x8xbf16>
    %cst = arith.constant dense<0.000000e+00> : vector<32x8xf32>
    %2 = tpu.matmul %0, %1, %cst {dimension_numbers = #tpu.dot_dimension_numbers<[1], [0], [0], [1], [0, 0, 1, 1], [], []>} : vector<32x72xbf16>, vector<72x8xbf16>, vector<32x8xf32> -> vector<32x8xf32>
    %c0_3 = arith.constant 0 : index
    %c0_4 = arith.constant 0 : index
    %3 = vector.load %arg3[%c0_3, %c0_4] : memref<1x8xf32, #tpu.memory_space<vmem>>, vector<1x8xf32>
    %4 = vector.broadcast %3 : vector<1x8xf32> to vector<32x8xf32>
    %5 = arith.addf %2, %4 : vector<32x8xf32>
    %cst_5 = arith.constant 0.000000e+00 : f32
    %6 = vector.broadcast %cst_5 : f32 to vector<32x8xf32>
    %7 = arith.maximumf %5, %6 : vector<32x8xf32>
    %8 = arith.truncf %7 : vector<32x8xf32> to vector<32x8xbf16>
    %c0_6 = arith.constant 0 : index
    %c0_7 = arith.constant 0 : index
    %9 = vector.load %arg4[%c0_6, %c0_7] : memref<8x32xbf16, #tpu.memory_space<vmem>>, vector<8x32xbf16>
    %cst_8 = arith.constant dense<0.000000e+00> : vector<32x32xf32>
    %10 = tpu.matmul %8, %9, %cst_8 {dimension_numbers = #tpu.dot_dimension_numbers<[1], [0], [0], [1], [0, 0, 1, 1], [], []>} : vector<32x8xbf16>, vector<8x32xbf16>, vector<32x32xf32> -> vector<32x32xf32>
    %c0_9 = arith.constant 0 : index
    %c0_10 = arith.constant 0 : index
    %11 = vector.load %arg5[%c0_9, %c0_10] : memref<1x32xf32, #tpu.memory_space<vmem>>, vector<1x32xf32>
    %12 = vector.broadcast %11 : vector<1x32xf32> to vector<32x32xf32>
    %13 = arith.addf %10, %12 : vector<32x32xf32>
    %c0_11 = arith.constant 0 : index
    %c0_12 = arith.constant 0 : index
    %14 = vector.load %arg6[%c0_11, %c0_12] : memref<32x32xbf16, #tpu.memory_space<vmem>>, vector<32x32xbf16>
    %15 = arith.extf %14 : vector<32x32xbf16> to vector<32x32xf32>
    %16 = arith.addf %13, %15 : vector<32x32xf32>
    %cst_13 = arith.constant 0.000000e+00 : f32
    %17 = vector.broadcast %cst_13 : f32 to vector<32x32xf32>
    %18 = arith.maximumf %16, %17 : vector<32x32xf32>
    %19 = arith.truncf %18 : vector<32x32xf32> to vector<32x32xbf16>
    %c0_14 = arith.constant 0 : index
    %c0_15 = arith.constant 0 : index
    %20 = vector.load %arg7[%c0_14, %c0_15] : memref<32x32xbf16, #tpu.memory_space<vmem>>, vector<32x32xbf16>
    tpu.vector_store %arg7[%c0_14, %c0_15], %19 {strides = array<i32>} : memref<32x32xbf16, #tpu.memory_space<vmem>>, vector<32x32xbf16>,
    return
  }
  func.func @transform_0(%arg0: i32) -> (i32, i32) {
    %c0_i32 = arith.constant 0 : i32
    %c0_i32_0 = arith.constant 0 : i32
    return %arg0, %c0_i32 : i32, i32
  }
  func.func @transform_1(%arg0: i32) -> (i32, i32) {
    %c0_i32 = arith.constant 0 : i32
    %c0_i32_0 = arith.constant 0 : i32
    %c0_i32_1 = arith.constant 0 : i32
    return %c0_i32, %c0_i32_0 : i32, i32
  }
  func.func @transform_2(%arg0: i32) -> (i32, i32) {
    %c0_i32 = arith.constant 0 : i32
    %c0_i32_0 = arith.constant 0 : i32
    %c0_i32_1 = arith.constant 0 : i32
    return %c0_i32, %c0_i32_0 : i32, i32
  }
  func.func @transform_3(%arg0: i32) -> (i32, i32) {
    %c0_i32 = arith.constant 0 : i32
    %c0_i32_0 = arith.constant 0 : i32
    %c0_i32_1 = arith.constant 0 : i32
    return %c0_i32, %c0_i32_0 : i32, i32
  }
  func.func @transform_4(%arg0: i32) -> (i32, i32) {
    %c0_i32 = arith.constant 0 : i32
    %c0_i32_0 = arith.constant 0 : i32
    %c0_i32_1 = arith.constant 0 : i32
    return %c0_i32, %c0_i32_0 : i32, i32
  }
  func.func @transform_5(%arg0: i32) -> (i32, i32) {
    %c0_i32 = arith.constant 0 : i32
    %c0_i32_0 = arith.constant 0 : i32
    return %arg0, %c0_i32 : i32, i32
  }
  func.func @transform_6(%arg0: i32) -> (i32, i32) {
    %c0_i32 = arith.constant 0 : i32
    %c0_i32_0 = arith.constant 0 : i32
    return %arg0, %c0_i32 : i32, i32
  }
}

module attributes {stable_mosaic.version = 11 : i64} {
  func.func @_mm_bias_act_kernel(%arg0: i32, %arg1: memref<32x32xbf16, #tpu.memory_space<vmem>>, %arg2: memref<32x16xbf16, #tpu.memory_space<vmem>>, %arg3: memref<1x16xf32, #tpu.memory_space<vmem>>, %arg4: memref<32x16xbf16, #tpu.memory_space<vmem>>) attributes {dimension_semantics = [#tpu.dimension_semantics<parallel>], iteration_bounds = array<i64: 1>, scalar_prefetch = 0 : i64, scratch_operands = 0 : i64, tpu.core_type = #tpu.core_type<tc>, window_params = [{transform_indices = @transform_0, window_bounds = array<i64: 32, 32>}, {pipeline_mode = #tpu.pipeline_mode<synchronous>, transform_indices = @transform_1, window_bounds = array<i64: 32, 16>}, {pipeline_mode = #tpu.pipeline_mode<synchronous>, transform_indices = @transform_2, window_bounds = array<i64: 1, 16>}, {transform_indices = @transform_3, window_bounds = array<i64: 32, 16>}]} {
    %c0 = arith.constant 0 : index
    %c0_0 = arith.constant 0 : index
    %0 = vector.load %arg1[%c0, %c0_0] : memref<32x32xbf16, #tpu.memory_space<vmem>>, vector<32x32xbf16>
    %c0_1 = arith.constant 0 : index
    %c0_2 = arith.constant 0 : index
    %1 = vector.load %arg2[%c0_1, %c0_2] : memref<32x16xbf16, #tpu.memory_space<vmem>>, vector<32x16xbf16>
    %cst = arith.constant dense<0.000000e+00> : vector<32x16xf32>
    %2 = tpu.matmul %0, %1, %cst {dimension_numbers = #tpu.dot_dimension_numbers<[1], [0], [0], [1], [0, 0, 1, 1], [], []>} : vector<32x32xbf16>, vector<32x16xbf16>, vector<32x16xf32> -> vector<32x16xf32>
    %c0_3 = arith.constant 0 : index
    %c0_4 = arith.constant 0 : index
    %3 = vector.load %arg3[%c0_3, %c0_4] : memref<1x16xf32, #tpu.memory_space<vmem>>, vector<1x16xf32>
    %4 = vector.broadcast %3 : vector<1x16xf32> to vector<32x16xf32>
    %5 = arith.addf %2, %4 : vector<32x16xf32>
    %cst_5 = arith.constant 0.000000e+00 : f32
    %6 = vector.broadcast %cst_5 : f32 to vector<32x16xf32>
    %7 = arith.maximumf %5, %6 : vector<32x16xf32>
    %8 = arith.truncf %7 : vector<32x16xf32> to vector<32x16xbf16>
    %c0_6 = arith.constant 0 : index
    %c0_7 = arith.constant 0 : index
    %9 = vector.load %arg4[%c0_6, %c0_7] : memref<32x16xbf16, #tpu.memory_space<vmem>>, vector<32x16xbf16>
    tpu.vector_store %arg4[%c0_6, %c0_7], %8 {strides = array<i32>} : memref<32x16xbf16, #tpu.memory_space<vmem>>, vector<32x16xbf16>,
    return
  }
  func.func @transform_0(%arg0: i32) -> (i32, i32) {
    %c0_i32 = arith.constant 0 : i32
    %c0_i32_0 = arith.constant 0 : i32
    return %arg0, %c0_i32 : i32, i32
  }
  func.func @transform_1(%arg0: i32) -> (i32, i32) {
    %c0_i32 = arith.constant 0 : i32
    %c0_i32_0 = arith.constant 0 : i32
    %c0_i32_1 = arith.constant 0 : i32
    return %c0_i32, %c0_i32_0 : i32, i32
  }
  func.func @transform_2(%arg0: i32) -> (i32, i32) {
    %c0_i32 = arith.constant 0 : i32
    %c0_i32_0 = arith.constant 0 : i32
    %c0_i32_1 = arith.constant 0 : i32
    return %c0_i32, %c0_i32_0 : i32, i32
  }
  func.func @transform_3(%arg0: i32) -> (i32, i32) {
    %c0_i32 = arith.constant 0 : i32
    %c0_i32_0 = arith.constant 0 : i32
    return %arg0, %c0_i32 : i32, i32
  }
}

module attributes {stable_mosaic.version = 11 : i64} {
  func.func @_mm_bias_act_kernel(%arg0: i32, %arg1: memref<8x64xbf16, #tpu.memory_space<vmem>>, %arg2: memref<64x16xbf16, #tpu.memory_space<vmem>>, %arg3: memref<1x16xf32, #tpu.memory_space<vmem>>, %arg4: memref<8x16xbf16, #tpu.memory_space<vmem>>) attributes {dimension_semantics = [#tpu.dimension_semantics<parallel>], iteration_bounds = array<i64: 1>, scalar_prefetch = 0 : i64, scratch_operands = 0 : i64, tpu.core_type = #tpu.core_type<tc>, window_params = [{transform_indices = @transform_0, window_bounds = array<i64: 8, 64>}, {pipeline_mode = #tpu.pipeline_mode<synchronous>, transform_indices = @transform_1, window_bounds = array<i64: 64, 16>}, {pipeline_mode = #tpu.pipeline_mode<synchronous>, transform_indices = @transform_2, window_bounds = array<i64: 1, 16>}, {transform_indices = @transform_3, window_bounds = array<i64: 8, 16>}]} {
    %c0 = arith.constant 0 : index
    %c0_0 = arith.constant 0 : index
    %0 = vector.load %arg1[%c0, %c0_0] : memref<8x64xbf16, #tpu.memory_space<vmem>>, vector<8x64xbf16>
    %c0_1 = arith.constant 0 : index
    %c0_2 = arith.constant 0 : index
    %1 = vector.load %arg2[%c0_1, %c0_2] : memref<64x16xbf16, #tpu.memory_space<vmem>>, vector<64x16xbf16>
    %cst = arith.constant dense<0.000000e+00> : vector<8x16xf32>
    %2 = tpu.matmul %0, %1, %cst {dimension_numbers = #tpu.dot_dimension_numbers<[1], [0], [0], [1], [0, 0, 1, 1], [], []>} : vector<8x64xbf16>, vector<64x16xbf16>, vector<8x16xf32> -> vector<8x16xf32>
    %c0_3 = arith.constant 0 : index
    %c0_4 = arith.constant 0 : index
    %3 = vector.load %arg3[%c0_3, %c0_4] : memref<1x16xf32, #tpu.memory_space<vmem>>, vector<1x16xf32>
    %4 = vector.broadcast %3 : vector<1x16xf32> to vector<8x16xf32>
    %5 = arith.addf %2, %4 : vector<8x16xf32>
    %cst_5 = arith.constant 0.000000e+00 : f32
    %6 = vector.broadcast %cst_5 : f32 to vector<8x16xf32>
    %7 = arith.maximumf %5, %6 : vector<8x16xf32>
    %8 = arith.truncf %7 : vector<8x16xf32> to vector<8x16xbf16>
    %c0_6 = arith.constant 0 : index
    %c0_7 = arith.constant 0 : index
    %9 = vector.load %arg4[%c0_6, %c0_7] : memref<8x16xbf16, #tpu.memory_space<vmem>>, vector<8x16xbf16>
    tpu.vector_store %arg4[%c0_6, %c0_7], %8 {strides = array<i32>} : memref<8x16xbf16, #tpu.memory_space<vmem>>, vector<8x16xbf16>,
    return
  }
  func.func @transform_0(%arg0: i32) -> (i32, i32) {
    %c0_i32 = arith.constant 0 : i32
    %c0_i32_0 = arith.constant 0 : i32
    return %arg0, %c0_i32 : i32, i32
  }
  func.func @transform_1(%arg0: i32) -> (i32, i32) {
    %c0_i32 = arith.constant 0 : i32
    %c0_i32_0 = arith.constant 0 : i32
    %c0_i32_1 = arith.constant 0 : i32
    return %c0_i32, %c0_i32_0 : i32, i32
  }
  func.func @transform_2(%arg0: i32) -> (i32, i32) {
    %c0_i32 = arith.constant 0 : i32
    %c0_i32_0 = arith.constant 0 : i32
    %c0_i32_1 = arith.constant 0 : i32
    return %c0_i32, %c0_i32_0 : i32, i32
  }
  func.func @transform_3(%arg0: i32) -> (i32, i32) {
    %c0_i32 = arith.constant 0 : i32
    %c0_i32_0 = arith.constant 0 : i32
    return %arg0, %c0_i32 : i32, i32
  }
}

module attributes {stable_mosaic.version = 11 : i64} {
  func.func @_tail_ds_kernel(%arg0: i32, %arg1: memref<8x144xbf16, #tpu.memory_space<vmem>>, %arg2: memref<144x16xbf16, #tpu.memory_space<vmem>>, %arg3: memref<1x16xf32, #tpu.memory_space<vmem>>, %arg4: memref<16x64xbf16, #tpu.memory_space<vmem>>, %arg5: memref<1x64xf32, #tpu.memory_space<vmem>>, %arg6: memref<8x32xbf16, #tpu.memory_space<vmem>>, %arg7: memref<32x64xbf16, #tpu.memory_space<vmem>>, %arg8: memref<1x64xf32, #tpu.memory_space<vmem>>, %arg9: memref<8x64xbf16, #tpu.memory_space<vmem>>) attributes {dimension_semantics = [#tpu.dimension_semantics<parallel>], iteration_bounds = array<i64: 1>, scalar_prefetch = 0 : i64, scratch_operands = 0 : i64, tpu.core_type = #tpu.core_type<tc>, window_params = [{transform_indices = @transform_0, window_bounds = array<i64: 8, 144>}, {pipeline_mode = #tpu.pipeline_mode<synchronous>, transform_indices = @transform_1, window_bounds = array<i64: 144, 16>}, {pipeline_mode = #tpu.pipeline_mode<synchronous>, transform_indices = @transform_2, window_bounds = array<i64: 1, 16>}, {pipeline_mode = #tpu.pipeline_mode<synchronous>, transform_indices = @transform_3, window_bounds = array<i64: 16, 64>}, {pipeline_mode = #tpu.pipeline_mode<synchronous>, transform_indices = @transform_4, window_bounds = array<i64: 1, 64>}, {transform_indices = @transform_5, window_bounds = array<i64: 8, 32>}, {pipeline_mode = #tpu.pipeline_mode<synchronous>, transform_indices = @transform_6, window_bounds = array<i64: 32, 64>}, {pipeline_mode = #tpu.pipeline_mode<synchronous>, transform_indices = @transform_7, window_bounds = array<i64: 1, 64>}, {transform_indices = @transform_8, window_bounds = array<i64: 8, 64>}]} {
    %c0 = arith.constant 0 : index
    %c0_0 = arith.constant 0 : index
    %0 = vector.load %arg6[%c0, %c0_0] : memref<8x32xbf16, #tpu.memory_space<vmem>>, vector<8x32xbf16>
    %c0_1 = arith.constant 0 : index
    %c0_2 = arith.constant 0 : index
    %1 = vector.load %arg7[%c0_1, %c0_2] : memref<32x64xbf16, #tpu.memory_space<vmem>>, vector<32x64xbf16>
    %cst = arith.constant dense<0.000000e+00> : vector<8x64xf32>
    %2 = tpu.matmul %0, %1, %cst {dimension_numbers = #tpu.dot_dimension_numbers<[1], [0], [0], [1], [0, 0, 1, 1], [], []>} : vector<8x32xbf16>, vector<32x64xbf16>, vector<8x64xf32> -> vector<8x64xf32>
    %c0_3 = arith.constant 0 : index
    %c0_4 = arith.constant 0 : index
    %3 = vector.load %arg8[%c0_3, %c0_4] : memref<1x64xf32, #tpu.memory_space<vmem>>, vector<1x64xf32>
    %4 = vector.broadcast %3 : vector<1x64xf32> to vector<8x64xf32>
    %5 = arith.addf %2, %4 : vector<8x64xf32>
    %c0_5 = arith.constant 0 : index
    %c0_6 = arith.constant 0 : index
    %6 = vector.load %arg1[%c0_5, %c0_6] : memref<8x144xbf16, #tpu.memory_space<vmem>>, vector<8x144xbf16>
    %c0_7 = arith.constant 0 : index
    %c0_8 = arith.constant 0 : index
    %7 = vector.load %arg2[%c0_7, %c0_8] : memref<144x16xbf16, #tpu.memory_space<vmem>>, vector<144x16xbf16>
    %cst_9 = arith.constant dense<0.000000e+00> : vector<8x16xf32>
    %8 = tpu.matmul %6, %7, %cst_9 {dimension_numbers = #tpu.dot_dimension_numbers<[1], [0], [0], [1], [0, 0, 1, 1], [], []>} : vector<8x144xbf16>, vector<144x16xbf16>, vector<8x16xf32> -> vector<8x16xf32>
    %c0_10 = arith.constant 0 : index
    %c0_11 = arith.constant 0 : index
    %9 = vector.load %arg3[%c0_10, %c0_11] : memref<1x16xf32, #tpu.memory_space<vmem>>, vector<1x16xf32>
    %10 = vector.broadcast %9 : vector<1x16xf32> to vector<8x16xf32>
    %11 = arith.addf %8, %10 : vector<8x16xf32>
    %cst_12 = arith.constant 0.000000e+00 : f32
    %12 = vector.broadcast %cst_12 : f32 to vector<8x16xf32>
    %13 = arith.maximumf %11, %12 : vector<8x16xf32>
    %14 = arith.truncf %13 : vector<8x16xf32> to vector<8x16xbf16>
    %c0_13 = arith.constant 0 : index
    %c0_14 = arith.constant 0 : index
    %15 = vector.load %arg4[%c0_13, %c0_14] : memref<16x64xbf16, #tpu.memory_space<vmem>>, vector<16x64xbf16>
    %cst_15 = arith.constant dense<0.000000e+00> : vector<8x64xf32>
    %16 = tpu.matmul %14, %15, %cst_15 {dimension_numbers = #tpu.dot_dimension_numbers<[1], [0], [0], [1], [0, 0, 1, 1], [], []>} : vector<8x16xbf16>, vector<16x64xbf16>, vector<8x64xf32> -> vector<8x64xf32>
    %c0_16 = arith.constant 0 : index
    %c0_17 = arith.constant 0 : index
    %17 = vector.load %arg5[%c0_16, %c0_17] : memref<1x64xf32, #tpu.memory_space<vmem>>, vector<1x64xf32>
    %18 = vector.broadcast %17 : vector<1x64xf32> to vector<8x64xf32>
    %19 = arith.addf %16, %18 : vector<8x64xf32>
    %20 = arith.addf %19, %5 : vector<8x64xf32>
    %cst_18 = arith.constant 0.000000e+00 : f32
    %21 = vector.broadcast %cst_18 : f32 to vector<8x64xf32>
    %22 = arith.maximumf %20, %21 : vector<8x64xf32>
    %23 = arith.truncf %22 : vector<8x64xf32> to vector<8x64xbf16>
    %c0_19 = arith.constant 0 : index
    %c0_20 = arith.constant 0 : index
    %24 = vector.load %arg9[%c0_19, %c0_20] : memref<8x64xbf16, #tpu.memory_space<vmem>>, vector<8x64xbf16>
    tpu.vector_store %arg9[%c0_19, %c0_20], %23 {strides = array<i32>} : memref<8x64xbf16, #tpu.memory_space<vmem>>, vector<8x64xbf16>,
    return
  }
  func.func @transform_0(%arg0: i32) -> (i32, i32) {
    %c0_i32 = arith.constant 0 : i32
    %c0_i32_0 = arith.constant 0 : i32
    return %arg0, %c0_i32 : i32, i32
  }
  func.func @transform_1(%arg0: i32) -> (i32, i32) {
    %c0_i32 = arith.constant 0 : i32
    %c0_i32_0 = arith.constant 0 : i32
    %c0_i32_1 = arith.constant 0 : i32
    return %c0_i32, %c0_i32_0 : i32, i32
  }
  func.func @transform_2(%arg0: i32) -> (i32, i32) {
    %c0_i32 = arith.constant 0 : i32
    %c0_i32_0 = arith.constant 0 : i32
    %c0_i32_1 = arith.constant 0 : i32
    return %c0_i32, %c0_i32_0 : i32, i32
  }
  func.func @transform_3(%arg0: i32) -> (i32, i32) {
    %c0_i32 = arith.constant 0 : i32
    %c0_i32_0 = arith.constant 0 : i32
    %c0_i32_1 = arith.constant 0 : i32
    return %c0_i32, %c0_i32_0 : i32, i32
  }
  func.func @transform_4(%arg0: i32) -> (i32, i32) {
    %c0_i32 = arith.constant 0 : i32
    %c0_i32_0 = arith.constant 0 : i32
    %c0_i32_1 = arith.constant 0 : i32
    return %c0_i32, %c0_i32_0 : i32, i32
  }
  func.func @transform_5(%arg0: i32) -> (i32, i32) {
    %c0_i32 = arith.constant 0 : i32
    %c0_i32_0 = arith.constant 0 : i32
    return %arg0, %c0_i32 : i32, i32
  }
  func.func @transform_6(%arg0: i32) -> (i32, i32) {
    %c0_i32 = arith.constant 0 : i32
    %c0_i32_0 = arith.constant 0 : i32
    %c0_i32_1 = arith.constant 0 : i32
    return %c0_i32, %c0_i32_0 : i32, i32
  }
  func.func @transform_7(%arg0: i32) -> (i32, i32) {
    %c0_i32 = arith.constant 0 : i32
    %c0_i32_0 = arith.constant 0 : i32
    %c0_i32_1 = arith.constant 0 : i32
    return %c0_i32, %c0_i32_0 : i32, i32
  }
  func.func @transform_8(%arg0: i32) -> (i32, i32) {
    %c0_i32 = arith.constant 0 : i32
    %c0_i32_0 = arith.constant 0 : i32
    return %arg0, %c0_i32 : i32, i32
  }
}

module attributes {stable_mosaic.version = 11 : i64} {
  func.func @_tail_kernel(%arg0: i32, %arg1: memref<8x144xbf16, #tpu.memory_space<vmem>>, %arg2: memref<144x16xbf16, #tpu.memory_space<vmem>>, %arg3: memref<1x16xf32, #tpu.memory_space<vmem>>, %arg4: memref<16x64xbf16, #tpu.memory_space<vmem>>, %arg5: memref<1x64xf32, #tpu.memory_space<vmem>>, %arg6: memref<8x64xbf16, #tpu.memory_space<vmem>>, %arg7: memref<8x64xbf16, #tpu.memory_space<vmem>>) attributes {dimension_semantics = [#tpu.dimension_semantics<parallel>], iteration_bounds = array<i64: 1>, scalar_prefetch = 0 : i64, scratch_operands = 0 : i64, tpu.core_type = #tpu.core_type<tc>, window_params = [{transform_indices = @transform_0, window_bounds = array<i64: 8, 144>}, {pipeline_mode = #tpu.pipeline_mode<synchronous>, transform_indices = @transform_1, window_bounds = array<i64: 144, 16>}, {pipeline_mode = #tpu.pipeline_mode<synchronous>, transform_indices = @transform_2, window_bounds = array<i64: 1, 16>}, {pipeline_mode = #tpu.pipeline_mode<synchronous>, transform_indices = @transform_3, window_bounds = array<i64: 16, 64>}, {pipeline_mode = #tpu.pipeline_mode<synchronous>, transform_indices = @transform_4, window_bounds = array<i64: 1, 64>}, {transform_indices = @transform_5, window_bounds = array<i64: 8, 64>}, {transform_indices = @transform_6, window_bounds = array<i64: 8, 64>}]} {
    %c0 = arith.constant 0 : index
    %c0_0 = arith.constant 0 : index
    %0 = vector.load %arg1[%c0, %c0_0] : memref<8x144xbf16, #tpu.memory_space<vmem>>, vector<8x144xbf16>
    %c0_1 = arith.constant 0 : index
    %c0_2 = arith.constant 0 : index
    %1 = vector.load %arg2[%c0_1, %c0_2] : memref<144x16xbf16, #tpu.memory_space<vmem>>, vector<144x16xbf16>
    %cst = arith.constant dense<0.000000e+00> : vector<8x16xf32>
    %2 = tpu.matmul %0, %1, %cst {dimension_numbers = #tpu.dot_dimension_numbers<[1], [0], [0], [1], [0, 0, 1, 1], [], []>} : vector<8x144xbf16>, vector<144x16xbf16>, vector<8x16xf32> -> vector<8x16xf32>
    %c0_3 = arith.constant 0 : index
    %c0_4 = arith.constant 0 : index
    %3 = vector.load %arg3[%c0_3, %c0_4] : memref<1x16xf32, #tpu.memory_space<vmem>>, vector<1x16xf32>
    %4 = vector.broadcast %3 : vector<1x16xf32> to vector<8x16xf32>
    %5 = arith.addf %2, %4 : vector<8x16xf32>
    %cst_5 = arith.constant 0.000000e+00 : f32
    %6 = vector.broadcast %cst_5 : f32 to vector<8x16xf32>
    %7 = arith.maximumf %5, %6 : vector<8x16xf32>
    %8 = arith.truncf %7 : vector<8x16xf32> to vector<8x16xbf16>
    %c0_6 = arith.constant 0 : index
    %c0_7 = arith.constant 0 : index
    %9 = vector.load %arg4[%c0_6, %c0_7] : memref<16x64xbf16, #tpu.memory_space<vmem>>, vector<16x64xbf16>
    %cst_8 = arith.constant dense<0.000000e+00> : vector<8x64xf32>
    %10 = tpu.matmul %8, %9, %cst_8 {dimension_numbers = #tpu.dot_dimension_numbers<[1], [0], [0], [1], [0, 0, 1, 1], [], []>} : vector<8x16xbf16>, vector<16x64xbf16>, vector<8x64xf32> -> vector<8x64xf32>
    %c0_9 = arith.constant 0 : index
    %c0_10 = arith.constant 0 : index
    %11 = vector.load %arg5[%c0_9, %c0_10] : memref<1x64xf32, #tpu.memory_space<vmem>>, vector<1x64xf32>
    %12 = vector.broadcast %11 : vector<1x64xf32> to vector<8x64xf32>
    %13 = arith.addf %10, %12 : vector<8x64xf32>
    %c0_11 = arith.constant 0 : index
    %c0_12 = arith.constant 0 : index
    %14 = vector.load %arg6[%c0_11, %c0_12] : memref<8x64xbf16, #tpu.memory_space<vmem>>, vector<8x64xbf16>
    %15 = arith.extf %14 : vector<8x64xbf16> to vector<8x64xf32>
    %16 = arith.addf %13, %15 : vector<8x64xf32>
    %cst_13 = arith.constant 0.000000e+00 : f32
    %17 = vector.broadcast %cst_13 : f32 to vector<8x64xf32>
    %18 = arith.maximumf %16, %17 : vector<8x64xf32>
    %19 = arith.truncf %18 : vector<8x64xf32> to vector<8x64xbf16>
    %c0_14 = arith.constant 0 : index
    %c0_15 = arith.constant 0 : index
    %20 = vector.load %arg7[%c0_14, %c0_15] : memref<8x64xbf16, #tpu.memory_space<vmem>>, vector<8x64xbf16>
    tpu.vector_store %arg7[%c0_14, %c0_15], %19 {strides = array<i32>} : memref<8x64xbf16, #tpu.memory_space<vmem>>, vector<8x64xbf16>,
    return
  }
  func.func @transform_0(%arg0: i32) -> (i32, i32) {
    %c0_i32 = arith.constant 0 : i32
    %c0_i32_0 = arith.constant 0 : i32
    return %arg0, %c0_i32 : i32, i32
  }
  func.func @transform_1(%arg0: i32) -> (i32, i32) {
    %c0_i32 = arith.constant 0 : i32
    %c0_i32_0 = arith.constant 0 : i32
    %c0_i32_1 = arith.constant 0 : i32
    return %c0_i32, %c0_i32_0 : i32, i32
  }
  func.func @transform_2(%arg0: i32) -> (i32, i32) {
    %c0_i32 = arith.constant 0 : i32
    %c0_i32_0 = arith.constant 0 : i32
    %c0_i32_1 = arith.constant 0 : i32
    return %c0_i32, %c0_i32_0 : i32, i32
  }
  func.func @transform_3(%arg0: i32) -> (i32, i32) {
    %c0_i32 = arith.constant 0 : i32
    %c0_i32_0 = arith.constant 0 : i32
    %c0_i32_1 = arith.constant 0 : i32
    return %c0_i32, %c0_i32_0 : i32, i32
  }
  func.func @transform_4(%arg0: i32) -> (i32, i32) {
    %c0_i32 = arith.constant 0 : i32
    %c0_i32_0 = arith.constant 0 : i32
    %c0_i32_1 = arith.constant 0 : i32
    return %c0_i32, %c0_i32_0 : i32, i32
  }
  func.func @transform_5(%arg0: i32) -> (i32, i32) {
    %c0_i32 = arith.constant 0 : i32
    %c0_i32_0 = arith.constant 0 : i32
    return %arg0, %c0_i32 : i32, i32
  }
  func.func @transform_6(%arg0: i32) -> (i32, i32) {
    %c0_i32 = arith.constant 0 : i32
    %c0_i32_0 = arith.constant 0 : i32
    return %arg0, %c0_i32 : i32, i32
  }
}

module attributes {stable_mosaic.version = 11 : i64} {
  func.func @_mm_bias_act_kernel(%arg0: i32, %arg1: memref<8x64xbf16, #tpu.memory_space<vmem>>, %arg2: memref<64x32xbf16, #tpu.memory_space<vmem>>, %arg3: memref<1x32xf32, #tpu.memory_space<vmem>>, %arg4: memref<8x32xbf16, #tpu.memory_space<vmem>>) attributes {dimension_semantics = [#tpu.dimension_semantics<parallel>], iteration_bounds = array<i64: 1>, scalar_prefetch = 0 : i64, scratch_operands = 0 : i64, tpu.core_type = #tpu.core_type<tc>, window_params = [{transform_indices = @transform_0, window_bounds = array<i64: 8, 64>}, {pipeline_mode = #tpu.pipeline_mode<synchronous>, transform_indices = @transform_1, window_bounds = array<i64: 64, 32>}, {pipeline_mode = #tpu.pipeline_mode<synchronous>, transform_indices = @transform_2, window_bounds = array<i64: 1, 32>}, {transform_indices = @transform_3, window_bounds = array<i64: 8, 32>}]} {
    %c0 = arith.constant 0 : index
    %c0_0 = arith.constant 0 : index
    %0 = vector.load %arg1[%c0, %c0_0] : memref<8x64xbf16, #tpu.memory_space<vmem>>, vector<8x64xbf16>
    %c0_1 = arith.constant 0 : index
    %c0_2 = arith.constant 0 : index
    %1 = vector.load %arg2[%c0_1, %c0_2] : memref<64x32xbf16, #tpu.memory_space<vmem>>, vector<64x32xbf16>
    %cst = arith.constant dense<0.000000e+00> : vector<8x32xf32>
    %2 = tpu.matmul %0, %1, %cst {dimension_numbers = #tpu.dot_dimension_numbers<[1], [0], [0], [1], [0, 0, 1, 1], [], []>} : vector<8x64xbf16>, vector<64x32xbf16>, vector<8x32xf32> -> vector<8x32xf32>
    %c0_3 = arith.constant 0 : index
    %c0_4 = arith.constant 0 : index
    %3 = vector.load %arg3[%c0_3, %c0_4] : memref<1x32xf32, #tpu.memory_space<vmem>>, vector<1x32xf32>
    %4 = vector.broadcast %3 : vector<1x32xf32> to vector<8x32xf32>
    %5 = arith.addf %2, %4 : vector<8x32xf32>
    %cst_5 = arith.constant 0.000000e+00 : f32
    %6 = vector.broadcast %cst_5 : f32 to vector<8x32xf32>
    %7 = arith.maximumf %5, %6 : vector<8x32xf32>
    %8 = arith.truncf %7 : vector<8x32xf32> to vector<8x32xbf16>
    %c0_6 = arith.constant 0 : index
    %c0_7 = arith.constant 0 : index
    %9 = vector.load %arg4[%c0_6, %c0_7] : memref<8x32xbf16, #tpu.memory_space<vmem>>, vector<8x32xbf16>
    tpu.vector_store %arg4[%c0_6, %c0_7], %8 {strides = array<i32>} : memref<8x32xbf16, #tpu.memory_space<vmem>>, vector<8x32xbf16>,
    return
  }
  func.func @transform_0(%arg0: i32) -> (i32, i32) {
    %c0_i32 = arith.constant 0 : i32
    %c0_i32_0 = arith.constant 0 : i32
    return %arg0, %c0_i32 : i32, i32
  }
  func.func @transform_1(%arg0: i32) -> (i32, i32) {
    %c0_i32 = arith.constant 0 : i32
    %c0_i32_0 = arith.constant 0 : i32
    %c0_i32_1 = arith.constant 0 : i32
    return %c0_i32, %c0_i32_0 : i32, i32
  }
  func.func @transform_2(%arg0: i32) -> (i32, i32) {
    %c0_i32 = arith.constant 0 : i32
    %c0_i32_0 = arith.constant 0 : i32
    %c0_i32_1 = arith.constant 0 : i32
    return %c0_i32, %c0_i32_0 : i32, i32
  }
  func.func @transform_3(%arg0: i32) -> (i32, i32) {
    %c0_i32 = arith.constant 0 : i32
    %c0_i32_0 = arith.constant 0 : i32
    return %arg0, %c0_i32 : i32, i32
  }
}

module attributes {stable_mosaic.version = 11 : i64} {
  func.func @_tail_ds_kernel(%arg0: i32, %arg1: memref<2x288xbf16, #tpu.memory_space<vmem>>, %arg2: memref<288x32xbf16, #tpu.memory_space<vmem>>, %arg3: memref<1x32xf32, #tpu.memory_space<vmem>>, %arg4: memref<32x128xbf16, #tpu.memory_space<vmem>>, %arg5: memref<1x128xf32, #tpu.memory_space<vmem>>, %arg6: memref<2x64xbf16, #tpu.memory_space<vmem>>, %arg7: memref<64x128xbf16, #tpu.memory_space<vmem>>, %arg8: memref<1x128xf32, #tpu.memory_space<vmem>>, %arg9: memref<2x128xbf16, #tpu.memory_space<vmem>>) attributes {dimension_semantics = [#tpu.dimension_semantics<parallel>], iteration_bounds = array<i64: 1>, scalar_prefetch = 0 : i64, scratch_operands = 0 : i64, tpu.core_type = #tpu.core_type<tc>, window_params = [{transform_indices = @transform_0, window_bounds = array<i64: 2, 288>}, {pipeline_mode = #tpu.pipeline_mode<synchronous>, transform_indices = @transform_1, window_bounds = array<i64: 288, 32>}, {pipeline_mode = #tpu.pipeline_mode<synchronous>, transform_indices = @transform_2, window_bounds = array<i64: 1, 32>}, {pipeline_mode = #tpu.pipeline_mode<synchronous>, transform_indices = @transform_3, window_bounds = array<i64: 32, 128>}, {pipeline_mode = #tpu.pipeline_mode<synchronous>, transform_indices = @transform_4, window_bounds = array<i64: 1, 128>}, {transform_indices = @transform_5, window_bounds = array<i64: 2, 64>}, {pipeline_mode = #tpu.pipeline_mode<synchronous>, transform_indices = @transform_6, window_bounds = array<i64: 64, 128>}, {pipeline_mode = #tpu.pipeline_mode<synchronous>, transform_indices = @transform_7, window_bounds = array<i64: 1, 128>}, {transform_indices = @transform_8, window_bounds = array<i64: 2, 128>}]} {
    %c0 = arith.constant 0 : index
    %c0_0 = arith.constant 0 : index
    %0 = vector.load %arg6[%c0, %c0_0] : memref<2x64xbf16, #tpu.memory_space<vmem>>, vector<2x64xbf16>
    %c0_1 = arith.constant 0 : index
    %c0_2 = arith.constant 0 : index
    %1 = vector.load %arg7[%c0_1, %c0_2] : memref<64x128xbf16, #tpu.memory_space<vmem>>, vector<64x128xbf16>
    %cst = arith.constant dense<0.000000e+00> : vector<2x128xf32>
    %2 = tpu.matmul %0, %1, %cst {dimension_numbers = #tpu.dot_dimension_numbers<[1], [0], [0], [1], [0, 0, 1, 1], [], []>} : vector<2x64xbf16>, vector<64x128xbf16>, vector<2x128xf32> -> vector<2x128xf32>
    %c0_3 = arith.constant 0 : index
    %c0_4 = arith.constant 0 : index
    %3 = vector.load %arg8[%c0_3, %c0_4] : memref<1x128xf32, #tpu.memory_space<vmem>>, vector<1x128xf32>
    %4 = vector.broadcast %3 : vector<1x128xf32> to vector<2x128xf32>
    %5 = arith.addf %2, %4 : vector<2x128xf32>
    %c0_5 = arith.constant 0 : index
    %c0_6 = arith.constant 0 : index
    %6 = vector.load %arg1[%c0_5, %c0_6] : memref<2x288xbf16, #tpu.memory_space<vmem>>, vector<2x288xbf16>
    %c0_7 = arith.constant 0 : index
    %c0_8 = arith.constant 0 : index
    %7 = vector.load %arg2[%c0_7, %c0_8] : memref<288x32xbf16, #tpu.memory_space<vmem>>, vector<288x32xbf16>
    %cst_9 = arith.constant dense<0.000000e+00> : vector<2x32xf32>
    %8 = tpu.matmul %6, %7, %cst_9 {dimension_numbers = #tpu.dot_dimension_numbers<[1], [0], [0], [1], [0, 0, 1, 1], [], []>} : vector<2x288xbf16>, vector<288x32xbf16>, vector<2x32xf32> -> vector<2x32xf32>
    %c0_10 = arith.constant 0 : index
    %c0_11 = arith.constant 0 : index
    %9 = vector.load %arg3[%c0_10, %c0_11] : memref<1x32xf32, #tpu.memory_space<vmem>>, vector<1x32xf32>
    %10 = vector.broadcast %9 : vector<1x32xf32> to vector<2x32xf32>
    %11 = arith.addf %8, %10 : vector<2x32xf32>
    %cst_12 = arith.constant 0.000000e+00 : f32
    %12 = vector.broadcast %cst_12 : f32 to vector<2x32xf32>
    %13 = arith.maximumf %11, %12 : vector<2x32xf32>
    %14 = arith.truncf %13 : vector<2x32xf32> to vector<2x32xbf16>
    %c0_13 = arith.constant 0 : index
    %c0_14 = arith.constant 0 : index
    %15 = vector.load %arg4[%c0_13, %c0_14] : memref<32x128xbf16, #tpu.memory_space<vmem>>, vector<32x128xbf16>
    %cst_15 = arith.constant dense<0.000000e+00> : vector<2x128xf32>
    %16 = tpu.matmul %14, %15, %cst_15 {dimension_numbers = #tpu.dot_dimension_numbers<[1], [0], [0], [1], [0, 0, 1, 1], [], []>} : vector<2x32xbf16>, vector<32x128xbf16>, vector<2x128xf32> -> vector<2x128xf32>
    %c0_16 = arith.constant 0 : index
    %c0_17 = arith.constant 0 : index
    %17 = vector.load %arg5[%c0_16, %c0_17] : memref<1x128xf32, #tpu.memory_space<vmem>>, vector<1x128xf32>
    %18 = vector.broadcast %17 : vector<1x128xf32> to vector<2x128xf32>
    %19 = arith.addf %16, %18 : vector<2x128xf32>
    %20 = arith.addf %19, %5 : vector<2x128xf32>
    %cst_18 = arith.constant 0.000000e+00 : f32
    %21 = vector.broadcast %cst_18 : f32 to vector<2x128xf32>
    %22 = arith.maximumf %20, %21 : vector<2x128xf32>
    %23 = arith.truncf %22 : vector<2x128xf32> to vector<2x128xbf16>
    %c0_19 = arith.constant 0 : index
    %c0_20 = arith.constant 0 : index
    %24 = vector.load %arg9[%c0_19, %c0_20] : memref<2x128xbf16, #tpu.memory_space<vmem>>, vector<2x128xbf16>
    tpu.vector_store %arg9[%c0_19, %c0_20], %23 {strides = array<i32>} : memref<2x128xbf16, #tpu.memory_space<vmem>>, vector<2x128xbf16>,
    return
  }
  func.func @transform_0(%arg0: i32) -> (i32, i32) {
    %c0_i32 = arith.constant 0 : i32
    %c0_i32_0 = arith.constant 0 : i32
    return %arg0, %c0_i32 : i32, i32
  }
  func.func @transform_1(%arg0: i32) -> (i32, i32) {
    %c0_i32 = arith.constant 0 : i32
    %c0_i32_0 = arith.constant 0 : i32
    %c0_i32_1 = arith.constant 0 : i32
    return %c0_i32, %c0_i32_0 : i32, i32
  }
  func.func @transform_2(%arg0: i32) -> (i32, i32) {
    %c0_i32 = arith.constant 0 : i32
    %c0_i32_0 = arith.constant 0 : i32
    %c0_i32_1 = arith.constant 0 : i32
    return %c0_i32, %c0_i32_0 : i32, i32
  }
  func.func @transform_3(%arg0: i32) -> (i32, i32) {
    %c0_i32 = arith.constant 0 : i32
    %c0_i32_0 = arith.constant 0 : i32
    %c0_i32_1 = arith.constant 0 : i32
    return %c0_i32, %c0_i32_0 : i32, i32
  }
  func.func @transform_4(%arg0: i32) -> (i32, i32) {
    %c0_i32 = arith.constant 0 : i32
    %c0_i32_0 = arith.constant 0 : i32
    %c0_i32_1 = arith.constant 0 : i32
    return %c0_i32, %c0_i32_0 : i32, i32
  }
  func.func @transform_5(%arg0: i32) -> (i32, i32) {
    %c0_i32 = arith.constant 0 : i32
    %c0_i32_0 = arith.constant 0 : i32
    return %arg0, %c0_i32 : i32, i32
  }
  func.func @transform_6(%arg0: i32) -> (i32, i32) {
    %c0_i32 = arith.constant 0 : i32
    %c0_i32_0 = arith.constant 0 : i32
    %c0_i32_1 = arith.constant 0 : i32
    return %c0_i32, %c0_i32_0 : i32, i32
  }
  func.func @transform_7(%arg0: i32) -> (i32, i32) {
    %c0_i32 = arith.constant 0 : i32
    %c0_i32_0 = arith.constant 0 : i32
    %c0_i32_1 = arith.constant 0 : i32
    return %c0_i32, %c0_i32_0 : i32, i32
  }
  func.func @transform_8(%arg0: i32) -> (i32, i32) {
    %c0_i32 = arith.constant 0 : i32
    %c0_i32_0 = arith.constant 0 : i32
    return %arg0, %c0_i32 : i32, i32
  }
}

module attributes {stable_mosaic.version = 11 : i64} {
  func.func @_mm_bias_act_kernel(%arg0: i32, %arg1: memref<2x128xbf16, #tpu.memory_space<vmem>>, %arg2: memref<128x32xbf16, #tpu.memory_space<vmem>>, %arg3: memref<1x32xf32, #tpu.memory_space<vmem>>, %arg4: memref<2x32xbf16, #tpu.memory_space<vmem>>) attributes {dimension_semantics = [#tpu.dimension_semantics<parallel>], iteration_bounds = array<i64: 1>, scalar_prefetch = 0 : i64, scratch_operands = 0 : i64, tpu.core_type = #tpu.core_type<tc>, window_params = [{transform_indices = @transform_0, window_bounds = array<i64: 2, 128>}, {pipeline_mode = #tpu.pipeline_mode<synchronous>, transform_indices = @transform_1, window_bounds = array<i64: 128, 32>}, {pipeline_mode = #tpu.pipeline_mode<synchronous>, transform_indices = @transform_2, window_bounds = array<i64: 1, 32>}, {transform_indices = @transform_3, window_bounds = array<i64: 2, 32>}]} {
    %c0 = arith.constant 0 : index
    %c0_0 = arith.constant 0 : index
    %0 = vector.load %arg1[%c0, %c0_0] : memref<2x128xbf16, #tpu.memory_space<vmem>>, vector<2x128xbf16>
    %c0_1 = arith.constant 0 : index
    %c0_2 = arith.constant 0 : index
    %1 = vector.load %arg2[%c0_1, %c0_2] : memref<128x32xbf16, #tpu.memory_space<vmem>>, vector<128x32xbf16>
    %cst = arith.constant dense<0.000000e+00> : vector<2x32xf32>
    %2 = tpu.matmul %0, %1, %cst {dimension_numbers = #tpu.dot_dimension_numbers<[1], [0], [0], [1], [0, 0, 1, 1], [], []>} : vector<2x128xbf16>, vector<128x32xbf16>, vector<2x32xf32> -> vector<2x32xf32>
    %c0_3 = arith.constant 0 : index
    %c0_4 = arith.constant 0 : index
    %3 = vector.load %arg3[%c0_3, %c0_4] : memref<1x32xf32, #tpu.memory_space<vmem>>, vector<1x32xf32>
    %4 = vector.broadcast %3 : vector<1x32xf32> to vector<2x32xf32>
    %5 = arith.addf %2, %4 : vector<2x32xf32>
    %cst_5 = arith.constant 0.000000e+00 : f32
    %6 = vector.broadcast %cst_5 : f32 to vector<2x32xf32>
    %7 = arith.maximumf %5, %6 : vector<2x32xf32>
    %8 = arith.truncf %7 : vector<2x32xf32> to vector<2x32xbf16>
    %c0_6 = arith.constant 0 : index
    %c0_7 = arith.constant 0 : index
    %9 = vector.load %arg4[%c0_6, %c0_7] : memref<2x32xbf16, #tpu.memory_space<vmem>>, vector<2x32xbf16>
    tpu.vector_store %arg4[%c0_6, %c0_7], %8 {strides = array<i32>} : memref<2x32xbf16, #tpu.memory_space<vmem>>, vector<2x32xbf16>,
    return
  }
  func.func @transform_0(%arg0: i32) -> (i32, i32) {
    %c0_i32 = arith.constant 0 : i32
    %c0_i32_0 = arith.constant 0 : i32
    return %arg0, %c0_i32 : i32, i32
  }
  func.func @transform_1(%arg0: i32) -> (i32, i32) {
    %c0_i32 = arith.constant 0 : i32
    %c0_i32_0 = arith.constant 0 : i32
    %c0_i32_1 = arith.constant 0 : i32
    return %c0_i32, %c0_i32_0 : i32, i32
  }
  func.func @transform_2(%arg0: i32) -> (i32, i32) {
    %c0_i32 = arith.constant 0 : i32
    %c0_i32_0 = arith.constant 0 : i32
    %c0_i32_1 = arith.constant 0 : i32
    return %c0_i32, %c0_i32_0 : i32, i32
  }
  func.func @transform_3(%arg0: i32) -> (i32, i32) {
    %c0_i32 = arith.constant 0 : i32
    %c0_i32_0 = arith.constant 0 : i32
    return %arg0, %c0_i32 : i32, i32
  }
}

module attributes {stable_mosaic.version = 11 : i64} {
  func.func @_tail_kernel(%arg0: i32, %arg1: memref<2x288xbf16, #tpu.memory_space<vmem>>, %arg2: memref<288x32xbf16, #tpu.memory_space<vmem>>, %arg3: memref<1x32xf32, #tpu.memory_space<vmem>>, %arg4: memref<32x128xbf16, #tpu.memory_space<vmem>>, %arg5: memref<1x128xf32, #tpu.memory_space<vmem>>, %arg6: memref<2x128xbf16, #tpu.memory_space<vmem>>, %arg7: memref<2x128xbf16, #tpu.memory_space<vmem>>) attributes {dimension_semantics = [#tpu.dimension_semantics<parallel>], iteration_bounds = array<i64: 1>, scalar_prefetch = 0 : i64, scratch_operands = 0 : i64, tpu.core_type = #tpu.core_type<tc>, window_params = [{transform_indices = @transform_0, window_bounds = array<i64: 2, 288>}, {pipeline_mode = #tpu.pipeline_mode<synchronous>, transform_indices = @transform_1, window_bounds = array<i64: 288, 32>}, {pipeline_mode = #tpu.pipeline_mode<synchronous>, transform_indices = @transform_2, window_bounds = array<i64: 1, 32>}, {pipeline_mode = #tpu.pipeline_mode<synchronous>, transform_indices = @transform_3, window_bounds = array<i64: 32, 128>}, {pipeline_mode = #tpu.pipeline_mode<synchronous>, transform_indices = @transform_4, window_bounds = array<i64: 1, 128>}, {transform_indices = @transform_5, window_bounds = array<i64: 2, 128>}, {transform_indices = @transform_6, window_bounds = array<i64: 2, 128>}]} {
    %c0 = arith.constant 0 : index
    %c0_0 = arith.constant 0 : index
    %0 = vector.load %arg1[%c0, %c0_0] : memref<2x288xbf16, #tpu.memory_space<vmem>>, vector<2x288xbf16>
    %c0_1 = arith.constant 0 : index
    %c0_2 = arith.constant 0 : index
    %1 = vector.load %arg2[%c0_1, %c0_2] : memref<288x32xbf16, #tpu.memory_space<vmem>>, vector<288x32xbf16>
    %cst = arith.constant dense<0.000000e+00> : vector<2x32xf32>
    %2 = tpu.matmul %0, %1, %cst {dimension_numbers = #tpu.dot_dimension_numbers<[1], [0], [0], [1], [0, 0, 1, 1], [], []>} : vector<2x288xbf16>, vector<288x32xbf16>, vector<2x32xf32> -> vector<2x32xf32>
    %c0_3 = arith.constant 0 : index
    %c0_4 = arith.constant 0 : index
    %3 = vector.load %arg3[%c0_3, %c0_4] : memref<1x32xf32, #tpu.memory_space<vmem>>, vector<1x32xf32>
    %4 = vector.broadcast %3 : vector<1x32xf32> to vector<2x32xf32>
    %5 = arith.addf %2, %4 : vector<2x32xf32>
    %cst_5 = arith.constant 0.000000e+00 : f32
    %6 = vector.broadcast %cst_5 : f32 to vector<2x32xf32>
    %7 = arith.maximumf %5, %6 : vector<2x32xf32>
    %8 = arith.truncf %7 : vector<2x32xf32> to vector<2x32xbf16>
    %c0_6 = arith.constant 0 : index
    %c0_7 = arith.constant 0 : index
    %9 = vector.load %arg4[%c0_6, %c0_7] : memref<32x128xbf16, #tpu.memory_space<vmem>>, vector<32x128xbf16>
    %cst_8 = arith.constant dense<0.000000e+00> : vector<2x128xf32>
    %10 = tpu.matmul %8, %9, %cst_8 {dimension_numbers = #tpu.dot_dimension_numbers<[1], [0], [0], [1], [0, 0, 1, 1], [], []>} : vector<2x32xbf16>, vector<32x128xbf16>, vector<2x128xf32> -> vector<2x128xf32>
    %c0_9 = arith.constant 0 : index
    %c0_10 = arith.constant 0 : index
    %11 = vector.load %arg5[%c0_9, %c0_10] : memref<1x128xf32, #tpu.memory_space<vmem>>, vector<1x128xf32>
    %12 = vector.broadcast %11 : vector<1x128xf32> to vector<2x128xf32>
    %13 = arith.addf %10, %12 : vector<2x128xf32>
    %c0_11 = arith.constant 0 : index
    %c0_12 = arith.constant 0 : index
    %14 = vector.load %arg6[%c0_11, %c0_12] : memref<2x128xbf16, #tpu.memory_space<vmem>>, vector<2x128xbf16>
    %15 = arith.extf %14 : vector<2x128xbf16> to vector<2x128xf32>
    %16 = arith.addf %13, %15 : vector<2x128xf32>
    %cst_13 = arith.constant 0.000000e+00 : f32
    %17 = vector.broadcast %cst_13 : f32 to vector<2x128xf32>
    %18 = arith.maximumf %16, %17 : vector<2x128xf32>
    %19 = arith.truncf %18 : vector<2x128xf32> to vector<2x128xbf16>
    %c0_14 = arith.constant 0 : index
    %c0_15 = arith.constant 0 : index
    %20 = vector.load %arg7[%c0_14, %c0_15] : memref<2x128xbf16, #tpu.memory_space<vmem>>, vector<2x128xbf16>
    tpu.vector_store %arg7[%c0_14, %c0_15], %19 {strides = array<i32>} : memref<2x128xbf16, #tpu.memory_space<vmem>>, vector<2x128xbf16>,
    return
  }
  func.func @transform_0(%arg0: i32) -> (i32, i32) {
    %c0_i32 = arith.constant 0 : i32
    %c0_i32_0 = arith.constant 0 : i32
    return %arg0, %c0_i32 : i32, i32
  }
  func.func @transform_1(%arg0: i32) -> (i32, i32) {
    %c0_i32 = arith.constant 0 : i32
    %c0_i32_0 = arith.constant 0 : i32
    %c0_i32_1 = arith.constant 0 : i32
    return %c0_i32, %c0_i32_0 : i32, i32
  }
  func.func @transform_2(%arg0: i32) -> (i32, i32) {
    %c0_i32 = arith.constant 0 : i32
    %c0_i32_0 = arith.constant 0 : i32
    %c0_i32_1 = arith.constant 0 : i32
    return %c0_i32, %c0_i32_0 : i32, i32
  }
  func.func @transform_3(%arg0: i32) -> (i32, i32) {
    %c0_i32 = arith.constant 0 : i32
    %c0_i32_0 = arith.constant 0 : i32
    %c0_i32_1 = arith.constant 0 : i32
    return %c0_i32, %c0_i32_0 : i32, i32
  }
  func.func @transform_4(%arg0: i32) -> (i32, i32) {
    %c0_i32 = arith.constant 0 : i32
    %c0_i32_0 = arith.constant 0 : i32
    %c0_i32_1 = arith.constant 0 : i32
    return %c0_i32, %c0_i32_0 : i32, i32
  }
  func.func @transform_5(%arg0: i32) -> (i32, i32) {
    %c0_i32 = arith.constant 0 : i32
    %c0_i32_0 = arith.constant 0 : i32
    return %arg0, %c0_i32 : i32, i32
  }
  func.func @transform_6(%arg0: i32) -> (i32, i32) {
    %c0_i32 = arith.constant 0 : i32
    %c0_i32_0 = arith.constant 0 : i32
    return %arg0, %c0_i32 : i32, i32
  }
}

module attributes {stable_mosaic.version = 11 : i64} {
  func.func @_mm_bias_act_kernel(%arg0: i32, %arg1: memref<2x128xbf16, #tpu.memory_space<vmem>>, %arg2: memref<128x64xbf16, #tpu.memory_space<vmem>>, %arg3: memref<1x64xf32, #tpu.memory_space<vmem>>, %arg4: memref<2x64xbf16, #tpu.memory_space<vmem>>) attributes {dimension_semantics = [#tpu.dimension_semantics<parallel>], iteration_bounds = array<i64: 1>, scalar_prefetch = 0 : i64, scratch_operands = 0 : i64, tpu.core_type = #tpu.core_type<tc>, window_params = [{transform_indices = @transform_0, window_bounds = array<i64: 2, 128>}, {pipeline_mode = #tpu.pipeline_mode<synchronous>, transform_indices = @transform_1, window_bounds = array<i64: 128, 64>}, {pipeline_mode = #tpu.pipeline_mode<synchronous>, transform_indices = @transform_2, window_bounds = array<i64: 1, 64>}, {transform_indices = @transform_3, window_bounds = array<i64: 2, 64>}]} {
    %c0 = arith.constant 0 : index
    %c0_0 = arith.constant 0 : index
    %0 = vector.load %arg1[%c0, %c0_0] : memref<2x128xbf16, #tpu.memory_space<vmem>>, vector<2x128xbf16>
    %c0_1 = arith.constant 0 : index
    %c0_2 = arith.constant 0 : index
    %1 = vector.load %arg2[%c0_1, %c0_2] : memref<128x64xbf16, #tpu.memory_space<vmem>>, vector<128x64xbf16>
    %cst = arith.constant dense<0.000000e+00> : vector<2x64xf32>
    %2 = tpu.matmul %0, %1, %cst {dimension_numbers = #tpu.dot_dimension_numbers<[1], [0], [0], [1], [0, 0, 1, 1], [], []>} : vector<2x128xbf16>, vector<128x64xbf16>, vector<2x64xf32> -> vector<2x64xf32>
    %c0_3 = arith.constant 0 : index
    %c0_4 = arith.constant 0 : index
    %3 = vector.load %arg3[%c0_3, %c0_4] : memref<1x64xf32, #tpu.memory_space<vmem>>, vector<1x64xf32>
    %4 = vector.broadcast %3 : vector<1x64xf32> to vector<2x64xf32>
    %5 = arith.addf %2, %4 : vector<2x64xf32>
    %cst_5 = arith.constant 0.000000e+00 : f32
    %6 = vector.broadcast %cst_5 : f32 to vector<2x64xf32>
    %7 = arith.maximumf %5, %6 : vector<2x64xf32>
    %8 = arith.truncf %7 : vector<2x64xf32> to vector<2x64xbf16>
    %c0_6 = arith.constant 0 : index
    %c0_7 = arith.constant 0 : index
    %9 = vector.load %arg4[%c0_6, %c0_7] : memref<2x64xbf16, #tpu.memory_space<vmem>>, vector<2x64xbf16>
    tpu.vector_store %arg4[%c0_6, %c0_7], %8 {strides = array<i32>} : memref<2x64xbf16, #tpu.memory_space<vmem>>, vector<2x64xbf16>,
    return
  }
  func.func @transform_0(%arg0: i32) -> (i32, i32) {
    %c0_i32 = arith.constant 0 : i32
    %c0_i32_0 = arith.constant 0 : i32
    return %arg0, %c0_i32 : i32, i32
  }
  func.func @transform_1(%arg0: i32) -> (i32, i32) {
    %c0_i32 = arith.constant 0 : i32
    %c0_i32_0 = arith.constant 0 : i32
    %c0_i32_1 = arith.constant 0 : i32
    return %c0_i32, %c0_i32_0 : i32, i32
  }
  func.func @transform_2(%arg0: i32) -> (i32, i32) {
    %c0_i32 = arith.constant 0 : i32
    %c0_i32_0 = arith.constant 0 : i32
    %c0_i32_1 = arith.constant 0 : i32
    return %c0_i32, %c0_i32_0 : i32, i32
  }
  func.func @transform_3(%arg0: i32) -> (i32, i32) {
    %c0_i32 = arith.constant 0 : i32
    %c0_i32_0 = arith.constant 0 : i32
    return %arg0, %c0_i32 : i32, i32
  }
}

module attributes {stable_mosaic.version = 11 : i64} {
  func.func @_tail_ds_kernel(%arg0: i32, %arg1: memref<2x576xbf16, #tpu.memory_space<vmem>>, %arg2: memref<576x64xbf16, #tpu.memory_space<vmem>>, %arg3: memref<1x64xf32, #tpu.memory_space<vmem>>, %arg4: memref<64x256xbf16, #tpu.memory_space<vmem>>, %arg5: memref<1x256xf32, #tpu.memory_space<vmem>>, %arg6: memref<2x128xbf16, #tpu.memory_space<vmem>>, %arg7: memref<128x256xbf16, #tpu.memory_space<vmem>>, %arg8: memref<1x256xf32, #tpu.memory_space<vmem>>, %arg9: memref<2x256xbf16, #tpu.memory_space<vmem>>) attributes {dimension_semantics = [#tpu.dimension_semantics<parallel>], iteration_bounds = array<i64: 1>, scalar_prefetch = 0 : i64, scratch_operands = 0 : i64, tpu.core_type = #tpu.core_type<tc>, window_params = [{transform_indices = @transform_0, window_bounds = array<i64: 2, 576>}, {pipeline_mode = #tpu.pipeline_mode<synchronous>, transform_indices = @transform_1, window_bounds = array<i64: 576, 64>}, {pipeline_mode = #tpu.pipeline_mode<synchronous>, transform_indices = @transform_2, window_bounds = array<i64: 1, 64>}, {pipeline_mode = #tpu.pipeline_mode<synchronous>, transform_indices = @transform_3, window_bounds = array<i64: 64, 256>}, {pipeline_mode = #tpu.pipeline_mode<synchronous>, transform_indices = @transform_4, window_bounds = array<i64: 1, 256>}, {transform_indices = @transform_5, window_bounds = array<i64: 2, 128>}, {pipeline_mode = #tpu.pipeline_mode<synchronous>, transform_indices = @transform_6, window_bounds = array<i64: 128, 256>}, {pipeline_mode = #tpu.pipeline_mode<synchronous>, transform_indices = @transform_7, window_bounds = array<i64: 1, 256>}, {transform_indices = @transform_8, window_bounds = array<i64: 2, 256>}]} {
    %c0 = arith.constant 0 : index
    %c0_0 = arith.constant 0 : index
    %0 = vector.load %arg6[%c0, %c0_0] : memref<2x128xbf16, #tpu.memory_space<vmem>>, vector<2x128xbf16>
    %c0_1 = arith.constant 0 : index
    %c0_2 = arith.constant 0 : index
    %1 = vector.load %arg7[%c0_1, %c0_2] : memref<128x256xbf16, #tpu.memory_space<vmem>>, vector<128x256xbf16>
    %cst = arith.constant dense<0.000000e+00> : vector<2x256xf32>
    %2 = tpu.matmul %0, %1, %cst {dimension_numbers = #tpu.dot_dimension_numbers<[1], [0], [0], [1], [0, 0, 1, 1], [], []>} : vector<2x128xbf16>, vector<128x256xbf16>, vector<2x256xf32> -> vector<2x256xf32>
    %c0_3 = arith.constant 0 : index
    %c0_4 = arith.constant 0 : index
    %3 = vector.load %arg8[%c0_3, %c0_4] : memref<1x256xf32, #tpu.memory_space<vmem>>, vector<1x256xf32>
    %4 = vector.broadcast %3 : vector<1x256xf32> to vector<2x256xf32>
    %5 = arith.addf %2, %4 : vector<2x256xf32>
    %c0_5 = arith.constant 0 : index
    %c0_6 = arith.constant 0 : index
    %6 = vector.load %arg1[%c0_5, %c0_6] : memref<2x576xbf16, #tpu.memory_space<vmem>>, vector<2x576xbf16>
    %c0_7 = arith.constant 0 : index
    %c0_8 = arith.constant 0 : index
    %7 = vector.load %arg2[%c0_7, %c0_8] : memref<576x64xbf16, #tpu.memory_space<vmem>>, vector<576x64xbf16>
    %cst_9 = arith.constant dense<0.000000e+00> : vector<2x64xf32>
    %8 = tpu.matmul %6, %7, %cst_9 {dimension_numbers = #tpu.dot_dimension_numbers<[1], [0], [0], [1], [0, 0, 1, 1], [], []>} : vector<2x576xbf16>, vector<576x64xbf16>, vector<2x64xf32> -> vector<2x64xf32>
    %c0_10 = arith.constant 0 : index
    %c0_11 = arith.constant 0 : index
    %9 = vector.load %arg3[%c0_10, %c0_11] : memref<1x64xf32, #tpu.memory_space<vmem>>, vector<1x64xf32>
    %10 = vector.broadcast %9 : vector<1x64xf32> to vector<2x64xf32>
    %11 = arith.addf %8, %10 : vector<2x64xf32>
    %cst_12 = arith.constant 0.000000e+00 : f32
    %12 = vector.broadcast %cst_12 : f32 to vector<2x64xf32>
    %13 = arith.maximumf %11, %12 : vector<2x64xf32>
    %14 = arith.truncf %13 : vector<2x64xf32> to vector<2x64xbf16>
    %c0_13 = arith.constant 0 : index
    %c0_14 = arith.constant 0 : index
    %15 = vector.load %arg4[%c0_13, %c0_14] : memref<64x256xbf16, #tpu.memory_space<vmem>>, vector<64x256xbf16>
    %cst_15 = arith.constant dense<0.000000e+00> : vector<2x256xf32>
    %16 = tpu.matmul %14, %15, %cst_15 {dimension_numbers = #tpu.dot_dimension_numbers<[1], [0], [0], [1], [0, 0, 1, 1], [], []>} : vector<2x64xbf16>, vector<64x256xbf16>, vector<2x256xf32> -> vector<2x256xf32>
    %c0_16 = arith.constant 0 : index
    %c0_17 = arith.constant 0 : index
    %17 = vector.load %arg5[%c0_16, %c0_17] : memref<1x256xf32, #tpu.memory_space<vmem>>, vector<1x256xf32>
    %18 = vector.broadcast %17 : vector<1x256xf32> to vector<2x256xf32>
    %19 = arith.addf %16, %18 : vector<2x256xf32>
    %20 = arith.addf %19, %5 : vector<2x256xf32>
    %cst_18 = arith.constant 0.000000e+00 : f32
    %21 = vector.broadcast %cst_18 : f32 to vector<2x256xf32>
    %22 = arith.maximumf %20, %21 : vector<2x256xf32>
    %23 = arith.truncf %22 : vector<2x256xf32> to vector<2x256xbf16>
    %c0_19 = arith.constant 0 : index
    %c0_20 = arith.constant 0 : index
    %24 = vector.load %arg9[%c0_19, %c0_20] : memref<2x256xbf16, #tpu.memory_space<vmem>>, vector<2x256xbf16>
    tpu.vector_store %arg9[%c0_19, %c0_20], %23 {strides = array<i32>} : memref<2x256xbf16, #tpu.memory_space<vmem>>, vector<2x256xbf16>,
    return
  }
  func.func @transform_0(%arg0: i32) -> (i32, i32) {
    %c0_i32 = arith.constant 0 : i32
    %c0_i32_0 = arith.constant 0 : i32
    return %arg0, %c0_i32 : i32, i32
  }
  func.func @transform_1(%arg0: i32) -> (i32, i32) {
    %c0_i32 = arith.constant 0 : i32
    %c0_i32_0 = arith.constant 0 : i32
    %c0_i32_1 = arith.constant 0 : i32
    return %c0_i32, %c0_i32_0 : i32, i32
  }
  func.func @transform_2(%arg0: i32) -> (i32, i32) {
    %c0_i32 = arith.constant 0 : i32
    %c0_i32_0 = arith.constant 0 : i32
    %c0_i32_1 = arith.constant 0 : i32
    return %c0_i32, %c0_i32_0 : i32, i32
  }
  func.func @transform_3(%arg0: i32) -> (i32, i32) {
    %c0_i32 = arith.constant 0 : i32
    %c0_i32_0 = arith.constant 0 : i32
    %c0_i32_1 = arith.constant 0 : i32
    return %c0_i32, %c0_i32_0 : i32, i32
  }
  func.func @transform_4(%arg0: i32) -> (i32, i32) {
    %c0_i32 = arith.constant 0 : i32
    %c0_i32_0 = arith.constant 0 : i32
    %c0_i32_1 = arith.constant 0 : i32
    return %c0_i32, %c0_i32_0 : i32, i32
  }
  func.func @transform_5(%arg0: i32) -> (i32, i32) {
    %c0_i32 = arith.constant 0 : i32
    %c0_i32_0 = arith.constant 0 : i32
    return %arg0, %c0_i32 : i32, i32
  }
  func.func @transform_6(%arg0: i32) -> (i32, i32) {
    %c0_i32 = arith.constant 0 : i32
    %c0_i32_0 = arith.constant 0 : i32
    %c0_i32_1 = arith.constant 0 : i32
    return %c0_i32, %c0_i32_0 : i32, i32
  }
  func.func @transform_7(%arg0: i32) -> (i32, i32) {
    %c0_i32 = arith.constant 0 : i32
    %c0_i32_0 = arith.constant 0 : i32
    %c0_i32_1 = arith.constant 0 : i32
    return %c0_i32, %c0_i32_0 : i32, i32
  }
  func.func @transform_8(%arg0: i32) -> (i32, i32) {
    %c0_i32 = arith.constant 0 : i32
    %c0_i32_0 = arith.constant 0 : i32
    return %arg0, %c0_i32 : i32, i32
  }
}

module attributes {stable_mosaic.version = 11 : i64} {
  func.func @_mm_bias_act_kernel(%arg0: i32, %arg1: memref<2x256xbf16, #tpu.memory_space<vmem>>, %arg2: memref<256x64xbf16, #tpu.memory_space<vmem>>, %arg3: memref<1x64xf32, #tpu.memory_space<vmem>>, %arg4: memref<2x64xbf16, #tpu.memory_space<vmem>>) attributes {dimension_semantics = [#tpu.dimension_semantics<parallel>], iteration_bounds = array<i64: 1>, scalar_prefetch = 0 : i64, scratch_operands = 0 : i64, tpu.core_type = #tpu.core_type<tc>, window_params = [{transform_indices = @transform_0, window_bounds = array<i64: 2, 256>}, {pipeline_mode = #tpu.pipeline_mode<synchronous>, transform_indices = @transform_1, window_bounds = array<i64: 256, 64>}, {pipeline_mode = #tpu.pipeline_mode<synchronous>, transform_indices = @transform_2, window_bounds = array<i64: 1, 64>}, {transform_indices = @transform_3, window_bounds = array<i64: 2, 64>}]} {
    %c0 = arith.constant 0 : index
    %c0_0 = arith.constant 0 : index
    %0 = vector.load %arg1[%c0, %c0_0] : memref<2x256xbf16, #tpu.memory_space<vmem>>, vector<2x256xbf16>
    %c0_1 = arith.constant 0 : index
    %c0_2 = arith.constant 0 : index
    %1 = vector.load %arg2[%c0_1, %c0_2] : memref<256x64xbf16, #tpu.memory_space<vmem>>, vector<256x64xbf16>
    %cst = arith.constant dense<0.000000e+00> : vector<2x64xf32>
    %2 = tpu.matmul %0, %1, %cst {dimension_numbers = #tpu.dot_dimension_numbers<[1], [0], [0], [1], [0, 0, 1, 1], [], []>} : vector<2x256xbf16>, vector<256x64xbf16>, vector<2x64xf32> -> vector<2x64xf32>
    %c0_3 = arith.constant 0 : index
    %c0_4 = arith.constant 0 : index
    %3 = vector.load %arg3[%c0_3, %c0_4] : memref<1x64xf32, #tpu.memory_space<vmem>>, vector<1x64xf32>
    %4 = vector.broadcast %3 : vector<1x64xf32> to vector<2x64xf32>
    %5 = arith.addf %2, %4 : vector<2x64xf32>
    %cst_5 = arith.constant 0.000000e+00 : f32
    %6 = vector.broadcast %cst_5 : f32 to vector<2x64xf32>
    %7 = arith.maximumf %5, %6 : vector<2x64xf32>
    %8 = arith.truncf %7 : vector<2x64xf32> to vector<2x64xbf16>
    %c0_6 = arith.constant 0 : index
    %c0_7 = arith.constant 0 : index
    %9 = vector.load %arg4[%c0_6, %c0_7] : memref<2x64xbf16, #tpu.memory_space<vmem>>, vector<2x64xbf16>
    tpu.vector_store %arg4[%c0_6, %c0_7], %8 {strides = array<i32>} : memref<2x64xbf16, #tpu.memory_space<vmem>>, vector<2x64xbf16>,
    return
  }
  func.func @transform_0(%arg0: i32) -> (i32, i32) {
    %c0_i32 = arith.constant 0 : i32
    %c0_i32_0 = arith.constant 0 : i32
    return %arg0, %c0_i32 : i32, i32
  }
  func.func @transform_1(%arg0: i32) -> (i32, i32) {
    %c0_i32 = arith.constant 0 : i32
    %c0_i32_0 = arith.constant 0 : i32
    %c0_i32_1 = arith.constant 0 : i32
    return %c0_i32, %c0_i32_0 : i32, i32
  }
  func.func @transform_2(%arg0: i32) -> (i32, i32) {
    %c0_i32 = arith.constant 0 : i32
    %c0_i32_0 = arith.constant 0 : i32
    %c0_i32_1 = arith.constant 0 : i32
    return %c0_i32, %c0_i32_0 : i32, i32
  }
  func.func @transform_3(%arg0: i32) -> (i32, i32) {
    %c0_i32 = arith.constant 0 : i32
    %c0_i32_0 = arith.constant 0 : i32
    return %arg0, %c0_i32 : i32, i32
  }
}

module attributes {stable_mosaic.version = 11 : i64} {
  func.func @_tail_kernel(%arg0: i32, %arg1: memref<2x576xbf16, #tpu.memory_space<vmem>>, %arg2: memref<576x64xbf16, #tpu.memory_space<vmem>>, %arg3: memref<1x64xf32, #tpu.memory_space<vmem>>, %arg4: memref<64x256xbf16, #tpu.memory_space<vmem>>, %arg5: memref<1x256xf32, #tpu.memory_space<vmem>>, %arg6: memref<2x256xbf16, #tpu.memory_space<vmem>>, %arg7: memref<2x256xbf16, #tpu.memory_space<vmem>>) attributes {dimension_semantics = [#tpu.dimension_semantics<parallel>], iteration_bounds = array<i64: 1>, scalar_prefetch = 0 : i64, scratch_operands = 0 : i64, tpu.core_type = #tpu.core_type<tc>, window_params = [{transform_indices = @transform_0, window_bounds = array<i64: 2, 576>}, {pipeline_mode = #tpu.pipeline_mode<synchronous>, transform_indices = @transform_1, window_bounds = array<i64: 576, 64>}, {pipeline_mode = #tpu.pipeline_mode<synchronous>, transform_indices = @transform_2, window_bounds = array<i64: 1, 64>}, {pipeline_mode = #tpu.pipeline_mode<synchronous>, transform_indices = @transform_3, window_bounds = array<i64: 64, 256>}, {pipeline_mode = #tpu.pipeline_mode<synchronous>, transform_indices = @transform_4, window_bounds = array<i64: 1, 256>}, {transform_indices = @transform_5, window_bounds = array<i64: 2, 256>}, {transform_indices = @transform_6, window_bounds = array<i64: 2, 256>}]} {
    %c0 = arith.constant 0 : index
    %c0_0 = arith.constant 0 : index
    %0 = vector.load %arg1[%c0, %c0_0] : memref<2x576xbf16, #tpu.memory_space<vmem>>, vector<2x576xbf16>
    %c0_1 = arith.constant 0 : index
    %c0_2 = arith.constant 0 : index
    %1 = vector.load %arg2[%c0_1, %c0_2] : memref<576x64xbf16, #tpu.memory_space<vmem>>, vector<576x64xbf16>
    %cst = arith.constant dense<0.000000e+00> : vector<2x64xf32>
    %2 = tpu.matmul %0, %1, %cst {dimension_numbers = #tpu.dot_dimension_numbers<[1], [0], [0], [1], [0, 0, 1, 1], [], []>} : vector<2x576xbf16>, vector<576x64xbf16>, vector<2x64xf32> -> vector<2x64xf32>
    %c0_3 = arith.constant 0 : index
    %c0_4 = arith.constant 0 : index
    %3 = vector.load %arg3[%c0_3, %c0_4] : memref<1x64xf32, #tpu.memory_space<vmem>>, vector<1x64xf32>
    %4 = vector.broadcast %3 : vector<1x64xf32> to vector<2x64xf32>
    %5 = arith.addf %2, %4 : vector<2x64xf32>
    %cst_5 = arith.constant 0.000000e+00 : f32
    %6 = vector.broadcast %cst_5 : f32 to vector<2x64xf32>
    %7 = arith.maximumf %5, %6 : vector<2x64xf32>
    %8 = arith.truncf %7 : vector<2x64xf32> to vector<2x64xbf16>
    %c0_6 = arith.constant 0 : index
    %c0_7 = arith.constant 0 : index
    %9 = vector.load %arg4[%c0_6, %c0_7] : memref<64x256xbf16, #tpu.memory_space<vmem>>, vector<64x256xbf16>
    %cst_8 = arith.constant dense<0.000000e+00> : vector<2x256xf32>
    %10 = tpu.matmul %8, %9, %cst_8 {dimension_numbers = #tpu.dot_dimension_numbers<[1], [0], [0], [1], [0, 0, 1, 1], [], []>} : vector<2x64xbf16>, vector<64x256xbf16>, vector<2x256xf32> -> vector<2x256xf32>
    %c0_9 = arith.constant 0 : index
    %c0_10 = arith.constant 0 : index
    %11 = vector.load %arg5[%c0_9, %c0_10] : memref<1x256xf32, #tpu.memory_space<vmem>>, vector<1x256xf32>
    %12 = vector.broadcast %11 : vector<1x256xf32> to vector<2x256xf32>
    %13 = arith.addf %10, %12 : vector<2x256xf32>
    %c0_11 = arith.constant 0 : index
    %c0_12 = arith.constant 0 : index
    %14 = vector.load %arg6[%c0_11, %c0_12] : memref<2x256xbf16, #tpu.memory_space<vmem>>, vector<2x256xbf16>
    %15 = arith.extf %14 : vector<2x256xbf16> to vector<2x256xf32>
    %16 = arith.addf %13, %15 : vector<2x256xf32>
    %cst_13 = arith.constant 0.000000e+00 : f32
    %17 = vector.broadcast %cst_13 : f32 to vector<2x256xf32>
    %18 = arith.maximumf %16, %17 : vector<2x256xf32>
    %19 = arith.truncf %18 : vector<2x256xf32> to vector<2x256xbf16>
    %c0_14 = arith.constant 0 : index
    %c0_15 = arith.constant 0 : index
    %20 = vector.load %arg7[%c0_14, %c0_15] : memref<2x256xbf16, #tpu.memory_space<vmem>>, vector<2x256xbf16>
    tpu.vector_store %arg7[%c0_14, %c0_15], %19 {strides = array<i32>} : memref<2x256xbf16, #tpu.memory_space<vmem>>, vector<2x256xbf16>,
    return
  }
  func.func @transform_0(%arg0: i32) -> (i32, i32) {
    %c0_i32 = arith.constant 0 : i32
    %c0_i32_0 = arith.constant 0 : i32
    return %arg0, %c0_i32 : i32, i32
  }
  func.func @transform_1(%arg0: i32) -> (i32, i32) {
    %c0_i32 = arith.constant 0 : i32
    %c0_i32_0 = arith.constant 0 : i32
    %c0_i32_1 = arith.constant 0 : i32
    return %c0_i32, %c0_i32_0 : i32, i32
  }
  func.func @transform_2(%arg0: i32) -> (i32, i32) {
    %c0_i32 = arith.constant 0 : i32
    %c0_i32_0 = arith.constant 0 : i32
    %c0_i32_1 = arith.constant 0 : i32
    return %c0_i32, %c0_i32_0 : i32, i32
  }
  func.func @transform_3(%arg0: i32) -> (i32, i32) {
    %c0_i32 = arith.constant 0 : i32
    %c0_i32_0 = arith.constant 0 : i32
    %c0_i32_1 = arith.constant 0 : i32
    return %c0_i32, %c0_i32_0 : i32, i32
  }
  func.func @transform_4(%arg0: i32) -> (i32, i32) {
    %c0_i32 = arith.constant 0 : i32
    %c0_i32_0 = arith.constant 0 : i32
    %c0_i32_1 = arith.constant 0 : i32
    return %c0_i32, %c0_i32_0 : i32, i32
  }
  func.func @transform_5(%arg0: i32) -> (i32, i32) {
    %c0_i32 = arith.constant 0 : i32
    %c0_i32_0 = arith.constant 0 : i32
    return %arg0, %c0_i32 : i32, i32
  }
  func.func @transform_6(%arg0: i32) -> (i32, i32) {
    %c0_i32 = arith.constant 0 : i32
    %c0_i32_0 = arith.constant 0 : i32
    return %arg0, %c0_i32 : i32, i32
  }
}

module attributes {stable_mosaic.version = 11 : i64} {
  func.func @_avgpool_kernel(%arg0: memref<2x1x256xbf16, #tpu.memory_space<vmem>>, %arg1: memref<2x256xf32, #tpu.memory_space<vmem>>) attributes {dimension_semantics = [], scalar_prefetch = 0 : i64, scratch_operands = 0 : i64, tpu.core_type = #tpu.core_type<tc>} {
    %c0 = arith.constant 0 : index
    %c0_0 = arith.constant 0 : index
    %c0_1 = arith.constant 0 : index
    %0 = vector.load %arg0[%c0, %c0_0, %c0_1] : memref<2x1x256xbf16, #tpu.memory_space<vmem>>, vector<2x1x256xbf16>
    %1 = arith.extf %0 : vector<2x1x256xbf16> to vector<2x1x256xf32>
    %cst = arith.constant dense<0.000000e+00> : vector<2x256xf32>
    %2 = vector.multi_reduction <add>, %1, %cst [1] : vector<2x1x256xf32> to vector<2x256xf32>
    %cst_2 = arith.constant 1.000000e+00 : f32
    %3 = vector.broadcast %cst_2 : f32 to vector<2x256xf32>
    %4 = arith.divf %2, %3 : vector<2x256xf32>
    %c0_3 = arith.constant 0 : index
    %c0_4 = arith.constant 0 : index
    %5 = vector.load %arg1[%c0_3, %c0_4] : memref<2x256xf32, #tpu.memory_space<vmem>>, vector<2x256xf32>
    tpu.vector_store %arg1[%c0_3, %c0_4], %4 {strides = array<i32>} : memref<2x256xf32, #tpu.memory_space<vmem>>, vector<2x256xf32>,
    return
  }
}

</mosaic_0001>

<bundles_post_ra>
// kernel: forward.44
= control target key start
LH: loop header
LB: loop body
LE: loop exit
PB: predicated region body
PF: predicated region fallthrough
CT: control target
= control target key end

     0   :  { %s523_s6 = smov 0   ;;  %s740_s0 = inlined_call_operand.vmem [shape: bf16[2,8,8,8], index: 0, kind: input, shape index: {}]   ;;  %s741_s1 = inlined_call_operand.vmem [shape: bf16[2,4,4,8], index: 1, kind: output, shape index: {}]  }
   0x1 LB: > { %s441_s7 = sadd.s32 4294967295, %s511_s6   ;;  %p445_p0 = scmp.ge.s32.totalorder %s511_s6, 1  ;;  %s511_s6 = sphi %s523_s6, %s11_s6  }
   0x2   : > { %p87_p1 = scmp.lt.s32.totalorder %s511_s6, 3 }
   0x4   : > { %p88_p2 = pnand %p445_p0, %p87_p1 }
   0x5   : > { %p107_p3 = scmp.lt.s32.totalorder (!%p88_p2), %s441_s7, 1 }
   0x6   : > { %91 = sbr.rel (%p88_p2) target bundleno = 79 (0x4f), region = 24 }
   0xb   : > { %s751_s7 = smov (!%p107_p3, %s441_s7), 1  ;;  %vm133_vm0 = vcmask 58368   ;;  %vm168_vm1 = vcmask 62467   ;;  %vm145_vm2 = vcmask 57344   ;;  %vm146_vm3 = vsmask.f32 256 }
   0xc   : > { %s476_s8 = sshll.u32 %s751_s7, 5  ;;  %vm180_vm4 = vcmask 58369   ;;  %vm181_vm5 = vsmask.f32 1280  ;;  %s477_s12 = sshll.u32 %s751_s7, 3  ;;  %vm151_vm6 = vcmask 60417   ;;  %vm606_vm8 = vmand %vm145_vm2, %vm146_vm3 }
   0xd   : > { %s537_s11 = scalar_lea.vmem %s740_s0, %s476_s8  ;;  %s600_s15 = scalar_lea.vmem %s741_s1, %s477_s12  ;;  %vm186_vm7 = vcmask 64517   ;;  %vm613_vm9 = vmand %vm180_vm4, %vm181_vm5  ;;  %vm163_vm10 = vsmask.f32 7938  ;;  %vm198_vm11 = vsmask.f32 7942 }
   0xe   : > { %v479_v0 = vld [vmem:[%s537_s11] sm:$0xff]   ;;  %v494_v3 = vld [vmem:[%s537_s11 + $0x8] sm:$0xff]   ;;  %v495_v6 = vld [vmem:[%s537_s11 + $0x10] sm:$0xff]  }
   0xf   : > { %v540_v1 = vunpack.c.l.bf16 %v479_v0  ;;  %v542_v2 = vunpack.c.h.bf16 %v479_v0  ;;  %v545_v4 = vunpack.c.l.bf16 %v494_v3  ;;  %v547_v5 = vunpack.c.h.bf16 %v494_v3  ;;  %v496_v31 = vld [vmem:[%s537_s11 + $0x18] sm:$0xff]   ;;  %vm680_vm12 = vmand %vm145_vm2, %vm163_vm10 }
  0x10   : > { %v566_v18 = vunpack.c.l.bf16 %v495_v6  ;;  %v570_v22 = vunpack.c.h.bf16 %v495_v6  ;;  %v585_v43 = vunpack.c.l.bf16 %v496_v31  ;;  %v590_v47 = vunpack.c.h.bf16 %v496_v31  ;;  %vm691_vm13 = vmand %vm180_vm4, %vm198_vm11 }
  0x11   : > { %v134_v7 = vsel %vm133_vm0, %v540_v1, -inf  ;;  %v135_v8 = vsel %vm133_vm0, %v542_v2, -inf  ;;  %v169_v9 = vsel %vm168_vm1, %v540_v1, -inf  ;;  %v170_v10 = vsel %vm168_vm1, %v542_v2, -inf }
  0x12   : > { %v136_v11 = vmax.f32 %v134_v7, %v135_v8  ;;  %v171_v12 = vmax.f32 %v169_v9, %v170_v10  ;;  %v203_v13 = vsel %vm133_vm0, %v545_v4, -inf  ;;  %v204_v14 = vsel %vm133_vm0, %v547_v5, -inf  ;;  %v148_v9 = vld [vmem:[%s600_s15] sm:$0x1] }
  0x13   : > { %v205_v15 = vmax.f32 %v135_v8, %v203_v13  ;;  %v234_v16 = vsel %vm168_vm1, %v545_v4, -inf  ;;  %v235_v17 = vsel %vm168_vm1, %v547_v5, -inf  ;;  %v264_v26 = vsel %vm133_vm0, %v566_v18, -inf }
  0x14   : > { %v137_v19 = vsel %vm133_vm0, %v136_v11, -inf  ;;  %v172_v20 = vsel %vm168_vm1, %v171_v12, -inf  ;;  %v236_v21 = vmax.f32 %v170_v10, %v234_v16  ;;  %v265_v28 = vsel %vm133_vm0, %v570_v22, -inf  ;;  %v183_v11 = vld [vmem:[%s600_s15] sm:$0x2] }
  0x15   : > { %v138_v23 = vrot.slane %v137_v19, 4  ;;  %v173_v24 = vrot.slane %v172_v20, 4  ;;  %v206_v25 = vmax.f32 %v205_v15, %v204_v14  ;;  %v266_v29 = vmax.f32 %v204_v14, %v264_v26 }
  0x16   : > { %v237_v27 = vmax.f32 %v236_v21, %v235_v17  ;;  %v295_v30 = vsel %vm168_vm1, %v566_v18, -inf  ;;  %v582_v35 = vsel %vm168_vm1, %v570_v22, -inf  ;;  %v325_v54 = vsel %vm133_vm0, %v585_v43, -inf }
  0x17   : > { %v139_v32 = vmax.f32 %v137_v19, %v138_v23  ;;  %v174_v33 = vmax.f32 %v172_v20, %v173_v24  ;;  %v207_v34 = vsel %vm133_vm0, %v206_v25, -inf  ;;  %v267_v38 = vmax.f32 %v266_v29, %v265_v28 }
  0x18   : > { %v208_v36 = vrot.slane %v207_v34, 4  ;;  %v238_v37 = vsel %vm168_vm1, %v237_v27, -inf  ;;  %v297_v39 = vmax.f32 %v235_v17, %v295_v30  ;;  %v326_v55 = vsel %vm133_vm0, %v590_v47, -inf }
  0x19   : > { %v140_v40 = vrot.slane %v139_v32, 2  ;;  %v175_v41 = vrot.slane %v174_v33, 2  ;;  %v239_v42 = vrot.slane %v238_v37, 4  ;;  %v268_v45 = vsel %vm133_vm0, %v267_v38, -inf }
  0x1a   : > { %v209_v44 = vmax.f32 %v207_v34, %v208_v36  ;;  %v298_v46 = vmax.f32 %v297_v39, %v582_v35  ;;  %v269_v51 = vrot.slane %v268_v45, 4  ;;  %v327_v62 = vmax.f32 %v265_v28, %v325_v54  ;;  %v450_v28 = vld [vmem:[%s600_s15 + $0x2] sm:$0x1] }
  0x1b   : > { %v141_v48 = vmax.f32 %v139_v32, %v140_v40  ;;  %v176_v49 = vmax.f32 %v174_v33, %v175_v41  ;;  %v240_v50 = vmax.f32 %v238_v37, %v239_v42  ;;  %v356_v63 = vsel %vm168_vm1, %v585_v43, -inf  ;;  %v454_v32 = vld [vmem:[%s600_s15 + $0x2] sm:$0x2]  ;;  %v458_v41 = vld [vmem:[%s600_s15 + $0x4] sm:$0x1] }
  0x1c   : > { %v210_v52 = vrot.slane %v209_v44, 2  ;;  %v299_v53 = vsel %vm168_vm1, %v298_v46, -inf  ;;  %v270_v59 = vmax.f32 %v268_v45, %v269_v51  ;;  %v328_v14 = vmax.f32 %v327_v62, %v326_v55 }
  0x1d   : > { %v142_v56 = vrot.slane %v141_v48, 1  ;;  %v177_v57 = vrot.slane %v176_v49, 1  ;;  %v241_v58 = vrot.slane %v240_v50, 2  ;;  %v300_v61 = vrot.slane %v299_v53, 4 }
  0x1e   : > { %v211_v60 = vmax.f32 %v209_v44, %v210_v52  ;;  %v271_v8 = vrot.slane %v270_v59, 2  ;;  %v357_v15 = vsel %vm168_vm1, %v590_v47, -inf  ;;  %v329_v24 = vsel %vm133_vm0, %v328_v14, -inf }
  0x1f   : > { %v143_v0 = vmax.f32 %v141_v48, %v142_v56  ;;  %v178_v6 = vmax.f32 %v176_v49, %v177_v57  ;;  %v242_v7 = vmax.f32 %v240_v50, %v241_v58  ;;  %v301_v13 = vmax.f32 %v299_v53, %v300_v61  ;;  %v462_v56 = vld [vmem:[%s600_s15 + $0x4] sm:$0x2] }
  0x20   : > { %v212_v12 = vrot.slane %v211_v60, 1  ;;  %v272_v20 = vmax.f32 %v270_v59, %v271_v8  ;;  %v358_v25 = vmax.f32 %v582_v35, %v356_v63  ;;  %v330_v34 = vrot.slane %v329_v24, 4 }
  0x21   : > { %v144_v16 = vpack.c.bf16 %v143_v0, %v143_v0  ;;  %v179_v17 = vpack.c.bf16 %v178_v6, %v178_v6  ;;  %v243_v19 = vrot.slane %v242_v7, 1  ;;  %v302_v23 = vrot.slane %v301_v13, 2 }
  0x22   : > { %v213_v21 = vmax.f32 %v211_v60, %v212_v12  ;;  %v273_v30 = vrot.slane %v272_v20, 1  ;;  %v359_v36 = vmax.f32 %v358_v25, %v357_v15  ;;  %v152_v38 = vsel %vm151_vm6, %v540_v1, -inf }
  0x23   : > { %v149_v26 = vsel %vm606_vm8, %v144_v16, %v148_v9  ;;  %v184_v27 = vsel %vm613_vm9, %v179_v17, %v183_v11  ;;  %v244_v29 = vmax.f32 %v242_v7, %v243_v19  ;;  %v303_v33 = vmax.f32 %v301_v13, %v302_v23 }
  0x24   : > { %150 = vst [vmem:[%s600_s15] sm:$0x1] %v149_v26  ;;  %185 = vst [vmem:[%s600_s15] sm:$0x2] %v184_v27  ;;  %v214_v31 = vpack.c.bf16 %v213_v21, %v213_v21  ;;  %v274_v37 = vmax.f32 %v272_v20, %v273_v30  ;;  %v153_v39 = vsel %vm151_vm6, %v542_v2, -inf  ;;  %v331_v44 = vmax.f32 %v329_v24, %v330_v34  ;;  %v466_v20 = vld [vmem:[%s600_s15 + $0x6] sm:$0x1] }
  0x25   : > { %v245_v35 = vpack.c.bf16 %v244_v29, %v244_v29  ;;  %v304_v42 = vrot.slane %v303_v33, 1  ;;  %v360_v45 = vsel %vm168_vm1, %v359_v36, -inf  ;;  %v154_v50 = vmax.f32 %v152_v38, %v153_v39 }
  0x26   : > { %v217_v40 = vsel %vm606_vm8, %v214_v31, %v450_v28  ;;  %v275_v48 = vpack.c.bf16 %v274_v37, %v274_v37  ;;  %v361_v49 = vrot.slane %v360_v45, 4  ;;  %v332_v52 = vrot.slane %v331_v44, 2 }
  0x27   : > { %451 = vst [vmem:[%s600_s15 + $0x2] sm:$0x1] %v217_v40  ;;  %v247_v46 = vsel %vm613_vm9, %v245_v35, %v454_v32  ;;  %v305_v51 = vmax.f32 %v303_v33, %v304_v42  ;;  %v187_v53 = vsel %vm186_vm7, %v540_v1, -inf  ;;  %v188_v54 = vsel %vm186_vm7, %v542_v2, -inf  ;;  %v470_v33 = vld [vmem:[%s600_s15 + $0x6] sm:$0x2] }
  0x28   : > { %455 = vst [vmem:[%s600_s15 + $0x2] sm:$0x2] %v247_v46  ;;  %v278_v55 = vsel %vm606_vm8, %v275_v48, %v458_v41  ;;  %v362_v57 = vmax.f32 %v360_v45, %v361_v49  ;;  %v155_v58 = vsel %vm151_vm6, %v154_v50, -inf  ;;  %v189_v59 = vmax.f32 %v187_v53, %v188_v54 }
  0x29   : > { %459 = vst [vmem:[%s600_s15 + $0x4] sm:$0x1] %v278_v55  ;;  %v306_v60 = vpack.c.bf16 %v305_v51, %v305_v51  ;;  %v333_v61 = vmax.f32 %v331_v44, %v332_v52  ;;  %v156_v62 = vrot.slane %v155_v58, 4  ;;  %v219_v63 = vsel %vm151_vm6, %v545_v4, -inf }
  0x2a   : > { %v363_v1 = vrot.slane %v362_v57, 2  ;;  %v190_v2 = vsel %vm186_vm7, %v189_v59, -inf  ;;  %v221_v0 = vmax.f32 %v153_v39, %v219_v63  ;;  %v220_v12 = vsel %vm151_vm6, %v547_v5, -inf }
  0x2b   : > { %v308_v6 = vsel %vm613_vm9, %v306_v60, %v462_v56  ;;  %v334_v7 = vrot.slane %v333_v61, 1  ;;  %v157_v8 = vmax.f32 %v155_v58, %v156_v62  ;;  %v191_v9 = vrot.slane %v190_v2, 4  ;;  %v165_v46 = vld [vmem:[%s600_s15] sm:$0x1]  ;;  %v200_v55 = vld [vmem:[%s600_s15] sm:$0x2] }
  0x2c   : > { %463 = vst [vmem:[%s600_s15 + $0x4] sm:$0x2] %v308_v6  ;;  %v364_v11 = vmax.f32 %v362_v57, %v363_v1  ;;  %v249_v13 = vsel %vm186_vm7, %v545_v4, -inf  ;;  %v250_v14 = vsel %vm186_vm7, %v547_v5, -inf  ;;  %v222_v19 = vmax.f32 %v221_v0, %v220_v12 }
  0x2d   : > { %v335_v15 = vmax.f32 %v333_v61, %v334_v7  ;;  %v158_v16 = vrot.slane %v157_v8, 2  ;;  %v192_v17 = vmax.f32 %v190_v2, %v191_v9  ;;  %v251_v23 = vmax.f32 %v188_v54, %v249_v13 }
  0x2e   : > { %v365_v21 = vrot.slane %v364_v11, 1  ;;  %v280_v24 = vsel %vm151_vm6, %v566_v18, -inf  ;;  %v281_v25 = vsel %vm151_vm6, %v570_v22, -inf  ;;  %v223_v5 = vsel %vm151_vm6, %v222_v19, -inf }
  0x2f   : > { %v336_v26 = vpack.c.bf16 %v335_v15, %v335_v15  ;;  %v159_v4 = vmax.f32 %v157_v8, %v158_v16  ;;  %v193_v27 = vrot.slane %v192_v17, 2  ;;  %v224_v29 = vrot.slane %v223_v5, 4  ;;  %v452_v15 = vld [vmem:[%s600_s15 + $0x2] sm:$0x1] }
  0x30   : > { %v366_v28 = vmax.f32 %v364_v11, %v365_v21  ;;  %v252_v30 = vmax.f32 %v251_v23, %v250_v14  ;;  %v282_v31 = vmax.f32 %v220_v12, %v280_v24  ;;  %v310_v35 = vsel %vm186_vm7, %v566_v18, -inf }
  0x31   : > { %v339_v32 = vsel %vm606_vm8, %v336_v26, %v466_v20  ;;  %v160_v34 = vrot.slane %v159_v4, 1  ;;  %v194_v36 = vmax.f32 %v192_v17, %v193_v27  ;;  %v225_v38 = vmax.f32 %v223_v5, %v224_v29 }
  0x32   : > { %467 = vst [vmem:[%s600_s15 + $0x6] sm:$0x1] %v339_v32  ;;  %v367_v37 = vpack.c.bf16 %v366_v28, %v366_v28  ;;  %v253_v39 = vsel %vm186_vm7, %v252_v30, -inf  ;;  %v283_v40 = vmax.f32 %v282_v31, %v281_v25  ;;  %v311_v3 = vsel %vm186_vm7, %v570_v22, -inf  ;;  %v460_v31 = vld [vmem:[%s600_s15 + $0x4] sm:$0x1] }
  0x33   : > { %v161_v41 = vmax.f32 %v159_v4, %v160_v34  ;;  %v195_v42 = vrot.slane %v194_v36, 1  ;;  %v254_v44 = vrot.slane %v253_v39, 4  ;;  %v226_v48 = vrot.slane %v225_v38, 2 }
  0x34   : > { %v369_v18 = vsel %vm613_vm9, %v367_v37, %v470_v33  ;;  %v284_v49 = vsel %vm151_vm6, %v283_v40, -inf  ;;  %v312_v50 = vmax.f32 %v250_v14, %v310_v35  ;;  %v341_v57 = vsel %vm151_vm6, %v585_v43, -inf }
  0x35   : > { %471 = vst [vmem:[%s600_s15 + $0x6] sm:$0x2] %v369_v18  ;;  %v162_v51 = vpack.c.bf16 %v161_v41, %v161_v41  ;;  %v196_v52 = vmax.f32 %v194_v36, %v195_v42  ;;  %v255_v53 = vmax.f32 %v253_v39, %v254_v44  ;;  %v285_v22 = vrot.slane %v284_v49, 4  ;;  %v464_v41 = vld [vmem:[%s600_s15 + $0x4] sm:$0x2] }
  0x36   : > { %v227_v10 = vmax.f32 %v225_v38, %v226_v48  ;;  %v313_v56 = vmax.f32 %v312_v50, %v311_v3  ;;  %v342_v58 = vsel %vm151_vm6, %v590_v47, -inf  ;;  %v343_v2 = vmax.f32 %v281_v25, %v341_v57 }
  0x37   : > { %v166_v59 = vsel %vm680_vm12, %v162_v51, %v165_v46  ;;  %v197_v60 = vpack.c.bf16 %v196_v52, %v196_v52  ;;  %v256_v61 = vrot.slane %v255_v53, 2  ;;  %v286_v62 = vmax.f32 %v284_v49, %v285_v22 }
  0x38   : > { %167 = vst [vmem:[%s600_s15] sm:$0x1] %v166_v59  ;;  %v228_v63 = vrot.slane %v227_v10, 1  ;;  %v314_v1 = vsel %vm186_vm7, %v313_v56, -inf  ;;  %v371_v0 = vsel %vm186_vm7, %v585_v43, -inf  ;;  %v344_v12 = vmax.f32 %v343_v2, %v342_v58 }
  0x39   : > { %v201_v6 = vsel %vm691_vm13, %v197_v60, %v200_v55  ;;  %v257_v7 = vmax.f32 %v255_v53, %v256_v61  ;;  %v287_v8 = vrot.slane %v286_v62, 2  ;;  %v315_v9 = vrot.slane %v314_v1, 4  ;;  %v468_v49 = vld [vmem:[%s600_s15 + $0x6] sm:$0x1] }
  0x3a   : > { %202 = vst [vmem:[%s600_s15] sm:$0x2] %v201_v6  ;;  %v229_v11 = vmax.f32 %v227_v10, %v228_v63  ;;  %v372_v13 = vsel %vm186_vm7, %v590_v47, -inf  ;;  %v373_v14 = vmax.f32 %v311_v3, %v371_v0  ;;  %v345_v20 = vsel %vm151_vm6, %v344_v12, -inf  ;;  %v456_v47 = vld [vmem:[%s600_s15 + $0x2] sm:$0x2] }
  0x3b   : > { %v258_v16 = vrot.slane %v257_v7, 1  ;;  %v288_v17 = vmax.f32 %v286_v62, %v287_v8  ;;  %v316_v19 = vmax.f32 %v314_v1, %v315_v9  ;;  %v346_v26 = vrot.slane %v345_v20, 4 }
  0x3c   : > { %v230_v43 = vpack.c.bf16 %v229_v11, %v229_v11  ;;  %v374_v21 = vmax.f32 %v373_v14, %v372_v13  ;;  %v472_v22 = vld [vmem:[%s600_s15 + $0x6] sm:$0x2] }
  0x3d   : > { %v259_v23 = vmax.f32 %v257_v7, %v258_v16  ;;  %v289_v24 = vrot.slane %v288_v17, 1  ;;  %v317_v25 = vrot.slane %v316_v19, 2  ;;  %v347_v30 = vmax.f32 %v345_v20, %v346_v26 }
  0x3e   : > { %v232_v4 = vsel %vm680_vm12, %v230_v43, %v452_v15  ;;  %v375_v27 = vsel %vm186_vm7, %v374_v21, -inf }
  0x3f   : > { %453 = vst [vmem:[%s600_s15 + $0x2] sm:$0x1] %v232_v4  ;;  %v260_v5 = vpack.c.bf16 %v259_v23, %v259_v23  ;;  %v290_v28 = vmax.f32 %v288_v17, %v289_v24  ;;  %v318_v29 = vmax.f32 %v316_v19, %v317_v25  ;;  %v376_v32 = vrot.slane %v375_v27, 4 }
  0x40   : > { %v348_v35 = vrot.slane %v347_v30, 2 }
  0x41   : > { %v262_v33 = vsel %vm691_vm13, %v260_v5, %v456_v47  ;;  %v291_v34 = vpack.c.bf16 %v290_v28, %v290_v28  ;;  %v319_v36 = vrot.slane %v318_v29, 1  ;;  %v377_v37 = vmax.f32 %v375_v27, %v376_v32 }
  0x42   : > { %457 = vst [vmem:[%s600_s15 + $0x2] sm:$0x2] %v262_v33  ;;  %v349_v40 = vmax.f32 %v347_v30, %v348_v35 }
  0x43   : > { %v293_v38 = vsel %vm680_vm12, %v291_v34, %v460_v31  ;;  %v320_v39 = vmax.f32 %v318_v29, %v319_v36  ;;  %v378_v42 = vrot.slane %v377_v37, 2 }
  0x44   : > { %461 = vst [vmem:[%s600_s15 + $0x4] sm:$0x1] %v293_v38  ;;  %v350_v3 = vrot.slane %v349_v40, 1 }
  0x45   : > { %v321_v44 = vpack.c.bf16 %v320_v39, %v320_v39  ;;  %v379_v18 = vmax.f32 %v377_v37, %v378_v42 }
  0x46   : > { %v351_v48 = vmax.f32 %v349_v40, %v350_v3 }
  0x47   : > { %v323_v46 = vsel %vm691_vm13, %v321_v44, %v464_v41  ;;  %v380_v50 = vrot.slane %v379_v18, 1 }
  0x48   : > { %465 = vst [vmem:[%s600_s15 + $0x4] sm:$0x2] %v323_v46  ;;  %v352_v51 = vpack.c.bf16 %v351_v48, %v351_v48 }
  0x49   : > { %v381_v52 = vmax.f32 %v379_v18, %v380_v50 }
  0x4a   : > { %v354_v53 = vsel %vm680_vm12, %v352_v51, %v468_v49 }
  0x4b   : > { %469 = vst [vmem:[%s600_s15 + $0x6] sm:$0x1] %v354_v53  ;;  %v382_v55 = vpack.c.bf16 %v381_v52, %v381_v52 }
  0x4d   : > { %v384_v10 = vsel %vm691_vm13, %v382_v55, %v472_v22 }
  0x4e   : > { %473 = vst [vmem:[%s600_s15 + $0x6] sm:$0x2] %v384_v10 }
  0x4f PF: > { %s11_s6 = sadd.s32 1, %s511_s6  }
  0x50   : > { %p8_p4 = scmp.ge.s32.totalorder %s11_s6, 4  }
  0x52   :  { %10 = sbr.rel (!%p8_p4) target bundleno = 1 (0x1), region = 57 }

// kernel: forward.45
= control target key start
LH: loop header
LB: loop body
LE: loop exit
PB: predicated region body
PF: predicated region fallthrough
CT: control target
= control target key end

     0   :  { %vm44_vm0 = vcmask 1043456   ;;  %vm37_vm1 = vcmask 64512   ;;  %vm117_vm2 = vcmask 60416   ;;  %s195_s1 = inlined_call_operand.vmem [shape: bf16[8,8], index: 1, kind: input, shape index: {}]   ;;  %s196_s0 = inlined_call_operand.vmem [shape: bf16[32,8], index: 0, kind: input, shape index: {}]   ;;  %s197_s2 = inlined_call_operand.vmem [shape: f32[1,8], index: 2, kind: input, shape index: {}]   ;;  %s198_s3 = inlined_call_operand.vmem [shape: bf16[32,8], index: 3, kind: output, shape index: {}]  }
   0x1   :  { %v19_v0 = vld [vmem:[%s195_s1] sm:$0xf]  ;;  %v150_v3 = vld [vmem:[%s196_s0 + $0x8] sm:$0xff]  }
   0x2   :  { %148 = vmatprep.subr.msk.bf16.mxu0 %vm44_vm0, %v19_v0  ;;  %v46_v1 = vsel %vm44_vm0, %v19_v0, 0  ;;  %v149_v2 = vld [vmem:[%s196_s0] sm:$0xff]  }
   0x3   :  { %143 = vmatpush3.bf16.msra.mxu0 %v46_v1  ;;  %144 = vmatprep.mubr.msk.bf16.mxu0 %vm37_vm1, %v149_v2  ;;  %v126_v4 = vld [vmem:[%s197_s2] ss:$0 sm:$0xff] }
   0x6   :  { %145 = vmatmul.mubr.msk.bf16.vlgmr.msra.gmra.mxu0 %vm37_vm1, %v150_v3 }
  0xc6   :  { %v146_v5 = vpop.f32.mrf.mxu0 }
  0xc7   :  { %v91_v6 = vadd.f32 %v146_v5, %v126_v4 }
  0xc8   :  { %v82_v7 = vpop.f32.mrf.mxu0 }
  0xc9   :  { %v99_v8 = vmax.f32 %v91_v6, 0.0  ;;  %v83_v9 = vadd.f32 %v126_v4, %v82_v7 }
  0xca   :  { %v147_v10 = vpop.f32.mrf.mxu0 }
  0xcb   :  { %v137_v11 = vpack.c.bf16 %v99_v8, %v99_v8  ;;  %v97_v12 = vmax.f32 %v83_v9, 0.0  ;;  %v94_v13 = vadd.f32 %v147_v10, %v126_v4 }
  0xcc   :  { %v85_v14 = vpop.f32.mrf.mxu0 }
  0xcd   :  { %120 = vst.msk [vmem:[%s198_s3 + $0x8] sm:$0xf] %vm117_vm2, %v137_v11  ;;  %v135_v15 = vpack.c.bf16 %v97_v12, %v97_v12  ;;  %v100_v16 = vmax.f32 %v94_v13, 0.0  ;;  %v86_v17 = vadd.f32 %v126_v4, %v85_v14 }
  0xcf   :  { %118 = vst.msk [vmem:[%s198_s3] sm:$0xf] %vm117_vm2, %v135_v15  ;;  %v138_v18 = vpack.c.bf16 %v100_v16, %v100_v16  ;;  %v98_v19 = vmax.f32 %v86_v17, 0.0 }
  0xd1   :  { %121 = vst.msk [vmem:[%s198_s3 + $0xc] sm:$0xf] %vm117_vm2, %v138_v18  ;;  %v136_v20 = vpack.c.bf16 %v98_v19, %v98_v19 }
  0xd3   :  { %119 = vst.msk [vmem:[%s198_s3 + $0x4] sm:$0xf] %vm117_vm2, %v136_v20 }

// kernel: forward.43
= control target key start
LH: loop header
LB: loop body
LE: loop exit
PB: predicated region body
PF: predicated region fallthrough
CT: control target
= control target key end

     0   :  { %s660_s12 = smov 0   ;;  %s781_s0 = inlined_call_operand.vmem [shape: bf16[128,196], index: 0, kind: input, shape index: {}]   ;;  %s782_s1 = inlined_call_operand.vmem [shape: bf16[196,8], index: 1, kind: input, shape index: {}]   ;;  %s783_s2 = inlined_call_operand.vmem [shape: f32[1,8], index: 2, kind: input, shape index: {}]   ;;  %s784_s3 = inlined_call_operand.vmem [shape: bf16[128,8], index: 3, kind: output, shape index: {}]  }
   0x1 LB: > { %s516_s13 = sadd.s32 4294967295, %s637_s12   ;;  %p520_p0 = scmp.ge.s32.totalorder %s637_s12, 1  ;;  %s637_s12 = sphi %s660_s12, %s13_s12  }
   0x2   : > { %p139_p1 = scmp.lt.s32.totalorder %s637_s12, 3 }
   0x4   : > { %p140_p2 = pnand %p520_p0, %p139_p1 }
   0x5   : > { %s521_s18 = sshll.u32 (!%p140_p2), %s516_s13, 3 }
   0x6   : > { %143 = sbr.rel (%p140_p2) target bundleno = 276 (0x114), region = 32  ;;  %p165_p3 = scmp.lt.s32.totalorder (!%p140_p2), %s521_s18, 15 }
   0xb   : > { %v606_v0 = vld [vmem:[%s782_s1 + $0x38] sm:$0xff]   ;;  %v639_v1 = vmov 0   ;;  %v607_v2 = vld [vmem:[%s782_s1 + $0x30] sm:$0xff]   ;;  %s786_s18 = smov (!%p165_p3, %s521_s18), 15  ;;  %v608_v3 = vld [vmem:[%s782_s1 + $0x28] sm:$0xff]   ;;  %vm329_vm0 = vcmask 556032  }
   0xc   : > { %346 = vmatprep.subr.bf16.mxu0 %v639_v1  ;;  %571 = vmatprep.subr.bf16.mxu1 %v639_v1  ;;  %s562_s21 = sshll.u32 %s786_s18, 3  ;;  %v609_v4 = vld [vmem:[%s782_s1 + $0x20] sm:$0xff]   ;;  %v610_v6 = vld [vmem:[%s782_s1 + $0x18] sm:$0xff]   ;;  %v611_v8 = vld [vmem:[%s782_s1 + $0x10] sm:$0xff]   ;;  %vm342_vm1 = vcmask 1041408   ;;  %s525_s22 = sshll.u32 %s786_s18, 2 }
   0xd   : > { %347 = vmatpush1.bf16.msra.mxu0 %v606_v0  ;;  %584 = vmatpush1.bf16.msra.mxu1 %v606_v0  ;;  %s692_s26 = scalar_lea.vmem %s781_s0, %s562_s21  ;;  %v612_v9 = vld [vmem:[%s782_s1 + $0x8] sm:$0xff]   ;;  %v613_v10 = vld [vmem:[%s782_s1] sm:$0xff]   ;;  %v615_v13 = vld [vmem:[%s782_s1 + $0x58] sm:$0xff]   ;;  %s760_s25 = scalar_lea.vmem %s784_s3, %s525_s22  ;;  %vm451_vm2 = vcmask 60416  }
   0xe   : > { %348 = vmatprep.subr.bf16.mxu0 %v639_v1  ;;  %572 = vmatprep.subr.bf16.mxu1 %v639_v1  ;;  %v621_v5 = vld [vmem:[%s692_s26 + $0x4] ss:$8 sps:$4 sm:$0xff]   ;;  %v614_v11 = vld [vmem:[%s782_s1 + $0x60] ss:$0 sps:$4 sm:$0x33]   ;;  %v616_v14 = vld [vmem:[%s782_s1 + $0x50] sm:$0xff]  }
   0xf   : > { %v624_v7 = vld [vmem:[%s692_s26 + $0x24] ss:$8 sps:$4 sm:$0xff]   ;;  %548 = vmatprep.mubr.msk.bf16.mxu0 %vm329_vm0, %v621_v5  ;;  %v344_v12 = vsel %vm342_vm1, %v614_v11, 0  ;;  %v619_v17 = vld [vmem:[%s692_s26] ss:$8 sps:$4 sm:$0xff]  }
  0x10   : > { %550 = vmatprep.mubr.msk.bf16.mxu1 %vm329_vm0, %v624_v7  ;;  %v617_v15 = vld [vmem:[%s782_s1 + $0x48] sm:$0xff]   ;;  %v618_v16 = vld [vmem:[%s782_s1 + $0x40] sm:$0xff]   ;;  %v625_v19 = vld [vmem:[%s692_s26 + $0x14] ss:$8 sps:$4 sm:$0xff]  }
  0x11   : > { %349 = vmatpush1.bf16.msra.mxu0 %v607_v2  ;;  %585 = vmatpush1.bf16.msra.mxu1 %v607_v2  ;;  %v622_v18 = vld [vmem:[%s692_s26 + $0x20] ss:$8 sps:$4 sm:$0xff]   ;;  %v627_v20 = vld [vmem:[%s692_s26 + $0x34] ss:$8 sps:$4 sm:$0xff]   ;;  %v629_v21 = vld [vmem:[%s692_s26 + $0x10] ss:$8 sps:$4 sm:$0xff]  }
  0x12   : > { %350 = vmatprep.subr.bf16.mxu0 %v639_v1  ;;  %573 = vmatprep.subr.bf16.mxu1 %v639_v1  ;;  %v630_v22 = vld [vmem:[%s692_s26 + $0x30] ss:$8 sps:$4 sm:$0xff]   ;;  %v526_v23 = vld [vmem:[%s783_s2] ss:$0 sm:$0xff] }
  0x15   : > { %351 = vmatpush1.bf16.msra.mxu0 %v608_v3  ;;  %586 = vmatpush1.bf16.msra.mxu1 %v608_v3 }
  0x16   : > { %352 = vmatprep.subr.bf16.mxu0 %v639_v1  ;;  %574 = vmatprep.subr.bf16.mxu1 %v639_v1 }
  0x19   : > { %353 = vmatpush1.bf16.msra.mxu0 %v609_v4  ;;  %587 = vmatpush1.bf16.msra.mxu1 %v609_v4 }
  0x1a   : > { %354 = vmatprep.subr.bf16.mxu0 %v639_v1  ;;  %575 = vmatprep.subr.bf16.mxu1 %v639_v1 }
  0x1d   : > { %355 = vmatpush1.bf16.msra.mxu0 %v610_v6  ;;  %588 = vmatpush1.bf16.msra.mxu1 %v610_v6 }
  0x1e   : > { %356 = vmatprep.subr.bf16.mxu0 %v639_v1  ;;  %576 = vmatprep.subr.bf16.mxu1 %v639_v1 }
  0x21   : > { %357 = vmatpush1.bf16.msra.mxu0 %v611_v8  ;;  %589 = vmatpush1.bf16.msra.mxu1 %v611_v8 }
  0x22   : > { %358 = vmatprep.subr.bf16.mxu0 %v639_v1  ;;  %577 = vmatprep.subr.bf16.mxu1 %v639_v1 }
  0x25   : > { %359 = vmatpush1.bf16.msra.mxu0 %v612_v9  ;;  %590 = vmatpush1.bf16.msra.mxu1 %v612_v9 }
  0x26   : > { %360 = vmatprep.subr.bf16.mxu0 %v639_v1  ;;  %578 = vmatprep.subr.bf16.mxu1 %v639_v1 }
  0x29   : > { %361 = vmatpush1.bf16.msra.mxu0 %v613_v10  ;;  %591 = vmatpush1.bf16.msra.mxu1 %v613_v10 }
  0x2a   : > { %368 = vmatprep.subr.bf16.mxu0 %v639_v1  ;;  %579 = vmatprep.subr.bf16.mxu1 %v639_v1 }
  0x2d   : > { %369 = vmatpush2.bf16.msra.mxu0 %v344_v12  ;;  %592 = vmatpush2.bf16.msra.mxu1 %v344_v12 }
  0x2e   : > { %370 = vmatprep.subr.bf16.mxu0 %v639_v1  ;;  %580 = vmatprep.subr.bf16.mxu1 %v639_v1 }
  0x31   : > { %371 = vmatpush2.bf16.msra.mxu0 %v615_v13  ;;  %593 = vmatpush2.bf16.msra.mxu1 %v615_v13 }
  0x32   : > { %372 = vmatprep.subr.bf16.mxu0 %v639_v1  ;;  %581 = vmatprep.subr.bf16.mxu1 %v639_v1 }
  0x35   : > { %373 = vmatpush2.bf16.msra.mxu0 %v616_v14  ;;  %594 = vmatpush2.bf16.msra.mxu1 %v616_v14 }
  0x36   : > { %374 = vmatprep.subr.bf16.mxu0 %v639_v1  ;;  %582 = vmatprep.subr.bf16.mxu1 %v639_v1 }
  0x39   : > { %375 = vmatpush2.bf16.msra.mxu0 %v617_v15  ;;  %595 = vmatpush2.bf16.msra.mxu1 %v617_v15 }
  0x3a   : > { %376 = vmatprep.subr.bf16.mxu0 %v639_v1  ;;  %583 = vmatprep.subr.bf16.mxu1 %v639_v1 }
  0x3d   : > { %377 = vmatpush2.bf16.msra.mxu0 %v618_v16  ;;  %596 = vmatpush2.bf16.msra.mxu1 %v618_v16 }
  0x40   : > { %379 = vmatmul.mubr.bf16.vlgmr.msra.gmra.mxu0 %v619_v17  ;;  %395 = vmatmul.mubr.bf16.vlgmr.msra.gmra.mxu1 %v622_v18 }
  0x41   : > { %549 = vmatprep.mubr.msk.bf16.mxu0 %vm329_vm0, %v625_v19  ;;  %551 = vmatprep.mubr.msk.bf16.mxu1 %vm329_vm0, %v627_v20 }
  0x48   : > { %387 = vmatmul.mubr.bf16.gmra.mxu0 %v629_v21  ;;  %403 = vmatmul.mubr.bf16.gmra.mxu1 %v630_v22 }
 0x100   : > { %v380_v24 = vpop.f32.mrf.mxu0  ;;  %v396_v25 = vpop.f32.mrf.mxu1 }
 0x101   : > { %v381_v26 = vadd.f32 %v526_v23, %v380_v24  ;;  %v397_v27 = vadd.f32 %v526_v23, %v396_v25 }
 0x102   : > { %v382_v28 = vpop.f32.mrf.mxu0  ;;  %v398_v29 = vpop.f32.mrf.mxu1 }
 0x103   : > { %v411_v30 = vmax.f32 %v381_v26, 0.0  ;;  %v415_v31 = vmax.f32 %v397_v27, 0.0 }
 0x104   : > { %v383_v32 = vpop.f32.mrf.mxu0  ;;  %v399_v33 = vpop.f32.mrf.mxu1 }
 0x105   : > { %v563_v34 = vpack.c.bf16 %v411_v30, %v411_v30  ;;  %v567_v35 = vpack.c.bf16 %v415_v31, %v415_v31  ;;  %v384_v36 = vadd.f32 %v526_v23, %v383_v32  ;;  %v400_v37 = vadd.f32 %v526_v23, %v399_v33 }
 0x106   : > { %v385_v38 = vpop.f32.mrf.mxu0  ;;  %v401_v39 = vpop.f32.mrf.mxu1 }
 0x107   : > { %452 = vst.msk [vmem:[%s760_s25] sm:$0xf] %vm451_vm2, %v563_v34  ;;  %456 = vst.msk [vmem:[%s760_s25 + $0x10] sm:$0xf] %vm451_vm2, %v567_v35  ;;  %v412_v40 = vmax.f32 %v384_v36, 0.0  ;;  %v416_v41 = vmax.f32 %v400_v37, 0.0 }
 0x108   : > { %v388_v42 = vpop.f32.mrf.mxu0  ;;  %v404_v43 = vpop.f32.mrf.mxu1 }
 0x109   : > { %v564_v44 = vpack.c.bf16 %v412_v40, %v412_v40  ;;  %v568_v45 = vpack.c.bf16 %v416_v41, %v416_v41  ;;  %v389_v46 = vadd.f32 %v526_v23, %v388_v42  ;;  %v405_v47 = vadd.f32 %v526_v23, %v404_v43 }
 0x10a   : > { %v390_v48 = vpop.f32.mrf.mxu0  ;;  %v406_v49 = vpop.f32.mrf.mxu1 }
 0x10b   : > { %453 = vst.msk [vmem:[%s760_s25 + $0x4] sm:$0xf] %vm451_vm2, %v564_v44  ;;  %457 = vst.msk [vmem:[%s760_s25 + $0x14] sm:$0xf] %vm451_vm2, %v568_v45  ;;  %v413_v50 = vmax.f32 %v389_v46, 0.0  ;;  %v417_v51 = vmax.f32 %v405_v47, 0.0 }
 0x10c   : > { %v391_v52 = vpop.f32.mrf.mxu0  ;;  %v407_v53 = vpop.f32.mrf.mxu1 }
 0x10d   : > { %v565_v54 = vpack.c.bf16 %v413_v50, %v413_v50  ;;  %v569_v55 = vpack.c.bf16 %v417_v51, %v417_v51  ;;  %v392_v56 = vadd.f32 %v526_v23, %v391_v52  ;;  %v408_v57 = vadd.f32 %v526_v23, %v407_v53 }
 0x10e   : > { %v393_v58 = vpop.f32.mrf.mxu0  ;;  %v409_v59 = vpop.f32.mrf.mxu1 }
 0x10f   : > { %454 = vst.msk [vmem:[%s760_s25 + $0x8] sm:$0xf] %vm451_vm2, %v565_v54  ;;  %458 = vst.msk [vmem:[%s760_s25 + $0x18] sm:$0xf] %vm451_vm2, %v569_v55  ;;  %v414_v60 = vmax.f32 %v392_v56, 0.0  ;;  %v418_v61 = vmax.f32 %v408_v57, 0.0 }
 0x111   : > { %v566_v62 = vpack.c.bf16 %v414_v60, %v414_v60  ;;  %v570_v63 = vpack.c.bf16 %v418_v61, %v418_v61 }
 0x113   : > { %455 = vst.msk [vmem:[%s760_s25 + $0xc] sm:$0xf] %vm451_vm2, %v566_v62  ;;  %459 = vst.msk [vmem:[%s760_s25 + $0x1c] sm:$0xf] %vm451_vm2, %v570_v63 }
 0x114 PF: > { %s13_s12 = sadd.s32 1, %s637_s12  }
 0x115   : > { %p10_p4 = scmp.ge.s32.totalorder %s13_s12, 4  }
 0x117   :  { %12 = sbr.rel (!%p10_p4) target bundleno = 1 (0x1), region = 62 }

// kernel: forward.47
= control target key start
LH: loop header
LB: loop body
LE: loop exit
PB: predicated region body
PF: predicated region fallthrough
CT: control target
= control target key end

     0   :  { %vm52_vm0 = vcmask 261120   ;;  %vm128_vm1 = vcmask 60416   ;;  %s215_s1 = inlined_call_operand.vmem [shape: bf16[32,8], index: 1, kind: input, shape index: {}]   ;;  %s216_s0 = inlined_call_operand.vmem [shape: bf16[32,32], index: 0, kind: input, shape index: {}]   ;;  %s217_s2 = inlined_call_operand.vmem [shape: f32[1,8], index: 2, kind: input, shape index: {}]   ;;  %s218_s3 = inlined_call_operand.vmem [shape: bf16[32,8], index: 3, kind: output, shape index: {}]  }
   0x1   :  { %v164_v0 = vld [vmem:[%s215_s1 + $0x8] sm:$0xff]   ;;  %v165_v1 = vld [vmem:[%s215_s1] sm:$0xff]  }
   0x2   :  { %156 = vmatprep.subr.bf16.mxu0 %v164_v0  ;;  %v166_v2 = vld [vmem:[%s216_s0] sm:$0xff]   ;;  %v167_v3 = vld [vmem:[%s216_s0 + $0x8] sm:$0xff]  }
   0x3   :  { %157 = vmatpush3.bf16.msra.mxu0 %v164_v0  ;;  %160 = vmatprep.mubr.msk.bf16.mxu0 %vm52_vm0, %v166_v2  ;;  %v137_v4 = vld [vmem:[%s217_s2] ss:$0 sm:$0xff] }
   0x4   :  { %158 = vmatprep.subr.bf16.mxu0 %v165_v1 }
   0x7   :  { %159 = vmatpush3.bf16.msra.mxu0 %v165_v1 }
   0xa   :  { %161 = vmatmul.mubr.msk.bf16.vlgmr.msra.gmra.mxu0 %vm52_vm0, %v167_v3 }
  0xca   :  { %v162_v5 = vpop.f32.mrf.mxu0 }
  0xcb   :  { %v102_v6 = vadd.f32 %v162_v5, %v137_v4 }
  0xcc   :  { %v93_v7 = vpop.f32.mrf.mxu0 }
  0xcd   :  { %v110_v8 = vmax.f32 %v102_v6, 0.0  ;;  %v94_v9 = vadd.f32 %v137_v4, %v93_v7 }
  0xce   :  { %v163_v10 = vpop.f32.mrf.mxu0 }
  0xcf   :  { %v150_v11 = vpack.c.bf16 %v110_v8, %v110_v8  ;;  %v108_v12 = vmax.f32 %v94_v9, 0.0  ;;  %v105_v13 = vadd.f32 %v163_v10, %v137_v4 }
  0xd0   :  { %v96_v14 = vpop.f32.mrf.mxu0 }
  0xd1   :  { %131 = vst.msk [vmem:[%s218_s3 + $0x8] sm:$0xf] %vm128_vm1, %v150_v11  ;;  %v148_v15 = vpack.c.bf16 %v108_v12, %v108_v12  ;;  %v111_v16 = vmax.f32 %v105_v13, 0.0  ;;  %v97_v17 = vadd.f32 %v137_v4, %v96_v14 }
  0xd3   :  { %129 = vst.msk [vmem:[%s218_s3] sm:$0xf] %vm128_vm1, %v148_v15  ;;  %v151_v18 = vpack.c.bf16 %v111_v16, %v111_v16  ;;  %v109_v19 = vmax.f32 %v97_v17, 0.0 }
  0xd5   :  { %132 = vst.msk [vmem:[%s218_s3 + $0xc] sm:$0xf] %vm128_vm1, %v151_v18  ;;  %v149_v20 = vpack.c.bf16 %v109_v19, %v109_v19 }
  0xd7   :  { %130 = vst.msk [vmem:[%s218_s3 + $0x4] sm:$0xf] %vm128_vm1, %v149_v20 }

// kernel: forward.46
= control target key start
LH: loop header
LB: loop body
LE: loop exit
PB: predicated region body
PF: predicated region fallthrough
CT: control target
= control target key end

     0   :  { %vm59_vm0 = vcmask 1043456   ;;  %vm169_vm1 = vcmask 588800   ;;  %vm52_vm2 = vcmask 64512   ;;  %vm324_vm3 = vcmask 257024   ;;  %s521_s1 = inlined_call_operand.vmem [shape: bf16[72,8], index: 1, kind: input, shape index: {}]   ;;  %s522_s0 = inlined_call_operand.vmem [shape: bf16[32,72], index: 0, kind: input, shape index: {}]   ;;  %s523_s6 = inlined_call_operand.vmem [shape: bf16[8,32], index: 6, kind: input, shape index: {}]   ;;  %s524_s5 = inlined_call_operand.vmem [shape: bf16[32,8], index: 5, kind: input, shape index: {}]   ;;  %s525_s3 = inlined_call_operand.vmem [shape: bf16[8,32], index: 3, kind: input, shape index: {}]   ;;  %s526_s2 = inlined_call_operand.vmem [shape: f32[1,8], index: 2, kind: input, shape index: {}]   ;;  %s527_s7 = inlined_call_operand.vmem [shape: f32[1,32], index: 7, kind: input, shape index: {}]   ;;  %s528_s4 = inlined_call_operand.vmem [shape: f32[1,32], index: 4, kind: input, shape index: {}]   ;;  %s529_s8 = inlined_call_operand.vmem [shape: bf16[32,32], index: 8, kind: output, shape index: {}]  }
   0x1   :  { %v401_v0 = vld [vmem:[%s521_s1 + $0x20] ss:$0 sps:$4 sm:$0xff]   ;;  %v402_v1 = vld [vmem:[%s521_s1 + $0x18] sm:$0xff]   ;;  %v403_v3 = vld [vmem:[%s521_s1 + $0x10] sm:$0xff]  }
   0x2   :  { %399 = vmatprep.subr.msk.bf16.mxu1 %vm59_vm0, %v401_v0  ;;  %v177_v2 = vsel %vm59_vm0, %v401_v0, 0  ;;  %v406_v4 = vld [vmem:[%s522_s0] sm:$0xff]   ;;  %v404_v5 = vld [vmem:[%s521_s1 + $0x8] sm:$0xff]  }
   0x3   :  { %379 = vmatpush3.bf16.msra.mxu1 %v177_v2  ;;  %v34_v6 = vld [vmem:[%s523_s6] sm:$0xf]  ;;  %388 = vmatprep.mubr.msk.bf16.mxu1 %vm169_vm1, %v406_v4  ;;  %v409_v9 = vld [vmem:[%s524_s5 + $0x8] sm:$0xff]  }
   0x4   :  { %380 = vmatprep.subr.bf16.mxu1 %v402_v1  ;;  %v61_v7 = vsel %vm59_vm0, %v34_v6, 0  ;;  %v408_v8 = vld [vmem:[%s524_s5] sm:$0xff]   ;;  %398 = vmatprep.subr.msk.bf16.mxu0 %vm59_vm0, %v34_v6  ;;  %v407_v11 = vld [vmem:[%s522_s0 + $0x8] sm:$0xff]  }
   0x5   :  { %373 = vmatpush3.bf16.msra.mxu0 %v61_v7  ;;  %374 = vmatprep.mubr.msk.bf16.mxu0 %vm52_vm2, %v408_v8  ;;  %v405_v10 = vld [vmem:[%s521_s1] sm:$0xff]  }
   0x6   :  { %v234_v12 = vld [vmem:[%s525_s3] sm:$0xf] }
   0x7   :  { %381 = vmatpush3.bf16.msra.mxu1 %v402_v1  ;;  %400 = vmatprep.subr.msk.bf16.mxu0 %vm59_vm0, %v234_v12  ;;  %v249_v13 = vsel %vm59_vm0, %v234_v12, 0  ;;  %v338_v16 = vld [vmem:[%s526_s2] ss:$0 sm:$0xff] }
   0x8   :  { %382 = vmatprep.subr.bf16.mxu1 %v403_v3  ;;  %375 = vmatmul.mubr.msk.bf16.vlgmr.msra.gmra.mxu0 %vm52_vm2, %v409_v9  ;;  %v333_v32 = vld [vmem:[%s527_s7] ss:$0 sm:$0xff] }
   0x9   :  { %393 = vmatpush3.bf16.msra.mxu0 %v249_v13  ;;  %v348_v34 = vld [vmem:[%s528_s4] ss:$0 sm:$0xff] }
   0xb   :  { %383 = vmatpush3.bf16.msra.mxu1 %v403_v3 }
   0xc   :  { %384 = vmatprep.subr.bf16.mxu1 %v404_v5 }
   0xf   :  { %385 = vmatpush3.bf16.msra.mxu1 %v404_v5 }
  0x10   :  { %386 = vmatprep.subr.bf16.mxu1 %v405_v10 }
  0x13   :  { %387 = vmatpush3.bf16.msra.mxu1 %v405_v10 }
  0x16   :  { %389 = vmatmul.mubr.msk.bf16.vlgmr.msra.gmra.mxu1 %vm169_vm1, %v407_v11 }
  0xc8   :  { %v376_v29 = vpop.f32.mrf.mxu0 }
  0xc9   :  { %v106_v36 = vadd.f32 %v376_v29, %v333_v32 }
  0xca   :  { %v97_v30 = vpop.f32.mrf.mxu0 }
  0xcb   :  { %v98_v39 = vadd.f32 %v333_v32, %v97_v30 }
  0xcc   :  { %v377_v31 = vpop.f32.mrf.mxu0 }
  0xcd   :  { %v109_v43 = vadd.f32 %v377_v31, %v333_v32 }
  0xce   :  { %v100_v33 = vpop.f32.mrf.mxu0 }
  0xcf   :  { %v101_v47 = vadd.f32 %v333_v32, %v100_v33 }
  0xd6   :  { %v390_v14 = vpop.f32.mrf.mxu1 }
  0xd7   :  { %v222_v20 = vadd.f32 %v390_v14, %v338_v16 }
  0xd8   :  { %v213_v15 = vpop.f32.mrf.mxu1 }
  0xd9   :  { %v214_v18 = vadd.f32 %v338_v16, %v213_v15  ;;  %v230_v26 = vmax.f32 %v222_v20, 0.0 }
  0xda   :  { %v391_v17 = vpop.f32.mrf.mxu1 }
  0xdb   :  { %v225_v19 = vadd.f32 %v391_v17, %v338_v16  ;;  %v228_v24 = vmax.f32 %v214_v18, 0.0 }
  0xdc   :  { %v216_v21 = vpop.f32.mrf.mxu1 }
  0xdd   :  { %v217_v22 = vadd.f32 %v338_v16, %v216_v21  ;;  %v231_v23 = vmax.f32 %v225_v19, 0.0 }
  0xdf   :  { %v229_v25 = vmax.f32 %v217_v22, 0.0  ;;  %v233_v28 = vpack.c.bf16 %v231_v23, %v230_v26 }
  0xe1   :  { %v232_v27 = vpack.c.bf16 %v229_v25, %v228_v24 }
  0xe3   :  { %394 = vmatprep.mubr.msk.bf16.mxu0 %vm52_vm2, %v232_v27 }
  0xe4   :  { %395 = vmatmul.mubr.msk.bf16.vlgmr.msra.gmra.mxu0 %vm52_vm2, %v233_v28 }
 0x1a4   :  { %v396_v35 = vpop.f32.mrf.mxu0 }
 0x1a5   :  { %v294_v37 = vadd.f32 %v396_v35, %v348_v34 }
 0x1a6   :  { %v285_v38 = vpop.f32.mrf.mxu0 }
 0x1a7   :  { %v302_v40 = vadd.f32 %v294_v37, %v106_v36  ;;  %v286_v41 = vadd.f32 %v348_v34, %v285_v38 }
 0x1a8   :  { %v397_v42 = vpop.f32.mrf.mxu0 }
 0x1a9   :  { %v306_v44 = vmax.f32 %v302_v40, 0.0  ;;  %v300_v45 = vadd.f32 %v286_v41, %v98_v39  ;;  %v297_v46 = vadd.f32 %v397_v42, %v348_v34 }
 0x1aa   :  { %v288_v48 = vpop.f32.mrf.mxu0 }
 0x1ab   :  { %v357_v49 = vpack.c.bf16 %v306_v44, %v306_v44  ;;  %v304_v50 = vmax.f32 %v300_v45, 0.0  ;;  %v303_v51 = vadd.f32 %v297_v46, %v109_v43  ;;  %v289_v52 = vadd.f32 %v348_v34, %v288_v48 }
 0x1ad   :  { %327 = vst.msk [vmem:[%s529_s8 + $0x8] sm:$0xf] %vm324_vm3, %v357_v49  ;;  %v355_v53 = vpack.c.bf16 %v304_v50, %v304_v50  ;;  %v307_v54 = vmax.f32 %v303_v51, 0.0  ;;  %v301_v55 = vadd.f32 %v289_v52, %v101_v47 }
 0x1af   :  { %325 = vst.msk [vmem:[%s529_s8] sm:$0xf] %vm324_vm3, %v355_v53  ;;  %v358_v56 = vpack.c.bf16 %v307_v54, %v307_v54  ;;  %v305_v57 = vmax.f32 %v301_v55, 0.0 }
 0x1b1   :  { %328 = vst.msk [vmem:[%s529_s8 + $0xc] sm:$0xf] %vm324_vm3, %v358_v56  ;;  %v356_v58 = vpack.c.bf16 %v305_v57, %v305_v57 }
 0x1b3   :  { %326 = vst.msk [vmem:[%s529_s8 + $0x4] sm:$0xf] %vm324_vm3, %v356_v58 }

// kernel: forward.48
= control target key start
LH: loop header
LB: loop body
LE: loop exit
PB: predicated region body
PF: predicated region fallthrough
CT: control target
= control target key end

     0   :  { %vm88_vm0 = vcmask 1043456   ;;  %vm81_vm1 = vcmask 588800   ;;  %vm155_vm2 = vcmask 64512   ;;  %vm246_vm3 = vcmask 257024   ;;  %s411_s1 = inlined_call_operand.vmem [shape: bf16[72,8], index: 1, kind: input, shape index: {}]   ;;  %s412_s0 = inlined_call_operand.vmem [shape: bf16[32,72], index: 0, kind: input, shape index: {}]   ;;  %s413_s3 = inlined_call_operand.vmem [shape: bf16[8,32], index: 3, kind: input, shape index: {}]   ;;  %s414_s2 = inlined_call_operand.vmem [shape: f32[1,8], index: 2, kind: input, shape index: {}]   ;;  %s415_s5 = inlined_call_operand.vmem [shape: bf16[32,32], index: 5, kind: input, shape index: {}]   ;;  %s416_s4 = inlined_call_operand.vmem [shape: f32[1,32], index: 4, kind: input, shape index: {}]   ;;  %s417_s6 = inlined_call_operand.vmem [shape: bf16[32,32], index: 6, kind: output, shape index: {}]  }
   0x1   :  { %v317_v0 = vld [vmem:[%s411_s1 + $0x20] ss:$0 sps:$4 sm:$0xff]   ;;  %v318_v1 = vld [vmem:[%s411_s1 + $0x18] sm:$0xff]   ;;  %v319_v3 = vld [vmem:[%s411_s1 + $0x10] sm:$0xff]  }
   0x2   :  { %315 = vmatprep.subr.msk.bf16.mxu0 %vm88_vm0, %v317_v0  ;;  %v90_v2 = vsel %vm88_vm0, %v317_v0, 0  ;;  %v322_v4 = vld [vmem:[%s412_s0] sm:$0xff]   ;;  %v320_v5 = vld [vmem:[%s411_s1 + $0x8] sm:$0xff]  }
   0x3   :  { %296 = vmatpush3.bf16.msra.mxu0 %v90_v2  ;;  %305 = vmatprep.mubr.msk.bf16.mxu0 %vm81_vm1, %v322_v4  ;;  %v321_v6 = vld [vmem:[%s411_s1] sm:$0xff]   ;;  %v323_v7 = vld [vmem:[%s412_s0 + $0x8] sm:$0xff]  }
   0x4   :  { %297 = vmatprep.subr.bf16.mxu0 %v318_v1  ;;  %v147_v8 = vld [vmem:[%s413_s3] sm:$0xf]  ;;  %v284_v25 = vld [vmem:[%s415_s5 + $0x8] sm:$0xff]  }
   0x5   :  { %316 = vmatprep.subr.msk.bf16.mxu1 %vm88_vm0, %v147_v8  ;;  %v163_v9 = vsel %vm88_vm0, %v147_v8, 0  ;;  %v255_v12 = vld [vmem:[%s414_s2] ss:$0 sm:$0xff]  ;;  %v282_v28 = vunpack.c.l.bf16 %v284_v25  ;;  %v283_v35 = vunpack.c.h.bf16 %v284_v25 }
   0x6   :  { %310 = vmatpush3.bf16.msra.mxu1 %v163_v9  ;;  %v265_v26 = vld [vmem:[%s416_s4] ss:$0 sm:$0xff] }
   0x7   :  { %298 = vmatpush3.bf16.msra.mxu0 %v318_v1  ;;  %v277_v27 = vld [vmem:[%s415_s5] sm:$0xff]  }
   0x8   :  { %299 = vmatprep.subr.bf16.mxu0 %v319_v3  ;;  %v278_v31 = vunpack.c.l.bf16 %v277_v27  ;;  %v279_v40 = vunpack.c.h.bf16 %v277_v27 }
   0xb   :  { %300 = vmatpush3.bf16.msra.mxu0 %v319_v3 }
   0xc   :  { %301 = vmatprep.subr.bf16.mxu0 %v320_v5 }
   0xf   :  { %302 = vmatpush3.bf16.msra.mxu0 %v320_v5 }
  0x10   :  { %303 = vmatprep.subr.bf16.mxu0 %v321_v6 }
  0x13   :  { %304 = vmatpush3.bf16.msra.mxu0 %v321_v6 }
  0x16   :  { %306 = vmatmul.mubr.msk.bf16.vlgmr.msra.gmra.mxu0 %vm81_vm1, %v323_v7 }
  0xd6   :  { %v307_v10 = vpop.f32.mrf.mxu0 }
  0xd7   :  { %v135_v16 = vadd.f32 %v307_v10, %v255_v12 }
  0xd8   :  { %v126_v11 = vpop.f32.mrf.mxu0 }
  0xd9   :  { %v127_v14 = vadd.f32 %v255_v12, %v126_v11  ;;  %v143_v22 = vmax.f32 %v135_v16, 0.0 }
  0xda   :  { %v308_v13 = vpop.f32.mrf.mxu0 }
  0xdb   :  { %v138_v15 = vadd.f32 %v308_v13, %v255_v12  ;;  %v141_v20 = vmax.f32 %v127_v14, 0.0 }
  0xdc   :  { %v129_v17 = vpop.f32.mrf.mxu0 }
  0xdd   :  { %v130_v18 = vadd.f32 %v255_v12, %v129_v17  ;;  %v144_v19 = vmax.f32 %v138_v15, 0.0 }
  0xdf   :  { %v142_v21 = vmax.f32 %v130_v18, 0.0  ;;  %v146_v24 = vpack.c.bf16 %v144_v19, %v143_v22 }
  0xe1   :  { %v145_v23 = vpack.c.bf16 %v142_v21, %v141_v20 }
  0xe3   :  { %311 = vmatprep.mubr.msk.bf16.mxu1 %vm155_vm2, %v145_v23 }
  0xe4   :  { %312 = vmatmul.mubr.msk.bf16.vlgmr.msra.gmra.mxu1 %vm155_vm2, %v146_v24 }
 0x1a4   :  { %v313_v29 = vpop.f32.mrf.mxu1 }
 0x1a5   :  { %v208_v30 = vadd.f32 %v313_v29, %v265_v26 }
 0x1a6   :  { %v199_v32 = vpop.f32.mrf.mxu1 }
 0x1a7   :  { %v224_v33 = vadd.f32 %v282_v28, %v208_v30  ;;  %v200_v34 = vadd.f32 %v265_v26, %v199_v32 }
 0x1a8   :  { %v314_v36 = vpop.f32.mrf.mxu1 }
 0x1a9   :  { %v228_v37 = vmax.f32 %v224_v33, 0.0  ;;  %v222_v38 = vadd.f32 %v278_v31, %v200_v34  ;;  %v211_v39 = vadd.f32 %v314_v36, %v265_v26 }
 0x1aa   :  { %v202_v41 = vpop.f32.mrf.mxu1 }
 0x1ab   :  { %v274_v42 = vpack.c.bf16 %v228_v37, %v228_v37  ;;  %v226_v43 = vmax.f32 %v222_v38, 0.0  ;;  %v225_v44 = vadd.f32 %v283_v35, %v211_v39  ;;  %v203_v45 = vadd.f32 %v265_v26, %v202_v41 }
 0x1ad   :  { %249 = vst.msk [vmem:[%s417_s6 + $0x8] sm:$0xf] %vm246_vm3, %v274_v42  ;;  %v272_v46 = vpack.c.bf16 %v226_v43, %v226_v43  ;;  %v229_v47 = vmax.f32 %v225_v44, 0.0  ;;  %v223_v48 = vadd.f32 %v279_v40, %v203_v45 }
 0x1af   :  { %247 = vst.msk [vmem:[%s417_s6] sm:$0xf] %vm246_vm3, %v272_v46  ;;  %v275_v49 = vpack.c.bf16 %v229_v47, %v229_v47  ;;  %v227_v50 = vmax.f32 %v223_v48, 0.0 }
 0x1b1   :  { %250 = vst.msk [vmem:[%s417_s6 + $0xc] sm:$0xf] %vm246_vm3, %v275_v49  ;;  %v273_v51 = vpack.c.bf16 %v227_v50, %v227_v50 }
 0x1b3   :  { %248 = vst.msk [vmem:[%s417_s6 + $0x4] sm:$0xf] %vm246_vm3, %v273_v51 }

// kernel: forward.51
= control target key start
LH: loop header
LB: loop body
LE: loop exit
PB: predicated region body
PF: predicated region fallthrough
CT: control target
= control target key end

     0   :  { %vm52_vm0 = vcmask 261120   ;;  %vm128_vm1 = vcmask 125952   ;;  %s215_s1 = inlined_call_operand.vmem [shape: bf16[32,16], index: 1, kind: input, shape index: {}]   ;;  %s216_s0 = inlined_call_operand.vmem [shape: bf16[32,32], index: 0, kind: input, shape index: {}]   ;;  %s217_s2 = inlined_call_operand.vmem [shape: f32[1,16], index: 2, kind: input, shape index: {}]   ;;  %s218_s3 = inlined_call_operand.vmem [shape: bf16[32,16], index: 3, kind: output, shape index: {}]  }
   0x1   :  { %v164_v0 = vld [vmem:[%s215_s1 + $0x8] sm:$0xff]   ;;  %v165_v1 = vld [vmem:[%s215_s1] sm:$0xff]  }
   0x2   :  { %156 = vmatprep.subr.bf16.mxu0 %v164_v0  ;;  %v166_v2 = vld [vmem:[%s216_s0] sm:$0xff]   ;;  %v167_v3 = vld [vmem:[%s216_s0 + $0x8] sm:$0xff]  }
   0x3   :  { %157 = vmatpush3.bf16.msra.mxu0 %v164_v0  ;;  %160 = vmatprep.mubr.msk.bf16.mxu0 %vm52_vm0, %v166_v2  ;;  %v137_v4 = vld [vmem:[%s217_s2] ss:$0 sm:$0xff] }
   0x4   :  { %158 = vmatprep.subr.bf16.mxu0 %v165_v1 }
   0x7   :  { %159 = vmatpush3.bf16.msra.mxu0 %v165_v1 }
   0xa   :  { %161 = vmatmul.mubr.msk.bf16.vlgmr.msra.gmra.mxu0 %vm52_vm0, %v167_v3 }
  0xca   :  { %v162_v5 = vpop.f32.mrf.mxu0 }
  0xcb   :  { %v102_v6 = vadd.f32 %v162_v5, %v137_v4 }
  0xcc   :  { %v93_v7 = vpop.f32.mrf.mxu0 }
  0xcd   :  { %v110_v8 = vmax.f32 %v102_v6, 0.0  ;;  %v94_v9 = vadd.f32 %v137_v4, %v93_v7 }
  0xce   :  { %v163_v10 = vpop.f32.mrf.mxu0 }
  0xcf   :  { %v150_v11 = vpack.c.bf16 %v110_v8, %v110_v8  ;;  %v108_v12 = vmax.f32 %v94_v9, 0.0  ;;  %v105_v13 = vadd.f32 %v163_v10, %v137_v4 }
  0xd0   :  { %v96_v14 = vpop.f32.mrf.mxu0 }
  0xd1   :  { %131 = vst.msk [vmem:[%s218_s3 + $0x8] sm:$0xf] %vm128_vm1, %v150_v11  ;;  %v148_v15 = vpack.c.bf16 %v108_v12, %v108_v12  ;;  %v111_v16 = vmax.f32 %v105_v13, 0.0  ;;  %v97_v17 = vadd.f32 %v137_v4, %v96_v14 }
  0xd3   :  { %129 = vst.msk [vmem:[%s218_s3] sm:$0xf] %vm128_vm1, %v148_v15  ;;  %v151_v18 = vpack.c.bf16 %v111_v16, %v111_v16  ;;  %v109_v19 = vmax.f32 %v97_v17, 0.0 }
  0xd5   :  { %132 = vst.msk [vmem:[%s218_s3 + $0xc] sm:$0xf] %vm128_vm1, %v151_v18  ;;  %v149_v20 = vpack.c.bf16 %v109_v19, %v109_v19 }
  0xd7   :  { %130 = vst.msk [vmem:[%s218_s3 + $0x4] sm:$0xf] %vm128_vm1, %v149_v20 }

// kernel: forward.53
= control target key start
LH: loop header
LB: loop body
LE: loop exit
PB: predicated region body
PF: predicated region fallthrough
CT: control target
= control target key end

     0   :  { %v136_v0 = vmov 0.0   ;;  %vm137_vm0 = vmmov 0   ;;  %vm55_vm1 = vcmask 523264   ;;  %vm101_vm2 = vcmask 125952   ;;  %s179_s1 = inlined_call_operand.vmem [shape: bf16[64,16], index: 1, kind: input, shape index: {}]   ;;  %s180_s0 = inlined_call_operand.vmem [shape: bf16[8,64], index: 0, kind: input, shape index: {}]   ;;  %s181_s2 = inlined_call_operand.vmem [shape: f32[1,16], index: 2, kind: input, shape index: {}]   ;;  %s182_s3 = inlined_call_operand.vmem [shape: bf16[8,16], index: 3, kind: output, shape index: {}]  }
   0x1   :  { %118 = vmatprep.subr.bf16.mxu0 %v136_v0  ;;  %v132_v1 = vld [vmem:[%s179_s1 + $0x18] sm:$0xff]   ;;  %126 = vmatprep.mubr.msk.bf16.mxu0 %vm137_vm0, %v136_v0  ;;  %v133_v2 = vld [vmem:[%s179_s1 + $0x10] sm:$0xff]   ;;  %v134_v3 = vld [vmem:[%s179_s1 + $0x8] sm:$0xff]  }
   0x2   :  { %119 = vmatpush3.bf16.msra.mxu0 %v132_v1  ;;  %v135_v4 = vld [vmem:[%s179_s1] sm:$0xff]  }
   0x3   :  { %120 = vmatprep.subr.bf16.mxu0 %v136_v0  ;;  %v15_v5 = vld [vmem:[%s180_s0] sm:$0xf] }
   0x4   :  { %v107_v6 = vld [vmem:[%s181_s2] ss:$0 sm:$0xff] }
   0x6   :  { %121 = vmatpush3.bf16.msra.mxu0 %v133_v2 }
   0x7   :  { %122 = vmatprep.subr.bf16.mxu0 %v136_v0 }
   0xa   :  { %123 = vmatpush3.bf16.msra.mxu0 %v134_v3 }
   0xb   :  { %124 = vmatprep.subr.bf16.mxu0 %v136_v0 }
   0xe   :  { %125 = vmatpush3.bf16.msra.mxu0 %v135_v4 }
  0x11   :  { %127 = vmatmul.mubr.msk.bf16.vlgmr.msra.gmra.mxu0 %vm55_vm1, %v15_v5 }
  0xd1   :  { %v93_v7 = vpop.f32.mrf.mxu0 }
  0xd2   :  { %v94_v8 = vadd.f32 %v107_v6, %v93_v7 }
  0xd3   :  { %v128_v9 = vpop.f32.mrf.mxu0 }
  0xd4   :  { %v99_v10 = vmax.f32 %v94_v8, 0.0 }
  0xd5   :  { %v96_v11 = vpop.f32.mrf.mxu0 }
  0xd6   :  { %v100_v12 = vpack.c.bf16 %v99_v10, %v99_v10 }
  0xd7   :  { %v129_v13 = vpop.f32.mrf.mxu0 }
  0xd8   :  { %102 = vst.msk [vmem:[%s182_s3] sm:$0xf] %vm101_vm2, %v100_v12 }

// kernel: forward.52
= control target key start
LH: loop header
LB: loop body
LE: loop exit
PB: predicated region body
PF: predicated region fallthrough
CT: control target
= control target key end

     0   :  { %v353_v0 = vmov 0   ;;  %v354_v2 = vmov 0.0   ;;  %vm355_vm0 = vmmov 0   ;;  %vm184_vm1 = vcmask 130048   ;;  %s459_s1 = inlined_call_operand.vmem [shape: bf16[144,16], index: 1, kind: input, shape index: {}]   ;;  %s460_s0 = inlined_call_operand.vmem [shape: bf16[8,144], index: 0, kind: input, shape index: {}]   ;;  %s461_s6 = inlined_call_operand.vmem [shape: bf16[32,64], index: 6, kind: input, shape index: {}]   ;;  %s462_s3 = inlined_call_operand.vmem [shape: bf16[16,64], index: 3, kind: input, shape index: {}]   ;;  %s463_s5 = inlined_call_operand.vmem [shape: bf16[8,32], index: 5, kind: input, shape index: {}]   ;;  %s464_s2 = inlined_call_operand.vmem [shape: f32[1,16], index: 2, kind: input, shape index: {}]   ;;  %s465_s7 = inlined_call_operand.vmem [shape: f32[1,64], index: 7, kind: input, shape index: {}]   ;;  %s466_s4 = inlined_call_operand.vmem [shape: f32[1,64], index: 4, kind: input, shape index: {}]   ;;  %s467_s8 = inlined_call_operand.vmem [shape: bf16[8,64], index: 8, kind: output, shape index: {}]  }
   0x1   :  { %188 = vmatprep.subr.bf16.mxu1 %v353_v0  ;;  %v339_v1 = vld [vmem:[%s459_s1 + $0x38] sm:$0xff]   ;;  %322 = vmatprep.subr.bf16.mxu0 %v354_v2  ;;  %v340_v3 = vld [vmem:[%s459_s1 + $0x30] sm:$0xff]   ;;  %v341_v4 = vld [vmem:[%s459_s1 + $0x28] sm:$0xff]   ;;  %vm54_vm2 = vcmask 261120   ;;  %vm291_vm3 = vcmask 519168  }
   0x2   :  { %326 = vmatprep.mubr.msk.bf16.mxu0 %vm355_vm0, %v354_v2  ;;  %189 = vmatpush1.bf16.msra.mxu1 %v339_v1  ;;  %v342_v5 = vld [vmem:[%s459_s1 + $0x20] sm:$0xff]   ;;  %v350_v8 = vld [vmem:[%s461_s6 + $0x8] sm:$0xff]   ;;  %v343_v10 = vld [vmem:[%s459_s1 + $0x18] sm:$0xff]  }
   0x3   :  { %190 = vmatprep.subr.bf16.mxu1 %v353_v0  ;;  %v98_v6 = vld [vmem:[%s460_s0] sm:$0xff]  ;;  %323 = vmatpush3.bf16.msra.mxu0 %v350_v8  ;;  %v344_v13 = vld [vmem:[%s459_s1 + $0x10] sm:$0xff]   ;;  %v345_v14 = vld [vmem:[%s459_s1 + $0x8] sm:$0xff]  }
   0x4   :  { %v303_v7 = vcombine.high %v98_v6, %v98_v6  ;;  %v351_v9 = vld [vmem:[%s461_s6] sm:$0xff]   ;;  %324 = vmatprep.subr.bf16.mxu0 %v354_v2  ;;  %v302_v17 = vcombine.low %v98_v6, %v98_v6 }
   0x5   :  { %v30_v11 = vld [vmem:[%s463_s5] sm:$0xf] }
   0x6   :  { %191 = vmatpush1.bf16.msra.mxu1 %v340_v3  ;;  %313 = vmatprep.mubr.msk.bf16.mxu1 %vm184_vm1, %v303_v7  ;;  %v352_v12 = vld [vmem:[%s462_s3] sm:$0xff]  }
   0x7   :  { %192 = vmatprep.subr.bf16.mxu1 %v353_v0  ;;  %325 = vmatpush3.bf16.msra.mxu0 %v351_v9  ;;  %v346_v15 = vld [vmem:[%s459_s1] sm:$0xff]  }
   0x8   :  { %330 = vmatprep.subr.bf16.mxu0 %v354_v2  ;;  %v347_v16 = vld [vmem:[%s459_s1 + $0x40] sm:$0xff]  }
   0x9   :  { %v301_v22 = vld [vmem:[%s464_s2] ss:$0 sm:$0xff] }
   0xa   :  { %193 = vmatpush1.bf16.msra.mxu1 %v341_v4  ;;  %327 = vmatmul.mubr.msk.bf16.vlgmr.msra.gmra.mxu0 %vm54_vm2, %v30_v11  ;;  %v297_v30 = vld [vmem:[%s465_s7] ss:$0 sm:$0xff] }
   0xb   :  { %194 = vmatprep.subr.bf16.mxu1 %v353_v0  ;;  %331 = vmatpush3.bf16.msra.mxu0 %v352_v12  ;;  %v314_v31 = vld [vmem:[%s466_s4] ss:$0 sm:$0xff] }
   0xc   :  { %332 = vmatprep.mubr.msk.bf16.mxu0 %vm355_vm0, %v354_v2 }
   0xe   :  { %195 = vmatpush1.bf16.msra.mxu1 %v342_v5 }
   0xf   :  { %196 = vmatprep.subr.bf16.mxu1 %v353_v0 }
  0x12   :  { %197 = vmatpush1.bf16.msra.mxu1 %v343_v10 }
  0x13   :  { %198 = vmatprep.subr.bf16.mxu1 %v353_v0 }
  0x16   :  { %199 = vmatpush1.bf16.msra.mxu1 %v344_v13 }
  0x17   :  { %200 = vmatprep.subr.bf16.mxu1 %v353_v0 }
  0x1a   :  { %201 = vmatpush1.bf16.msra.mxu1 %v345_v14 }
  0x1b   :  { %202 = vmatprep.subr.bf16.mxu1 %v353_v0 }
  0x1e   :  { %203 = vmatpush1.bf16.msra.mxu1 %v346_v15 }
  0x1f   :  { %218 = vmatprep.subr.bf16.mxu1 %v353_v0 }
  0x22   :  { %219 = vmatpush2.bf16.msra.mxu1 %v347_v16 }
  0x25   :  { %221 = vmatmul.mubr.bf16.vlgmr.msra.gmra.mxu1 %v302_v17 }
  0xca   :  { %v92_v18 = vpop.f32.mrf.mxu0 }
  0xcb   :  { %v93_v33 = vadd.f32 %v297_v30, %v92_v18 }
  0xcc   :  { %v328_v19 = vpop.f32.mrf.mxu0 }
  0xce   :  { %v95_v20 = vpop.f32.mrf.mxu0 }
  0xd0   :  { %v329_v21 = vpop.f32.mrf.mxu0 }
  0xe5   :  { %v222_v23 = vpop.f32.mrf.mxu1 }
  0xe6   :  { %v223_v24 = vadd.f32 %v301_v22, %v222_v23 }
  0xe7   :  { %v224_v25 = vpop.f32.mrf.mxu1 }
  0xe8   :  { %v228_v26 = vmax.f32 %v223_v24, 0.0 }
  0xe9   :  { %v225_v27 = vpop.f32.mrf.mxu1 }
  0xea   :  { %v229_v28 = vpack.c.bf16 %v228_v26, %v228_v26 }
  0xeb   :  { %v226_v29 = vpop.f32.mrf.mxu1 }
  0xec   :  { %333 = vmatmul.mubr.msk.bf16.vlgmr.msra.gmra.mxu0 %vm184_vm1, %v229_v28 }
 0x1ac   :  { %v282_v32 = vpop.f32.mrf.mxu0 }
 0x1ad   :  { %v283_v34 = vadd.f32 %v314_v31, %v282_v32 }
 0x1ae   :  { %v334_v35 = vpop.f32.mrf.mxu0 }
 0x1af   :  { %v288_v36 = vadd.f32 %v283_v34, %v93_v33 }
 0x1b0   :  { %v285_v37 = vpop.f32.mrf.mxu0 }
 0x1b1   :  { %v289_v38 = vmax.f32 %v288_v36, 0.0 }
 0x1b2   :  { %v335_v39 = vpop.f32.mrf.mxu0 }
 0x1b3   :  { %v290_v40 = vpack.c.bf16 %v289_v38, %v289_v38 }
 0x1b5   :  { %292 = vst.msk [vmem:[%s467_s8] sm:$0xf] %vm291_vm3, %v290_v40 }

// kernel: forward.59
= control target key start
LH: loop header
LB: loop body
LE: loop exit
PB: predicated region body
PF: predicated region fallthrough
CT: control target
= control target key end

     0   :  { %v136_v0 = vmov 0.0   ;;  %vm137_vm0 = vmmov 0   ;;  %vm55_vm1 = vcmask 523264   ;;  %vm101_vm2 = vcmask 257024   ;;  %s179_s1 = inlined_call_operand.vmem [shape: bf16[64,32], index: 1, kind: input, shape index: {}]   ;;  %s180_s0 = inlined_call_operand.vmem [shape: bf16[8,64], index: 0, kind: input, shape index: {}]   ;;  %s181_s2 = inlined_call_operand.vmem [shape: f32[1,32], index: 2, kind: input, shape index: {}]   ;;  %s182_s3 = inlined_call_operand.vmem [shape: bf16[8,32], index: 3, kind: output, shape index: {}]  }
   0x1   :  { %118 = vmatprep.subr.bf16.mxu0 %v136_v0  ;;  %v132_v1 = vld [vmem:[%s179_s1 + $0x18] sm:$0xff]   ;;  %126 = vmatprep.mubr.msk.bf16.mxu0 %vm137_vm0, %v136_v0  ;;  %v133_v2 = vld [vmem:[%s179_s1 + $0x10] sm:$0xff]   ;;  %v134_v3 = vld [vmem:[%s179_s1 + $0x8] sm:$0xff]  }
   0x2   :  { %119 = vmatpush3.bf16.msra.mxu0 %v132_v1  ;;  %v135_v4 = vld [vmem:[%s179_s1] sm:$0xff]  }
   0x3   :  { %120 = vmatprep.subr.bf16.mxu0 %v136_v0  ;;  %v15_v5 = vld [vmem:[%s180_s0] sm:$0xf] }
   0x4   :  { %v107_v6 = vld [vmem:[%s181_s2] ss:$0 sm:$0xff] }
   0x6   :  { %121 = vmatpush3.bf16.msra.mxu0 %v133_v2 }
   0x7   :  { %122 = vmatprep.subr.bf16.mxu0 %v136_v0 }
   0xa   :  { %123 = vmatpush3.bf16.msra.mxu0 %v134_v3 }
   0xb   :  { %124 = vmatprep.subr.bf16.mxu0 %v136_v0 }
   0xe   :  { %125 = vmatpush3.bf16.msra.mxu0 %v135_v4 }
  0x11   :  { %127 = vmatmul.mubr.msk.bf16.vlgmr.msra.gmra.mxu0 %vm55_vm1, %v15_v5 }
  0xd1   :  { %v93_v7 = vpop.f32.mrf.mxu0 }
  0xd2   :  { %v94_v8 = vadd.f32 %v107_v6, %v93_v7 }
  0xd3   :  { %v128_v9 = vpop.f32.mrf.mxu0 }
  0xd4   :  { %v99_v10 = vmax.f32 %v94_v8, 0.0 }
  0xd5   :  { %v96_v11 = vpop.f32.mrf.mxu0 }
  0xd6   :  { %v100_v12 = vpack.c.bf16 %v99_v10, %v99_v10 }
  0xd7   :  { %v129_v13 = vpop.f32.mrf.mxu0 }
  0xd8   :  { %102 = vst.msk [vmem:[%s182_s3] sm:$0xf] %vm101_vm2, %v100_v12 }

// kernel: forward.54
= control target key start
LH: loop header
LB: loop body
LE: loop exit
PB: predicated region body
PF: predicated region fallthrough
CT: control target
= control target key end

     0   :  { %v264_v0 = vmov 0   ;;  %vm110_vm0 = vcmask 130048   ;;  %v265_v14 = vmov 0.0   ;;  %vm266_vm1 = vmmov 0   ;;  %s349_s1 = inlined_call_operand.vmem [shape: bf16[144,16], index: 1, kind: input, shape index: {}]   ;;  %s350_s0 = inlined_call_operand.vmem [shape: bf16[8,144], index: 0, kind: input, shape index: {}]   ;;  %s351_s3 = inlined_call_operand.vmem [shape: bf16[16,64], index: 3, kind: input, shape index: {}]   ;;  %s352_s2 = inlined_call_operand.vmem [shape: f32[1,16], index: 2, kind: input, shape index: {}]   ;;  %s353_s5 = inlined_call_operand.vmem [shape: bf16[8,64], index: 5, kind: input, shape index: {}]   ;;  %s354_s4 = inlined_call_operand.vmem [shape: f32[1,64], index: 4, kind: input, shape index: {}]   ;;  %s355_s6 = inlined_call_operand.vmem [shape: bf16[8,64], index: 6, kind: output, shape index: {}]  }
   0x1   :  { %114 = vmatprep.subr.bf16.mxu0 %v264_v0  ;;  %v252_v1 = vld [vmem:[%s349_s1 + $0x38] sm:$0xff]   ;;  %v253_v2 = vld [vmem:[%s349_s1 + $0x30] sm:$0xff]   ;;  %v254_v3 = vld [vmem:[%s349_s1 + $0x28] sm:$0xff]   ;;  %243 = vmatprep.subr.bf16.mxu1 %v265_v14  ;;  %vm219_vm2 = vcmask 519168  }
   0x2   :  { %115 = vmatpush1.bf16.msra.mxu0 %v252_v1  ;;  %v24_v4 = vld [vmem:[%s350_s0] sm:$0xff]  ;;  %v256_v7 = vld [vmem:[%s349_s1 + $0x18] sm:$0xff]   ;;  %v257_v8 = vld [vmem:[%s349_s1 + $0x10] sm:$0xff]   ;;  %245 = vmatprep.mubr.msk.bf16.mxu1 %vm266_vm1, %v265_v14 }
   0x3   :  { %116 = vmatprep.subr.bf16.mxu0 %v264_v0  ;;  %v255_v5 = vld [vmem:[%s349_s1 + $0x20] sm:$0xff]   ;;  %v227_v6 = vcombine.high %v24_v4, %v24_v4  ;;  %v258_v9 = vld [vmem:[%s349_s1 + $0x8] sm:$0xff]   ;;  %v226_v12 = vcombine.low %v24_v4, %v24_v4 }
   0x4   :  { %v259_v10 = vld [vmem:[%s349_s1] sm:$0xff]  }
   0x5   :  { %237 = vmatprep.mubr.msk.bf16.mxu0 %vm110_vm0, %v227_v6  ;;  %v260_v11 = vld [vmem:[%s349_s1 + $0x40] sm:$0xff]  }
   0x6   :  { %117 = vmatpush1.bf16.msra.mxu0 %v253_v2  ;;  %v263_v13 = vld [vmem:[%s351_s3] sm:$0xff]  }
   0x7   :  { %118 = vmatprep.subr.bf16.mxu0 %v264_v0  ;;  %244 = vmatpush3.bf16.msra.mxu1 %v263_v13  ;;  %v225_v15 = vld [vmem:[%s352_s2] ss:$0 sm:$0xff] }
   0x8   :  { %v214_v23 = vld [vmem:[%s353_s5] sm:$0xf] }
   0x9   :  { %v238_v24 = vld [vmem:[%s354_s4] ss:$0 sm:$0xff]  ;;  %v215_v25 = vunpack.c.l.bf16 %v214_v23 }
   0xa   :  { %119 = vmatpush1.bf16.msra.mxu0 %v254_v3 }
   0xb   :  { %120 = vmatprep.subr.bf16.mxu0 %v264_v0 }
   0xe   :  { %121 = vmatpush1.bf16.msra.mxu0 %v255_v5 }
   0xf   :  { %122 = vmatprep.subr.bf16.mxu0 %v264_v0 }
  0x12   :  { %123 = vmatpush1.bf16.msra.mxu0 %v256_v7 }
  0x13   :  { %124 = vmatprep.subr.bf16.mxu0 %v264_v0 }
  0x16   :  { %125 = vmatpush1.bf16.msra.mxu0 %v257_v8 }
  0x17   :  { %126 = vmatprep.subr.bf16.mxu0 %v264_v0 }
  0x1a   :  { %127 = vmatpush1.bf16.msra.mxu0 %v258_v9 }
  0x1b   :  { %128 = vmatprep.subr.bf16.mxu0 %v264_v0 }
  0x1e   :  { %129 = vmatpush1.bf16.msra.mxu0 %v259_v10 }
  0x1f   :  { %144 = vmatprep.subr.bf16.mxu0 %v264_v0 }
  0x22   :  { %145 = vmatpush2.bf16.msra.mxu0 %v260_v11 }
  0x25   :  { %147 = vmatmul.mubr.bf16.vlgmr.msra.gmra.mxu0 %v226_v12 }
  0xe5   :  { %v148_v16 = vpop.f32.mrf.mxu0 }
  0xe6   :  { %v149_v17 = vadd.f32 %v225_v15, %v148_v16 }
  0xe7   :  { %v150_v18 = vpop.f32.mrf.mxu0 }
  0xe8   :  { %v154_v19 = vmax.f32 %v149_v17, 0.0 }
  0xe9   :  { %v151_v20 = vpop.f32.mrf.mxu0 }
  0xea   :  { %v155_v21 = vpack.c.bf16 %v154_v19, %v154_v19 }
  0xeb   :  { %v152_v22 = vpop.f32.mrf.mxu0 }
  0xec   :  { %246 = vmatmul.mubr.msk.bf16.vlgmr.msra.gmra.mxu1 %vm110_vm0, %v155_v21 }
 0x1ac   :  { %v208_v26 = vpop.f32.mrf.mxu1 }
 0x1ad   :  { %v209_v27 = vadd.f32 %v238_v24, %v208_v26 }
 0x1ae   :  { %v247_v28 = vpop.f32.mrf.mxu1 }
 0x1af   :  { %v216_v29 = vadd.f32 %v215_v25, %v209_v27 }
 0x1b0   :  { %v211_v30 = vpop.f32.mrf.mxu1 }
 0x1b1   :  { %v217_v31 = vmax.f32 %v216_v29, 0.0 }
 0x1b2   :  { %v248_v32 = vpop.f32.mrf.mxu1 }
 0x1b3   :  { %v218_v33 = vpack.c.bf16 %v217_v31, %v217_v31 }
 0x1b5   :  { %220 = vst.msk [vmem:[%s355_s6] sm:$0xf] %vm219_vm2, %v218_v33 }

// kernel: forward.70
= control target key start
LH: loop header
LB: loop body
LE: loop exit
PB: predicated region body
PF: predicated region fallthrough
CT: control target
= control target key end

     0   :  { %v223_v1 = vmov 0.0   ;;  %vm224_vm0 = vmmov 0   ;;  %vm131_vm1 = vcmask 253952   ;;  %s283_s0 = inlined_call_operand.vmem [shape: bf16[2,1,1,9,32], index: 0, kind: input, shape index: {}, may-alias: {0,4}]   ;;  %s284_s1 = inlined_call_operand.vmem [shape: bf16[2,128], index: 1, kind: input, shape index: {}]   ;;  %s285_s2 = inlined_call_operand.vmem [shape: bf16[128,32], index: 2, kind: input, shape index: {}]   ;;  %s286_s3 = inlined_call_operand.vmem [shape: f32[1,32], index: 3, kind: input, shape index: {}]   ;;  %s287_s4 = inlined_call_operand.vmem [shape: bf16[2,1,1,9,32], index: 4, kind: output, shape index: {}, may-alias: {0,4}]  }
   0x1   :  { %v215_v0 = vld [vmem:[%s285_s2 + $0x38] sm:$0xff]   ;;  %193 = vmatprep.subr.bf16.mxu0 %v223_v1  ;;  %v216_v2 = vld [vmem:[%s285_s2 + $0x30] sm:$0xff]   ;;  %209 = vmatprep.mubr.msk.bf16.mxu0 %vm224_vm0, %v223_v1  ;;  %v217_v3 = vld [vmem:[%s285_s2 + $0x28] sm:$0xff]  }
   0x2   :  { %194 = vmatpush3.bf16.msra.mxu0 %v215_v0  ;;  %v218_v4 = vld [vmem:[%s285_s2 + $0x20] sm:$0xff]   ;;  %v219_v5 = vld [vmem:[%s285_s2 + $0x18] sm:$0xff]   ;;  %v220_v6 = vld [vmem:[%s285_s2 + $0x10] sm:$0xff]  }
   0x3   :  { %195 = vmatprep.subr.bf16.mxu0 %v223_v1  ;;  %v221_v7 = vld [vmem:[%s285_s2 + $0x8] sm:$0xff]   ;;  %v222_v8 = vld [vmem:[%s285_s2] sm:$0xff]  }
   0x4   :  { %v17_v9 = vld [vmem:[%s284_s1] sm:$0x1] }
   0x5   :  { %v174_v10 = vld [vmem:[%s286_s3] ss:$0 sm:$0xff] }
   0x6   :  { %196 = vmatpush3.bf16.msra.mxu0 %v216_v2 }
   0x7   :  { %197 = vmatprep.subr.bf16.mxu0 %v223_v1 }
   0xa   :  { %198 = vmatpush3.bf16.msra.mxu0 %v217_v3 }
   0xb   :  { %199 = vmatprep.subr.bf16.mxu0 %v223_v1 }
   0xe   :  { %200 = vmatpush3.bf16.msra.mxu0 %v218_v4 }
   0xf   :  { %201 = vmatprep.subr.bf16.mxu0 %v223_v1 }
  0x12   :  { %202 = vmatpush3.bf16.msra.mxu0 %v219_v5 }
  0x13   :  { %203 = vmatprep.subr.bf16.mxu0 %v223_v1 }
  0x16   :  { %204 = vmatpush3.bf16.msra.mxu0 %v220_v6 }
  0x17   :  { %205 = vmatprep.subr.bf16.mxu0 %v223_v1 }
  0x1a   :  { %206 = vmatpush3.bf16.msra.mxu0 %v221_v7 }
  0x1b   :  { %207 = vmatprep.subr.bf16.mxu0 %v223_v1 }
  0x1e   :  { %208 = vmatpush3.bf16.msra.mxu0 %v222_v8 }
  0x21   :  { %210 = vmatmul.mubr.bf16.vlgmr.msra.gmra.mxu0 %v17_v9 }
  0xe1   :  { %v123_v11 = vpop.f32.mrf.mxu0 }
  0xe2   :  { %v124_v12 = vadd.f32 %v174_v10, %v123_v11 }
  0xe3   :  { %v211_v13 = vpop.f32.mrf.mxu0 }
  0xe4   :  { %v129_v14 = vmax.f32 %v124_v12, 0.0 }
  0xe5   :  { %v126_v15 = vpop.f32.mrf.mxu0 }
  0xe6   :  { %v130_v16 = vpack.c.bf16 %v129_v14, %v129_v14 }
  0xe7   :  { %v212_v17 = vpop.f32.mrf.mxu0 }
  0xe8   :  { %132 = vst.msk [vmem:[#allocation2] sm:$0x1] %vm131_vm1, %v130_v16 }
  0xef   :  { %v151_v18 = vld [vmem:[#allocation2] sm:$0x1] }
  0xf0   :  { %183 = vst [vmem:[%s287_s4 + $0x4] sm:$0x1] %v151_v18 }

// kernel: forward.60
= control target key start
LH: loop header
LB: loop body
LE: loop exit
PB: predicated region body
PF: predicated region fallthrough
CT: control target
= control target key end

     0   :  { %v571_v1 = vmov 0.0   ;;  %vm572_vm0 = vmmov 0   ;;  %v573_v12 = vmov 1966171168   ;;  %v170_v14 = vlaneseq  ;;  %s725_s1 = inlined_call_operand.vmem [shape: bf16[288,32], index: 1, kind: input, shape index: {}]   ;;  %s726_s6 = inlined_call_operand.vmem [shape: bf16[64,128], index: 6, kind: input, shape index: {}]   ;;  %s727_s5 = inlined_call_operand.vmem [shape: bf16[2,64], index: 5, kind: input, shape index: {}]   ;;  %s728_s0 = inlined_call_operand.vmem [shape: bf16[2,288], index: 0, kind: input, shape index: {}]   ;;  %s729_s3 = inlined_call_operand.vmem [shape: bf16[32,128], index: 3, kind: input, shape index: {}]   ;;  %s730_s2 = inlined_call_operand.vmem [shape: f32[1,32], index: 2, kind: input, shape index: {}]   ;;  %s731_s7 = inlined_call_operand.vmem [shape: f32[1,128], index: 7, kind: input, shape index: {}]   ;;  %s732_s4 = inlined_call_operand.vmem [shape: f32[1,128], index: 4, kind: input, shape index: {}]   ;;  %s733_s8 = inlined_call_operand.vmem [shape: bf16[2,128], index: 8, kind: output, shape index: {}]  }
   0x1   :  { %v547_v0 = vld [vmem:[%s725_s1 + $0x78] sm:$0xff]   ;;  %516 = vmatprep.subr.bf16.mxu0 %v571_v1  ;;  %524 = vmatprep.mubr.msk.bf16.mxu0 %vm572_vm0, %v571_v1  ;;  %v549_v3 = vld [vmem:[%s725_s1 + $0x70] sm:$0xff]   ;;  %v551_v5 = vld [vmem:[%s725_s1 + $0x68] sm:$0xff]   ;;  %v168_v13 = vunpack.c.l.s4 %v573_v12  ;;  %vm70_vm1 = vcmask 523264   ;;  %vm292_vm2 = vcmask 261120  }
   0x2   :  { %v548_v2 = vld [vmem:[%s725_s1 + $0x38] sm:$0xff]   ;;  %488 = vmatprep.subr.bf16.mxu1 %v547_v0  ;;  %v550_v4 = vld [vmem:[%s725_s1 + $0x30] sm:$0xff]   ;;  %v553_v7 = vld [vmem:[%s725_s1 + $0x28] sm:$0xff]   ;;  %v171_v19 = vshrl.u32 %v170_v14, 7 }
   0x3   :  { %489 = vmatpush3.bf16.msra.mxu1 %v548_v2  ;;  %v552_v6 = vld [vmem:[%s726_s6 + $0x18] sm:$0xff]   ;;  %v554_v8 = vld [vmem:[%s725_s1 + $0x60] sm:$0xff]   ;;  %v555_v9 = vld [vmem:[%s726_s6 + $0x10] sm:$0xff]   ;;  %v169_v18 = vunpack.c.0.s8 %v168_v13 }
   0x4   :  { %490 = vmatprep.subr.bf16.mxu1 %v549_v3  ;;  %517 = vmatpush3.bf16.msra.mxu0 %v552_v6  ;;  %v556_v10 = vld [vmem:[%s725_s1 + $0x20] sm:$0xff]   ;;  %v558_v11 = vld [vmem:[%s726_s6 + $0x8] sm:$0xff]   ;;  %v557_v15 = vld [vmem:[%s725_s1 + $0x58] sm:$0xff]  }
   0x5   :  { %518 = vmatprep.subr.bf16.mxu0 %v571_v1  ;;  %v559_v16 = vld [vmem:[%s725_s1 + $0x18] sm:$0xff]   ;;  %v561_v17 = vld [vmem:[%s726_s6] sm:$0xff]   ;;  %v560_v20 = vld [vmem:[%s725_s1 + $0x50] sm:$0xff]   ;;  %v172_v24 = vsub.s32 %v169_v18, %v171_v19 }
   0x6   :  { %v562_v21 = vld [vmem:[%s725_s1 + $0x10] sm:$0xff]   ;;  %v30_v22 = vld [vmem:[%s727_s5] sm:$0x1]  ;;  %v565_v23 = vld [vmem:[%s725_s1 + $0x88] sm:$0xff]  }
   0x7   :  { %491 = vmatpush3.bf16.msra.mxu1 %v550_v4  ;;  %v563_v25 = vld [vmem:[%s725_s1 + $0x48] sm:$0xff]   ;;  %v459_v26 = vld.sshfl [vmem:[%s728_s0] sm:$0x13 pattern:$0x75316420] }
   0x8   :  { %492 = vmatprep.subr.bf16.mxu1 %v551_v5  ;;  %519 = vmatpush3.bf16.msra.mxu0 %v555_v9  ;;  %v564_v27 = vld [vmem:[%s725_s1 + $0x8] sm:$0xff]   ;;  %v568_v28 = vld [vmem:[%s725_s1 + $0x80] sm:$0xff]   ;;  %v166_v29 = vcombine.high %v459_v26, %v459_v26  ;;  %v173_v30 = vrot.slane %v459_v26, %v172_v24 }
   0x9   :  { %520 = vmatprep.subr.bf16.mxu0 %v571_v1  ;;  %v566_v31 = vld [vmem:[%s725_s1 + $0x40] sm:$0xff]   ;;  %v569_v35 = vld [vmem:[%s729_s3 + $0x8] sm:$0xff]  }
   0xa   :  { %v180_v32 = vrot.slane %v166_v29, %v172_v24  ;;  %v181_v33 = vcombine.high %v173_v30, %v173_v30  ;;  %v567_v34 = vld [vmem:[%s725_s1] sm:$0xff]  }
   0xb   :  { %493 = vmatpush3.bf16.msra.mxu1 %v553_v7  ;;  %v570_v36 = vld [vmem:[%s729_s3] sm:$0xff]  }
   0xc   :  { %494 = vmatprep.subr.bf16.mxu1 %v554_v8  ;;  %521 = vmatpush3.bf16.msra.mxu0 %v558_v11  ;;  %v458_v45 = vld [vmem:[%s730_s2] ss:$0 sm:$0xff] }
   0xd   :  { %522 = vmatprep.subr.bf16.mxu0 %v571_v1  ;;  %328 = vmatprep.mubr.bf16.mxu1 %v180_v32  ;;  %v452_v55 = vld [vmem:[%s731_s7] ss:$0 sm:$0xff] }
   0xe   :  { %v479_v56 = vld [vmem:[%s732_s4] ss:$0 sm:$0xff] }
   0xf   :  { %495 = vmatpush3.bf16.msra.mxu1 %v556_v10 }
  0x10   :  { %496 = vmatprep.subr.bf16.mxu1 %v557_v15  ;;  %523 = vmatpush3.bf16.msra.mxu0 %v561_v17 }
  0x11   :  { %528 = vmatprep.subr.bf16.mxu0 %v571_v1 }
  0x13   :  { %497 = vmatpush3.bf16.msra.mxu1 %v559_v16  ;;  %525 = vmatmul.mubr.msk.bf16.vlgmr.msra.gmra.mxu0 %vm70_vm1, %v30_v22 }
  0x14   :  { %498 = vmatprep.subr.bf16.mxu1 %v560_v20  ;;  %529 = vmatpush3.bf16.msra.mxu0 %v565_v23 }
  0x15   :  { %530 = vmatprep.subr.bf16.mxu0 %v571_v1  ;;  %532 = vmatprep.mubr.msk.bf16.mxu0 %vm572_vm0, %v571_v1 }
  0x17   :  { %499 = vmatpush3.bf16.msra.mxu1 %v562_v21 }
  0x18   :  { %500 = vmatprep.subr.bf16.mxu1 %v563_v25  ;;  %531 = vmatpush3.bf16.msra.mxu0 %v568_v28 }
  0x19   :  { %536 = vmatprep.subr.bf16.mxu0 %v571_v1 }
  0x1b   :  { %501 = vmatpush3.bf16.msra.mxu1 %v564_v27  ;;  %533 = vmatmul.mubr.msk.bf16.vlgmr.msra.gmra.mxu0 %vm292_vm2, %v181_v33 }
  0x1c   :  { %502 = vmatprep.subr.bf16.mxu1 %v566_v31  ;;  %540 = vmatprep.mubr.msk.bf16.mxu0 %vm572_vm0, %v571_v1 }
  0x1d   :  { %537 = vmatpush3.bf16.msra.mxu0 %v569_v35 }
  0x1e   :  { %538 = vmatprep.subr.bf16.mxu0 %v571_v1 }
  0x1f   :  { %503 = vmatpush3.bf16.msra.mxu1 %v567_v34 }
  0x21   :  { %539 = vmatpush3.bf16.msra.mxu0 %v570_v36 }
  0x22   :  { %329 = vmatmul.mubr.bf16.vlgmr.msra.gmra.mxu1 %v173_v30 }
  0xd3   :  { %v108_v37 = vpop.f32.mrf.mxu0 }
  0xd4   :  { %v109_v58 = vadd.f32 %v452_v55, %v108_v37 }
  0xd5   :  { %v526_v38 = vpop.f32.mrf.mxu0 }
  0xd7   :  { %v111_v39 = vpop.f32.mrf.mxu0 }
  0xd9   :  { %v527_v40 = vpop.f32.mrf.mxu0 }
  0xdb   :  { %v370_v41 = vpop.f32.mrf.mxu0 }
  0xdd   :  { %v534_v42 = vpop.f32.mrf.mxu0 }
  0xdf   :  { %v373_v44 = vpop.f32.mrf.mxu0 }
  0xe1   :  { %v535_v47 = vpop.f32.mrf.mxu0 }
  0xe2   :  { %v504_v43 = vpop.f32.mrf.mxu1 }
  0xe4   :  { %v505_v46 = vpop.f32.mrf.mxu1 }
  0xe5   :  { %v506_v48 = vadd.f32 %v505_v46, %v504_v43 }
  0xe6   :  { %v507_v49 = vpop.f32.mrf.mxu1 }
  0xe7   :  { %v331_v50 = vadd.f32 %v506_v48, %v458_v45 }
  0xe8   :  { %v508_v51 = vpop.f32.mrf.mxu1 }
  0xe9   :  { %v371_v52 = vadd.f32 %v370_v41, %v331_v50 }
  0xeb   :  { %v376_v53 = vmax.f32 %v371_v52, 0.0 }
  0xed   :  { %v377_v54 = vpack.c.bf16 %v376_v53, %v376_v53 }
  0xef   :  { %541 = vmatmul.mubr.msk.bf16.vlgmr.msra.gmra.mxu0 %vm292_vm2, %v377_v54 }
 0x1af   :  { %v438_v57 = vpop.f32.mrf.mxu0 }
 0x1b0   :  { %v439_v59 = vadd.f32 %v479_v56, %v438_v57 }
 0x1b1   :  { %v542_v60 = vpop.f32.mrf.mxu0 }
 0x1b2   :  { %v444_v61 = vadd.f32 %v439_v59, %v109_v58 }
 0x1b3   :  { %v441_v62 = vpop.f32.mrf.mxu0 }
 0x1b4   :  { %v445_v63 = vmax.f32 %v444_v61, 0.0 }
 0x1b5   :  { %v543_v0 = vpop.f32.mrf.mxu0 }
 0x1b6   :  { %v446_v1 = vpack.c.bf16 %v445_v63, %v445_v63 }
 0x1b8   :  { %447 = vst [vmem:[%s733_s8] sm:$0x1] %v446_v1 }

// kernel: forward.61
= control target key start
LH: loop header
LB: loop body
LE: loop exit
PB: predicated region body
PF: predicated region fallthrough
CT: control target
= control target key end

     0   :  { %v456_v1 = vmov 0.0   ;;  %vm457_vm0 = vmmov 0   ;;  %v458_v7 = vmov 1966171168   ;;  %v80_v9 = vlaneseq  ;;  %s573_s1 = inlined_call_operand.vmem [shape: bf16[288,32], index: 1, kind: input, shape index: {}]   ;;  %s574_s0 = inlined_call_operand.vmem [shape: bf16[2,288], index: 0, kind: input, shape index: {}]   ;;  %s575_s3 = inlined_call_operand.vmem [shape: bf16[32,128], index: 3, kind: input, shape index: {}]   ;;  %s576_s2 = inlined_call_operand.vmem [shape: f32[1,32], index: 2, kind: input, shape index: {}]   ;;  %s577_s5 = inlined_call_operand.vmem [shape: bf16[2,128], index: 5, kind: input, shape index: {}]   ;;  %s578_s4 = inlined_call_operand.vmem [shape: f32[1,128], index: 4, kind: input, shape index: {}]   ;;  %s579_s6 = inlined_call_operand.vmem [shape: bf16[2,128], index: 6, kind: output, shape index: {}]  }
   0x1   :  { %v436_v0 = vld [vmem:[%s573_s1 + $0x78] sm:$0xff]   ;;  %417 = vmatprep.subr.bf16.mxu1 %v456_v1  ;;  %421 = vmatprep.mubr.msk.bf16.mxu1 %vm457_vm0, %v456_v1  ;;  %v438_v3 = vld [vmem:[%s573_s1 + $0x70] sm:$0xff]   ;;  %v440_v5 = vld [vmem:[%s573_s1 + $0x68] sm:$0xff]   ;;  %v78_v8 = vunpack.c.l.s4 %v458_v7  ;;  %vm202_vm1 = vcmask 261120  }
   0x2   :  { %v437_v2 = vld [vmem:[%s573_s1 + $0x38] sm:$0xff]   ;;  %389 = vmatprep.subr.bf16.mxu0 %v436_v0  ;;  %v439_v4 = vld [vmem:[%s573_s1 + $0x30] sm:$0xff]   ;;  %v441_v6 = vld [vmem:[%s573_s1 + $0x28] sm:$0xff]   ;;  %v81_v13 = vshrl.u32 %v80_v9, 7 }
   0x3   :  { %390 = vmatpush3.bf16.msra.mxu0 %v437_v2  ;;  %v442_v10 = vld [vmem:[%s573_s1 + $0x60] sm:$0xff]   ;;  %v79_v12 = vunpack.c.0.s8 %v78_v8  ;;  %v444_v14 = vld [vmem:[%s573_s1 + $0x58] sm:$0xff]   ;;  %v450_v15 = vld [vmem:[%s573_s1 + $0x88] sm:$0xff]  }
   0x4   :  { %391 = vmatprep.subr.bf16.mxu0 %v438_v3  ;;  %v443_v11 = vld [vmem:[%s573_s1 + $0x20] sm:$0xff]   ;;  %v445_v16 = vld [vmem:[%s573_s1 + $0x18] sm:$0xff]   ;;  %v446_v18 = vld [vmem:[%s573_s1 + $0x50] sm:$0xff]   ;;  %418 = vmatpush3.bf16.msra.mxu1 %v450_v15 }
   0x5   :  { %v82_v17 = vsub.s32 %v79_v12, %v81_v13  ;;  %419 = vmatprep.subr.bf16.mxu1 %v456_v1  ;;  %v453_v19 = vld [vmem:[%s573_s1 + $0x80] sm:$0xff]   ;;  %v447_v21 = vld [vmem:[%s573_s1 + $0x10] sm:$0xff]   ;;  %v448_v24 = vld [vmem:[%s573_s1 + $0x48] sm:$0xff]  }
   0x6   :  { %v365_v20 = vld.sshfl [vmem:[%s574_s0] sm:$0x13 pattern:$0x75316420]  ;;  %v449_v27 = vld [vmem:[%s573_s1 + $0x8] sm:$0xff]  }
   0x7   :  { %392 = vmatpush3.bf16.msra.mxu0 %v439_v4  ;;  %v76_v22 = vcombine.high %v365_v20, %v365_v20  ;;  %v83_v23 = vrot.slane %v365_v20, %v82_v17  ;;  %v451_v28 = vld [vmem:[%s573_s1 + $0x40] sm:$0xff]   ;;  %v454_v30 = vld [vmem:[%s575_s3 + $0x8] sm:$0xff]  }
   0x8   :  { %393 = vmatprep.subr.bf16.mxu0 %v440_v5  ;;  %420 = vmatpush3.bf16.msra.mxu1 %v453_v19  ;;  %v452_v29 = vld [vmem:[%s573_s1] sm:$0xff]  }
   0x9   :  { %v90_v25 = vrot.slane %v76_v22, %v82_v17  ;;  %v91_v26 = vcombine.high %v83_v23, %v83_v23  ;;  %425 = vmatprep.subr.bf16.mxu1 %v456_v1  ;;  %v455_v31 = vld [vmem:[%s575_s3] sm:$0xff]  }
   0xa   :  { %v364_v37 = vld [vmem:[%s576_s2] ss:$0 sm:$0xff] }
   0xb   :  { %394 = vmatpush3.bf16.msra.mxu0 %v441_v6  ;;  %238 = vmatprep.mubr.bf16.mxu0 %v90_v25  ;;  %v354_v46 = vld [vmem:[%s577_s5] sm:$0x1] }
   0xc   :  { %395 = vmatprep.subr.bf16.mxu0 %v442_v10  ;;  %422 = vmatmul.mubr.msk.bf16.vlgmr.msra.gmra.mxu1 %vm202_vm1, %v91_v26  ;;  %v385_v47 = vld [vmem:[%s578_s4] ss:$0 sm:$0xff]  ;;  %v355_v48 = vunpack.c.l.bf16 %v354_v46 }
   0xd   :  { %429 = vmatprep.mubr.msk.bf16.mxu1 %vm457_vm0, %v456_v1  ;;  %426 = vmatpush3.bf16.msra.mxu1 %v454_v30 }
   0xe   :  { %427 = vmatprep.subr.bf16.mxu1 %v456_v1 }
   0xf   :  { %396 = vmatpush3.bf16.msra.mxu0 %v443_v11 }
  0x10   :  { %397 = vmatprep.subr.bf16.mxu0 %v444_v14 }
  0x11   :  { %428 = vmatpush3.bf16.msra.mxu1 %v455_v31 }
  0x13   :  { %398 = vmatpush3.bf16.msra.mxu0 %v445_v16 }
  0x14   :  { %399 = vmatprep.subr.bf16.mxu0 %v446_v18 }
  0x17   :  { %400 = vmatpush3.bf16.msra.mxu0 %v447_v21 }
  0x18   :  { %401 = vmatprep.subr.bf16.mxu0 %v448_v24 }
  0x1b   :  { %402 = vmatpush3.bf16.msra.mxu0 %v449_v27 }
  0x1c   :  { %403 = vmatprep.subr.bf16.mxu0 %v451_v28 }
  0x1f   :  { %404 = vmatpush3.bf16.msra.mxu0 %v452_v29 }
  0x22   :  { %239 = vmatmul.mubr.bf16.vlgmr.msra.gmra.mxu0 %v83_v23 }
  0xcc   :  { %v280_v32 = vpop.f32.mrf.mxu1 }
  0xce   :  { %v423_v33 = vpop.f32.mrf.mxu1 }
  0xd0   :  { %v283_v34 = vpop.f32.mrf.mxu1 }
  0xd2   :  { %v424_v35 = vpop.f32.mrf.mxu1 }
  0xe2   :  { %v405_v36 = vpop.f32.mrf.mxu0 }
  0xe4   :  { %v406_v38 = vpop.f32.mrf.mxu0 }
  0xe5   :  { %v407_v39 = vadd.f32 %v406_v38, %v405_v36 }
  0xe6   :  { %v408_v40 = vpop.f32.mrf.mxu0 }
  0xe7   :  { %v241_v41 = vadd.f32 %v407_v39, %v364_v37 }
  0xe8   :  { %v409_v42 = vpop.f32.mrf.mxu0 }
  0xe9   :  { %v281_v43 = vadd.f32 %v280_v32, %v241_v41 }
  0xeb   :  { %v286_v44 = vmax.f32 %v281_v43, 0.0 }
  0xed   :  { %v287_v45 = vpack.c.bf16 %v286_v44, %v286_v44 }
  0xef   :  { %430 = vmatmul.mubr.msk.bf16.vlgmr.msra.gmra.mxu1 %vm202_vm1, %v287_v45 }
 0x1af   :  { %v348_v49 = vpop.f32.mrf.mxu1 }
 0x1b0   :  { %v349_v50 = vadd.f32 %v385_v47, %v348_v49 }
 0x1b1   :  { %v431_v51 = vpop.f32.mrf.mxu1 }
 0x1b2   :  { %v356_v52 = vadd.f32 %v355_v48, %v349_v50 }
 0x1b3   :  { %v351_v53 = vpop.f32.mrf.mxu1 }
 0x1b4   :  { %v357_v54 = vmax.f32 %v356_v52, 0.0 }
 0x1b5   :  { %v432_v55 = vpop.f32.mrf.mxu1 }
 0x1b6   :  { %v358_v56 = vpack.c.bf16 %v357_v54, %v357_v54 }
 0x1b8   :  { %359 = vst [vmem:[%s579_s6] sm:$0x1] %v358_v56 }

// kernel: forward.75
= control target key start
LH: loop header
LB: loop body
LE: loop exit
PB: predicated region body
PF: predicated region fallthrough
CT: control target
= control target key end

     0   :  { %v223_v1 = vmov 0.0   ;;  %vm224_vm0 = vmmov 0   ;;  %vm131_vm1 = vcmask 516096   ;;  %s283_s0 = inlined_call_operand.vmem [shape: bf16[2,1,1,9,64], index: 0, kind: input, shape index: {}, may-alias: {0,4}]   ;;  %s284_s1 = inlined_call_operand.vmem [shape: bf16[2,128], index: 1, kind: input, shape index: {}]   ;;  %s285_s2 = inlined_call_operand.vmem [shape: bf16[128,64], index: 2, kind: input, shape index: {}]   ;;  %s286_s3 = inlined_call_operand.vmem [shape: f32[1,64], index: 3, kind: input, shape index: {}]   ;;  %s287_s4 = inlined_call_operand.vmem [shape: bf16[2,1,1,9,64], index: 4, kind: output, shape index: {}, may-alias: {0,4}]  }
   0x1   :  { %v215_v0 = vld [vmem:[%s285_s2 + $0x38] sm:$0xff]   ;;  %193 = vmatprep.subr.bf16.mxu0 %v223_v1  ;;  %v216_v2 = vld [vmem:[%s285_s2 + $0x30] sm:$0xff]   ;;  %209 = vmatprep.mubr.msk.bf16.mxu0 %vm224_vm0, %v223_v1  ;;  %v217_v3 = vld [vmem:[%s285_s2 + $0x28] sm:$0xff]  }
   0x2   :  { %194 = vmatpush3.bf16.msra.mxu0 %v215_v0  ;;  %v218_v4 = vld [vmem:[%s285_s2 + $0x20] sm:$0xff]   ;;  %v219_v5 = vld [vmem:[%s285_s2 + $0x18] sm:$0xff]   ;;  %v220_v6 = vld [vmem:[%s285_s2 + $0x10] sm:$0xff]  }
   0x3   :  { %195 = vmatprep.subr.bf16.mxu0 %v223_v1  ;;  %v221_v7 = vld [vmem:[%s285_s2 + $0x8] sm:$0xff]   ;;  %v222_v8 = vld [vmem:[%s285_s2] sm:$0xff]  }
   0x4   :  { %v17_v9 = vld [vmem:[%s284_s1] sm:$0x1] }
   0x5   :  { %v174_v10 = vld [vmem:[%s286_s3] ss:$0 sm:$0xff] }
   0x6   :  { %196 = vmatpush3.bf16.msra.mxu0 %v216_v2 }
   0x7   :  { %197 = vmatprep.subr.bf16.mxu0 %v223_v1 }
   0xa   :  { %198 = vmatpush3.bf16.msra.mxu0 %v217_v3 }
   0xb   :  { %199 = vmatprep.subr.bf16.mxu0 %v223_v1 }
   0xe   :  { %200 = vmatpush3.bf16.msra.mxu0 %v218_v4 }
   0xf   :  { %201 = vmatprep.subr.bf16.mxu0 %v223_v1 }
  0x12   :  { %202 = vmatpush3.bf16.msra.mxu0 %v219_v5 }
  0x13   :  { %203 = vmatprep.subr.bf16.mxu0 %v223_v1 }
  0x16   :  { %204 = vmatpush3.bf16.msra.mxu0 %v220_v6 }
  0x17   :  { %205 = vmatprep.subr.bf16.mxu0 %v223_v1 }
  0x1a   :  { %206 = vmatpush3.bf16.msra.mxu0 %v221_v7 }
  0x1b   :  { %207 = vmatprep.subr.bf16.mxu0 %v223_v1 }
  0x1e   :  { %208 = vmatpush3.bf16.msra.mxu0 %v222_v8 }
  0x21   :  { %210 = vmatmul.mubr.bf16.vlgmr.msra.gmra.mxu0 %v17_v9 }
  0xe1   :  { %v123_v11 = vpop.f32.mrf.mxu0 }
  0xe2   :  { %v124_v12 = vadd.f32 %v174_v10, %v123_v11 }
  0xe3   :  { %v211_v13 = vpop.f32.mrf.mxu0 }
  0xe4   :  { %v129_v14 = vmax.f32 %v124_v12, 0.0 }
  0xe5   :  { %v126_v15 = vpop.f32.mrf.mxu0 }
  0xe6   :  { %v130_v16 = vpack.c.bf16 %v129_v14, %v129_v14 }
  0xe7   :  { %v212_v17 = vpop.f32.mrf.mxu0 }
  0xe8   :  { %132 = vst.msk [vmem:[#allocation2] sm:$0x1] %vm131_vm1, %v130_v16 }
  0xef   :  { %v151_v18 = vld [vmem:[#allocation2] sm:$0x1] }
  0xf0   :  { %183 = vst [vmem:[%s287_s4 + $0x4] sm:$0x1] %v151_v18 }

// kernel: forward.76
= control target key start
LH: loop header
LB: loop body
LE: loop exit
PB: predicated region body
PF: predicated region fallthrough
CT: control target
= control target key end

     0   :  { %v69_v9 = vlaneseq  ;;  %v321_v13 = vmov 1966171168   ;;  %vm220_vm0 = vcmask 516096   ;;  %s404_s0 = inlined_call_operand.vmem [shape: bf16[2,1,1,9,64], index: 0, kind: input, shape index: {}, may-alias: {0,4}]   ;;  %s405_s1 = inlined_call_operand.vmem [shape: bf16[2,256], index: 1, kind: input, shape index: {}]   ;;  %s406_s2 = inlined_call_operand.vmem [shape: bf16[256,64], index: 2, kind: input, shape index: {}]   ;;  %s407_s3 = inlined_call_operand.vmem [shape: f32[1,64], index: 3, kind: input, shape index: {}]   ;;  %s408_s4 = inlined_call_operand.vmem [shape: bf16[2,1,1,9,64], index: 4, kind: output, shape index: {}, may-alias: {0,4}]  }
   0x1   :  { %v305_v0 = vld [vmem:[%s406_s2 + $0x78] sm:$0xff]   ;;  %v307_v2 = vld [vmem:[%s406_s2 + $0x70] sm:$0xff]   ;;  %v309_v4 = vld [vmem:[%s406_s2 + $0x68] sm:$0xff]   ;;  %v67_v14 = vunpack.c.l.s4 %v321_v13 }
   0x2   :  { %v306_v1 = vld [vmem:[%s406_s2 + $0x38] sm:$0xff]   ;;  %282 = vmatprep.subr.bf16.mxu0 %v305_v0  ;;  %v308_v3 = vld [vmem:[%s406_s2 + $0x30] sm:$0xff]   ;;  %v310_v5 = vld [vmem:[%s406_s2 + $0x28] sm:$0xff]   ;;  %v70_v15 = vshrl.u32 %v69_v9, 7 }
   0x3   :  { %283 = vmatpush3.bf16.msra.mxu0 %v306_v1  ;;  %v311_v6 = vld [vmem:[%s406_s2 + $0x60] sm:$0xff]   ;;  %v313_v8 = vld [vmem:[%s406_s2 + $0x58] sm:$0xff]   ;;  %v315_v11 = vld [vmem:[%s406_s2 + $0x50] sm:$0xff]   ;;  %v68_v18 = vunpack.c.0.s8 %v67_v14 }
   0x4   :  { %284 = vmatprep.subr.bf16.mxu0 %v307_v2  ;;  %v312_v7 = vld [vmem:[%s406_s2 + $0x20] sm:$0xff]   ;;  %v314_v10 = vld [vmem:[%s406_s2 + $0x18] sm:$0xff]   ;;  %v316_v16 = vld [vmem:[%s406_s2 + $0x10] sm:$0xff]  }
   0x5   :  { %v264_v12 = vld.sshfl [vmem:[%s405_s1] sm:$0x11 pattern:$0x75316420]  ;;  %v317_v19 = vld [vmem:[%s406_s2 + $0x48] sm:$0xff]   ;;  %v71_v20 = vsub.s32 %v68_v18, %v70_v15 }
   0x6   :  { %v65_v17 = vcombine.high %v264_v12, %v264_v12  ;;  %v318_v21 = vld [vmem:[%s406_s2 + $0x8] sm:$0xff]   ;;  %v319_v23 = vld [vmem:[%s406_s2 + $0x40] sm:$0xff]  }
   0x7   :  { %285 = vmatpush3.bf16.msra.mxu0 %v308_v3  ;;  %v320_v24 = vld [vmem:[%s406_s2] sm:$0xff]   ;;  %v72_v25 = vrot.slane %v264_v12, %v71_v20 }
   0x8   :  { %286 = vmatprep.subr.bf16.mxu0 %v309_v4  ;;  %v79_v22 = vrot.slane %v65_v17, %v71_v20  ;;  %v263_v27 = vld [vmem:[%s407_s3] ss:$0 sm:$0xff] }
   0xa   :  { %210 = vmatprep.mubr.bf16.mxu0 %v79_v22 }
   0xb   :  { %287 = vmatpush3.bf16.msra.mxu0 %v310_v5 }
   0xc   :  { %288 = vmatprep.subr.bf16.mxu0 %v311_v6 }
   0xf   :  { %289 = vmatpush3.bf16.msra.mxu0 %v312_v7 }
  0x10   :  { %290 = vmatprep.subr.bf16.mxu0 %v313_v8 }
  0x13   :  { %291 = vmatpush3.bf16.msra.mxu0 %v314_v10 }
  0x14   :  { %292 = vmatprep.subr.bf16.mxu0 %v315_v11 }
  0x17   :  { %293 = vmatpush3.bf16.msra.mxu0 %v316_v16 }
  0x18   :  { %294 = vmatprep.subr.bf16.mxu0 %v317_v19 }
  0x1b   :  { %295 = vmatpush3.bf16.msra.mxu0 %v318_v21 }
  0x1c   :  { %296 = vmatprep.subr.bf16.mxu0 %v319_v23 }
  0x1f   :  { %297 = vmatpush3.bf16.msra.mxu0 %v320_v24 }
  0x22   :  { %211 = vmatmul.mubr.bf16.vlgmr.msra.gmra.mxu0 %v72_v25 }
  0xe2   :  { %v298_v26 = vpop.f32.mrf.mxu0 }
  0xe4   :  { %v299_v28 = vpop.f32.mrf.mxu0 }
  0xe5   :  { %v300_v29 = vadd.f32 %v299_v28, %v298_v26 }
  0xe6   :  { %v301_v30 = vpop.f32.mrf.mxu0 }
  0xe7   :  { %v213_v31 = vadd.f32 %v300_v29, %v263_v27 }
  0xe8   :  { %v302_v32 = vpop.f32.mrf.mxu0 }
  0xe9   :  { %v218_v33 = vmax.f32 %v213_v31, 0.0 }
  0xeb   :  { %v219_v34 = vpack.c.bf16 %v218_v33, %v218_v33 }
  0xed   :  { %221 = vst.msk [vmem:[#allocation2] sm:$0x1] %vm220_vm0, %v219_v34 }
  0xf4   :  { %v240_v35 = vld [vmem:[#allocation2] sm:$0x1] }
  0xf5   :  { %281 = vst [vmem:[%s408_s4 + $0x4] sm:$0x1] %v240_v35 }

// kernel: forward.66
= control target key start
LH: loop header
LB: loop body
LE: loop exit
PB: predicated region body
PF: predicated region fallthrough
CT: control target
= control target key end

     0   :  { %v982_v1 = vmov 0   ;;  %v49_v27 = vlaneseq  ;;  %v983_v28 = vmov 1966171168   ;;  %v984_v50 = vmov 0.0   ;;  %s1246_s6 = inlined_call_operand.vmem [shape: bf16[128,256], index: 6, kind: input, shape index: {}]   ;;  %s1247_s1 = inlined_call_operand.vmem [shape: bf16[576,64], index: 1, kind: input, shape index: {}]   ;;  %s1248_s5 = inlined_call_operand.vmem [shape: bf16[2,128], index: 5, kind: input, shape index: {}]   ;;  %s1249_s0 = inlined_call_operand.vmem [shape: bf16[2,576], index: 0, kind: input, shape index: {}]   ;;  %s1250_s3 = inlined_call_operand.vmem [shape: bf16[64,256], index: 3, kind: input, shape index: {}]   ;;  %s1251_s2 = inlined_call_operand.vmem [shape: f32[1,64], index: 2, kind: input, shape index: {}]   ;;  %s1252_s7 = inlined_call_operand.vmem [shape: f32[1,256], index: 7, kind: input, shape index: {}]   ;;  %s1253_s4 = inlined_call_operand.vmem [shape: f32[1,256], index: 4, kind: input, shape index: {}]   ;;  %s1254_s8 = inlined_call_operand.vmem [shape: bf16[2,256], index: 8, kind: output, shape index: {}]  }
   0x1   :  { %v909_v0 = vld [vmem:[%s1246_s6 + $0x74] ss:$8 sps:$4 sm:$0xff]   ;;  %171 = vmatprep.mubr.bf16.mxu0 %v982_v1  ;;  %v911_v2 = vld [vmem:[%s1246_s6 + $0x70] ss:$8 sps:$4 sm:$0xff]   ;;  %v912_v3 = vld [vmem:[%s1246_s6 + $0x64] ss:$8 sps:$4 sm:$0xff]   ;;  %v263_v29 = vunpack.c.l.s4 %v983_v28 }
   0x2   :  { %139 = vmatprep.subr.bf16.mxu0 %v909_v0  ;;  %v914_v4 = vld [vmem:[%s1246_s6 + $0x60] ss:$8 sps:$4 sm:$0xff]   ;;  %v915_v5 = vld [vmem:[%s1246_s6 + $0x54] ss:$8 sps:$4 sm:$0xff]   ;;  %v917_v6 = vld [vmem:[%s1246_s6 + $0x50] ss:$8 sps:$4 sm:$0xff]  }
   0x3   :  { %140 = vmatpush1.bf16.msra.mxu0 %v911_v2  ;;  %v918_v7 = vld [vmem:[%s1246_s6 + $0x44] ss:$8 sps:$4 sm:$0xff]   ;;  %v923_v8 = vld [vmem:[%s1247_s1 + $0x78] sm:$0xff]   ;;  %v920_v10 = vld [vmem:[%s1246_s6 + $0x40] ss:$8 sps:$4 sm:$0xff]   ;;  %v1122_v34 = vshrl.u32 %v49_v27, 7  ;;  %v264_v35 = vunpack.c.0.s8 %v263_v29 }
   0x4   :  { %141 = vmatprep.subr.bf16.mxu0 %v912_v3  ;;  %v925_v9 = vld [vmem:[%s1247_s1 + $0x38] sm:$0xff]   ;;  %844 = vmatprep.subr.bf16.mxu1 %v923_v8  ;;  %v928_v11 = vld [vmem:[%s1247_s1 + $0x70] sm:$0xff]   ;;  %v933_v14 = vld [vmem:[%s1247_s1 + $0x68] sm:$0xff]   ;;  %vm985_vm0 = vmmov 0   ;;  %vm520_vm1 = vcmask 523264  }
   0x5   :  { %845 = vmatpush3.bf16.msra.mxu1 %v925_v9  ;;  %v930_v12 = vld [vmem:[%s1247_s1 + $0x30] sm:$0xff]   ;;  %v935_v16 = vld [vmem:[%s1247_s1 + $0x28] sm:$0xff]   ;;  %v938_v18 = vld [vmem:[%s1247_s1 + $0x60] sm:$0xff]   ;;  %v1140_v41 = vsub.s32 %v264_v35, %v1122_v34 }
   0x6   :  { %v921_v13 = vld [vmem:[%s1246_s6 + $0x34] ss:$8 sps:$4 sm:$0xff]   ;;  %846 = vmatprep.subr.bf16.mxu1 %v928_v11  ;;  %v924_v15 = vld [vmem:[%s1246_s6 + $0x30] ss:$8 sps:$4 sm:$0xff]   ;;  %v926_v17 = vld [vmem:[%s1246_s6 + $0x24] ss:$8 sps:$4 sm:$0xff]  }
   0x7   :  { %142 = vmatpush1.bf16.msra.mxu0 %v914_v4  ;;  %v929_v19 = vld [vmem:[%s1246_s6 + $0x20] ss:$8 sps:$4 sm:$0xff]   ;;  %v941_v21 = vld [vmem:[%s1247_s1 + $0x58] sm:$0xff]   ;;  %v945_v25 = vld [vmem:[%s1247_s1 + $0x50] sm:$0xff]  }
   0x8   :  { %143 = vmatprep.subr.bf16.mxu0 %v915_v5  ;;  %v940_v20 = vld [vmem:[%s1247_s1 + $0x20] sm:$0xff]   ;;  %v931_v22 = vld [vmem:[%s1246_s6 + $0x14] ss:$8 sps:$4 sm:$0xff]   ;;  %v934_v23 = vld [vmem:[%s1246_s6 + $0x10] ss:$8 sps:$4 sm:$0xff]  }
   0x9   :  { %847 = vmatpush3.bf16.msra.mxu1 %v930_v12  ;;  %v943_v24 = vld [vmem:[%s1247_s1 + $0x18] sm:$0xff]   ;;  %v936_v26 = vld [vmem:[%s1246_s6 + $0x4] ss:$8 sps:$4 sm:$0xff]   ;;  %v939_v30 = vld [vmem:[%s1246_s6] ss:$8 sps:$4 sm:$0xff]  }
   0xa   :  { %848 = vmatprep.subr.bf16.mxu1 %v933_v14  ;;  %v947_v31 = vld [vmem:[%s1247_s1 + $0x10] sm:$0xff]   ;;  %v949_v32 = vld [vmem:[%s1247_s1 + $0x48] sm:$0xff]   ;;  %v942_v33 = vld [vmem:[%s1247_s1 + $0xf8] sm:$0xff]  }
   0xb   :  { %144 = vmatpush1.bf16.msra.mxu0 %v917_v6  ;;  %v30_v36 = vld [vmem:[%s1248_s5] sm:$0x1]  ;;  %v944_v37 = vld [vmem:[%s1247_s1 + $0xb8] sm:$0xff]   ;;  %v951_v38 = vld [vmem:[%s1247_s1 + $0x8] sm:$0xff]  }
   0xc   :  { %145 = vmatprep.subr.bf16.mxu0 %v918_v7  ;;  %v953_v39 = vld [vmem:[%s1247_s1 + $0x40] sm:$0xff]   ;;  %v946_v40 = vld [vmem:[%s1247_s1 + $0xf0] sm:$0xff]   ;;  %v950_v45 = vld [vmem:[%s1247_s1 + $0xe8] sm:$0xff]  }
   0xd   :  { %849 = vmatpush3.bf16.msra.mxu1 %v935_v16  ;;  %v948_v42 = vld [vmem:[%s1247_s1 + $0xb0] sm:$0xff]   ;;  %v955_v43 = vld [vmem:[%s1247_s1] sm:$0xff]   ;;  %v952_v47 = vld [vmem:[%s1247_s1 + $0xa8] sm:$0xff]  }
   0xe   :  { %850 = vmatprep.subr.bf16.mxu1 %v938_v18  ;;  %v180_v44 = vld [vmem:[%s1249_s0] sm:$0x1f]  ;;  %v960_v53 = vld [vmem:[%s1247_s1 + $0x118] sm:$0xff]   ;;  %v963_v57 = vld [vmem:[%s1247_s1 + $0x110] sm:$0xff]  }
   0xf   :  { %146 = vmatpush1.bf16.msra.mxu0 %v920_v10  ;;  %v268_v46 = vrot.slane %v180_v44, %v1140_v41  ;;  %v954_v49 = vld [vmem:[%s1247_s1 + $0xe0] sm:$0xff]   ;;  %v958_v56 = vld [vmem:[%s1247_s1 + $0xd8] sm:$0xff]   ;;  %v261_v58 = vcombine.high %v180_v44, %v180_v44  ;;  %v961_v60 = vld [vmem:[%s1247_s1 + $0xd0] sm:$0xff]   ;;  %v55_v44 = vsub.s32 1, %v1122_v34 }
  0x10   :  { %147 = vmatprep.subr.bf16.mxu0 %v921_v13  ;;  %v956_v54 = vld [vmem:[%s1247_s1 + $0xa0] sm:$0xff]   ;;  %v959_v59 = vld [vmem:[%s1247_s1 + $0x98] sm:$0xff]   ;;  %v966_v61 = vld [vmem:[%s1247_s1 + $0x108] sm:$0xff]  }
  0x11   :  { %851 = vmatpush3.bf16.msra.mxu1 %v940_v20  ;;  %v276_v48 = vcombine.high %v268_v46, %v268_v46  ;;  %v283_v51 = vrot.slane %v268_v46, %v1140_v41  ;;  %v275_v62 = vrot.slane %v261_v58, %v1140_v41  ;;  %v962_v63 = vld [vmem:[%s1247_s1 + $0x90] sm:$0xff]   ;;  %v964_v0 = vld [vmem:[%s1247_s1 + $0xc8] sm:$0xff]   ;;  %v969_v2 = vld [vmem:[%s1247_s1 + $0x100] sm:$0xff]  }
  0x12   :  { %852 = vmatprep.subr.bf16.mxu1 %v941_v21  ;;  %v965_v4 = vld [vmem:[%s1247_s1 + $0x88] sm:$0xff]   ;;  %v967_v5 = vld [vmem:[%s1247_s1 + $0xc0] sm:$0xff]   ;;  %v970_v8 = vld [vmem:[%s1250_s3 + $0x30] ss:$8 sps:$4 sm:$0xff]  }
  0x13   :  { %148 = vmatpush1.bf16.msra.mxu0 %v924_v15  ;;  %v297_v52 = vrot.slane %v276_v48, %v1140_v41  ;;  %v290_v3 = vrot.slane %v275_v62, %v1140_v41  ;;  %v968_v6 = vld [vmem:[%s1247_s1 + $0x80] sm:$0xff]   ;;  %v298_v7 = vcombine.high %v283_v51, %v283_v51  ;;  %v972_v9 = vld [vmem:[%s1250_s3 + $0x34] ss:$8 sps:$4 sm:$0xff]   ;;  %v976_v12 = vld [vmem:[%s1250_s3 + $0x10] ss:$8 sps:$4 sm:$0xff]  }
  0x14   :  { %149 = vmatprep.subr.bf16.mxu0 %v926_v17  ;;  %v975_v10 = vld [vmem:[%s1250_s3 + $0x24] ss:$8 sps:$4 sm:$0xff]   ;;  %v978_v11 = vld [vmem:[%s1250_s3 + $0x14] ss:$8 sps:$4 sm:$0xff]   ;;  %v979_v14 = vld [vmem:[%s1250_s3] ss:$8 sps:$4 sm:$0xff]  }
  0x15   :  { %853 = vmatpush3.bf16.msra.mxu1 %v943_v24  ;;  %v299_v55 = vcombine.high %v297_v52, %v297_v52  ;;  %556 = vmatprep.mubr.bf16.mxu1 %v297_v52  ;;  %v981_v13 = vld [vmem:[%s1250_s3 + $0x4] ss:$8 sps:$4 sm:$0xff]   ;;  %v795_v28 = vld [vmem:[%s1251_s2] ss:$0 sm:$0xff] }
  0x16   :  { %854 = vmatprep.subr.bf16.mxu1 %v945_v25 }
  0x17   :  { %150 = vmatpush1.bf16.msra.mxu0 %v929_v19 }
  0x18   :  { %151 = vmatprep.subr.bf16.mxu0 %v931_v22 }
  0x19   :  { %855 = vmatpush3.bf16.msra.mxu1 %v947_v31 }
  0x1a   :  { %856 = vmatprep.subr.bf16.mxu1 %v949_v32 }
  0x1b   :  { %152 = vmatpush1.bf16.msra.mxu0 %v934_v23 }
  0x1c   :  { %153 = vmatprep.subr.bf16.mxu0 %v936_v26 }
  0x1d   :  { %857 = vmatpush3.bf16.msra.mxu1 %v951_v38 }
  0x1e   :  { %858 = vmatprep.subr.bf16.mxu1 %v953_v39 }
  0x1f   :  { %154 = vmatpush1.bf16.msra.mxu0 %v939_v30 }
  0x20   :  { %866 = vmatprep.subr.bf16.mxu0 %v942_v33 }
  0x21   :  { %859 = vmatpush3.bf16.msra.mxu1 %v955_v43  ;;  %v654_v43 = vld [vmem:[%s1253_s4] sm:$0x3] }
  0x22   :  { %172 = vmatmul.mubr.bf16.vlgmr.msra.gmra.mxu0 %v30_v36  ;;  %893 = vmatprep.subr.bf16.mxu1 %v984_v50  ;;  %v663_v48 = vrot.slane %v654_v43, %v55_v44 }
  0x23   :  { %867 = vmatpush3.bf16.msra.mxu0 %v944_v37  ;;  %596 = vmatprep.mubr.bf16.mxu0 %v299_v55 }
  0x24   :  { %868 = vmatprep.subr.bf16.mxu0 %v946_v40  ;;  %557 = vmatmul.mubr.bf16.vlgmr.msra.gmra.mxu1 %v283_v51  ;;  %v51_v40 = vsub.s32 0, %v1122_v34 }
  0x25   :  { %894 = vmatpush3.bf16.msra.mxu1 %v960_v53  ;;  %901 = vmatprep.mubr.msk.bf16.mxu1 %vm985_vm0, %v984_v50 }
  0x26   :  { %895 = vmatprep.subr.bf16.mxu1 %v984_v50  ;;  %v659_v46 = vrot.slane %v654_v43, %v51_v40 }
  0x27   :  { %869 = vmatpush3.bf16.msra.mxu0 %v948_v42  ;;  %v47_v42 = vld [vmem:[%s1252_s7] sm:$0x3] }
  0x28   :  { %870 = vmatprep.subr.bf16.mxu0 %v950_v45  ;;  %v52_v45 = vrot.slane %v47_v42, %v51_v40 }
  0x29   :  { %896 = vmatpush3.bf16.msra.mxu1 %v963_v57 }
  0x2a   :  { %897 = vmatprep.subr.bf16.mxu1 %v984_v50 }
  0x2b   :  { %871 = vmatpush3.bf16.msra.mxu0 %v952_v47  ;;  %v56_v47 = vrot.slane %v47_v42, %v55_v44 }
  0x2c   :  { %872 = vmatprep.subr.bf16.mxu0 %v954_v49 }
  0x2d   :  { %898 = vmatpush3.bf16.msra.mxu1 %v966_v61 }
  0x2e   :  { %899 = vmatprep.subr.bf16.mxu1 %v984_v50 }
  0x2f   :  { %873 = vmatpush3.bf16.msra.mxu0 %v956_v54 }
  0x30   :  { %874 = vmatprep.subr.bf16.mxu0 %v958_v56 }
  0x31   :  { %900 = vmatpush3.bf16.msra.mxu1 %v969_v2 }
  0x32   :  { %717 = vmatprep.subr.bf16.mxu1 %v972_v9 }
  0x33   :  { %875 = vmatpush3.bf16.msra.mxu0 %v959_v59 }
  0x34   :  { %876 = vmatprep.subr.bf16.mxu0 %v961_v60  ;;  %902 = vmatmul.mubr.msk.bf16.vlgmr.msra.gmra.mxu1 %vm520_vm1, %v290_v3 }
  0x35   :  { %741 = vmatprep.mubr.bf16.mxu1 %v982_v1  ;;  %718 = vmatpush1.bf16.msra.mxu1 %v970_v8  ;;  %v973_v1 = vld [vmem:[%s1250_s3 + $0x20] ss:$8 sps:$4 sm:$0xff]  }
  0x36   :  { %719 = vmatprep.subr.bf16.mxu1 %v975_v10 }
  0x37   :  { %877 = vmatpush3.bf16.msra.mxu0 %v962_v63 }
  0x38   :  { %878 = vmatprep.subr.bf16.mxu0 %v964_v0 }
  0x39   :  { %720 = vmatpush1.bf16.msra.mxu1 %v973_v1 }
  0x3a   :  { %721 = vmatprep.subr.bf16.mxu1 %v978_v11 }
  0x3b   :  { %879 = vmatpush3.bf16.msra.mxu0 %v965_v4 }
  0x3c   :  { %880 = vmatprep.subr.bf16.mxu0 %v967_v5 }
  0x3d   :  { %722 = vmatpush1.bf16.msra.mxu1 %v976_v12 }
  0x3e   :  { %723 = vmatprep.subr.bf16.mxu1 %v981_v13 }
  0x3f   :  { %881 = vmatpush3.bf16.msra.mxu0 %v968_v6 }
  0x41   :  { %724 = vmatpush1.bf16.msra.mxu1 %v979_v14 }
  0x42   :  { %597 = vmatmul.mubr.bf16.vlgmr.msra.gmra.mxu0 %v298_v7 }
  0xe2   :  { %v173_v15 = vpop.f32.mrf.mxu0 }
  0xe3   :  { %v174_v50 = vadd.f32 %v173_v15, %v52_v45 }
  0xe4   :  { %v175_v16 = vpop.f32.mrf.mxu0  ;;  %v860_v19 = vpop.f32.mrf.mxu1 }
  0xe5   :  { %v176_v53 = vadd.f32 %v175_v16, %v56_v47 }
  0xe6   :  { %v177_v17 = vpop.f32.mrf.mxu0  ;;  %v861_v20 = vpop.f32.mrf.mxu1 }
  0xe7   :  { %v862_v26 = vadd.f32 %v861_v20, %v860_v19 }
  0xe8   :  { %v178_v18 = vpop.f32.mrf.mxu0  ;;  %v863_v21 = vpop.f32.mrf.mxu1 }
  0xe9   :  { %v559_v31 = vadd.f32 %v862_v26, %v795_v28 }
  0xea   :  { %v864_v22 = vpop.f32.mrf.mxu1 }
  0xf4   :  { %v638_v23 = vpop.f32.mrf.mxu1 }
  0xf6   :  { %v903_v24 = vpop.f32.mrf.mxu1 }
  0xf8   :  { %v641_v25 = vpop.f32.mrf.mxu1 }
  0xfa   :  { %v904_v27 = vpop.f32.mrf.mxu1 }
 0x102   :  { %v882_v29 = vpop.f32.mrf.mxu0 }
 0x104   :  { %v883_v30 = vpop.f32.mrf.mxu0 }
 0x105   :  { %v884_v32 = vadd.f32 %v883_v30, %v882_v29 }
 0x106   :  { %v885_v33 = vpop.f32.mrf.mxu0 }
 0x107   :  { %v599_v35 = vadd.f32 %v884_v32, %v559_v31 }
 0x108   :  { %v886_v36 = vpop.f32.mrf.mxu0 }
 0x109   :  { %v639_v37 = vadd.f32 %v638_v23, %v599_v35 }
 0x10b   :  { %v644_v38 = vmax.f32 %v639_v37, 0.0 }
 0x10d   :  { %v645_v39 = vpack.c.bf16 %v644_v38, %v644_v38 }
 0x10f   :  { %841 = vmatmul.mubr.msk.bf16.vlgmr.msra.gmra.mxu1 %vm520_vm1, %v645_v39 }
 0x1cf   :  { %v743_v49 = vpop.f32.mrf.mxu1 }
 0x1d0   :  { %v744_v51 = vadd.f32 %v743_v49, %v659_v46 }
 0x1d1   :  { %v745_v52 = vpop.f32.mrf.mxu1 }
 0x1d2   :  { %v750_v54 = vadd.f32 %v744_v51, %v174_v50  ;;  %v746_v55 = vadd.f32 %v745_v52, %v663_v48 }
 0x1d3   :  { %v747_v56 = vpop.f32.mrf.mxu1 }
 0x1d4   :  { %v751_v57 = vadd.f32 %v746_v55, %v176_v53  ;;  %v752_v59 = vmax.f32 %v750_v54, 0.0 }
 0x1d5   :  { %v748_v58 = vpop.f32.mrf.mxu1 }
 0x1d6   :  { %v753_v60 = vmax.f32 %v751_v57, 0.0 }
 0x1d8   :  { %v842_v61 = vpack.c.bf16 %v753_v60, %v752_v59 }
 0x1da   :  { %v765_v62 = vrot.slane %v842_v61, %v1140_v41 }
 0x1dc   :  { %843 = vst.sshfl [vmem:[%s1254_s8] sm:$0x5 pattern:$0x73625140] %v765_v62 }

// kernel: forward.69
= control target key start
LH: loop header
LB: loop body
LE: loop exit
PB: predicated region body
PF: predicated region fallthrough
CT: control target
= control target key end

     0   :  { %s89_s0 = inlined_call_operand.vmem [shape: bf16[2,1,256], index: 0, kind: input, shape index: {}]   ;;  %s90_s1 = inlined_call_operand.hbm [shape: f32[2,256], index: 1, kind: output, shape index: {}]  }
   0x1   :  { %v9_v0 = vld [vmem:[%s89_s0] sm:$0x3]  ;;  %v10_v1 = vld [vmem:[%s89_s0 + $0x2] sm:$0x3] }
   0x2   :  { %v11_v2 = vunpack.c.l.bf16 %v9_v0  ;;  %v12_v3 = vunpack.c.l.bf16 %v10_v1 }
   0x3   :  { %6 = vsyncpa [#allocation3], 0  ;;  %vm22_vm0 = vcmask 1041409   ;;  %vm24_vm1 = vcmask 1043459   ;;  %vm26_vm2 = vcmask 1045509   ;;  %s69_s10 = smov [#allocation2]  }
   0x4   :  { %v21_v4 = vrot.slane %v12_v3, 7  ;;  %s38_s11 = sshll.u32 %s69_s10, 4  ;;  %vm28_vm3 = vcmask 1047559   ;;  %s39_s11 = int_to_ptr.vmem [resolvable:$true] %s38_s11 }
   0x5   :  { %s47_s12 = scalar_lea.vmem %s39_s11, 64  ;;  %p52_p1 = scmp.lt.s32.totalorder %s39_s11, %s39_s11 }
   0x6   :  { %v23_v5 = vsel %vm22_vm0, %v21_v4, %v11_v2  ;;  %p48_p0 = scmp.ne.s32.totalorder %s39_s11, %s47_s12  ;;  %p53_p2 = scmp.lt.s32.totalorder %s47_s12, %s47_s12 }
   0x7   :  { %v25_v6 = vsel %vm24_vm1, %v21_v4, %v23_v5 }
   0x8   :  { %v27_v7 = vsel %vm26_vm2, %v21_v4, %v25_v6  ;;  %p54_p3 = por %p53_p2, %p52_p1 }
   0x9   :  { %v29_v8 = vsel %vm28_vm3, %v21_v4, %v27_v7 }
   0xa   :  { %31 = vst [vmem:[#allocation2] sm:$0xf] %v29_v8  ;;  %p55_p4 = pnand %p54_p3, %p48_p0 }
   0xc   :  { %58 = shalt.err (!%p55_p4)
}
   0xd   :  { %41 = dma.vmem_to_hbm [thread:$0]  %s39_s11, 64, %s90_s1, [#allocation3]  }
   0xe   :  { %67 = dma.done.wait [#allocation3], 64  }
   0xf   :  { %68 = vsyncadd [#allocation3], 4294967232 }
  0x10   :  { %45 = vsyncpa [#allocation3], 1 }

// kernel: forward.67
= control target key start
LH: loop header
LB: loop body
LE: loop exit
PB: predicated region body
PF: predicated region fallthrough
CT: control target
= control target key end

     0   :  { %v800_v21 = vmov 1966171168   ;;  %v109_v23 = vlaneseq  ;;  %v801_v40 = vmov 0.0   ;;  %vm802_vm0 = vmmov 0   ;;  %s1003_s1 = inlined_call_operand.vmem [shape: bf16[576,64], index: 1, kind: input, shape index: {}]   ;;  %s1004_s0 = inlined_call_operand.vmem [shape: bf16[2,576], index: 0, kind: input, shape index: {}]   ;;  %s1005_s3 = inlined_call_operand.vmem [shape: bf16[64,256], index: 3, kind: input, shape index: {}]   ;;  %s1006_s2 = inlined_call_operand.vmem [shape: f32[1,64], index: 2, kind: input, shape index: {}]   ;;  %s1007_s5 = inlined_call_operand.vmem [shape: bf16[2,256], index: 5, kind: input, shape index: {}]   ;;  %s1008_s4 = inlined_call_operand.vmem [shape: f32[1,256], index: 4, kind: input, shape index: {}]   ;;  %s1009_s6 = inlined_call_operand.vmem [shape: bf16[2,256], index: 6, kind: output, shape index: {}]  }
   0x1   :  { %v751_v0 = vld [vmem:[%s1003_s1 + $0x78] sm:$0xff]   ;;  %v755_v4 = vld [vmem:[%s1003_s1 + $0x70] sm:$0xff]   ;;  %v759_v8 = vld [vmem:[%s1003_s1 + $0x68] sm:$0xff]   ;;  %v107_v22 = vunpack.c.l.s4 %v800_v21  ;;  %vm364_vm1 = vcmask 523264   ;;  %v803_v61 = vmov 0  }
   0x2   :  { %v752_v1 = vld [vmem:[%s1003_s1 + $0x38] sm:$0xff]   ;;  %685 = vmatprep.subr.bf16.mxu0 %v751_v0  ;;  %v756_v5 = vld [vmem:[%s1003_s1 + $0x30] sm:$0xff]   ;;  %v760_v9 = vld [vmem:[%s1003_s1 + $0x28] sm:$0xff]   ;;  %v915_v29 = vshrl.u32 %v109_v23, 7 }
   0x3   :  { %v753_v2 = vld [vmem:[%s1003_s1 + $0xf8] sm:$0xff]   ;;  %686 = vmatpush3.bf16.msra.mxu0 %v752_v1  ;;  %v757_v6 = vld [vmem:[%s1003_s1 + $0xf0] sm:$0xff]   ;;  %v761_v10 = vld [vmem:[%s1003_s1 + $0xe8] sm:$0xff]   ;;  %v108_v28 = vunpack.c.0.s8 %v107_v22 }
   0x4   :  { %v754_v3 = vld [vmem:[%s1003_s1 + $0xb8] sm:$0xff]   ;;  %707 = vmatprep.subr.bf16.mxu1 %v753_v2  ;;  %687 = vmatprep.subr.bf16.mxu0 %v755_v4  ;;  %v758_v7 = vld [vmem:[%s1003_s1 + $0xb0] sm:$0xff]   ;;  %v762_v11 = vld [vmem:[%s1003_s1 + $0xa8] sm:$0xff]   ;;  %v502_v22 = vsub.s32 0, %v915_v29 }
   0x5   :  { %708 = vmatpush3.bf16.msra.mxu1 %v754_v3  ;;  %v763_v12 = vld [vmem:[%s1003_s1 + $0x60] sm:$0xff]   ;;  %v767_v16 = vld [vmem:[%s1003_s1 + $0x58] sm:$0xff]   ;;  %v771_v20 = vld [vmem:[%s1003_s1 + $0x50] sm:$0xff]   ;;  %v930_v34 = vsub.s32 %v108_v28, %v915_v29 }
   0x6   :  { %709 = vmatprep.subr.bf16.mxu1 %v757_v6  ;;  %v764_v13 = vld [vmem:[%s1003_s1 + $0x20] sm:$0xff]   ;;  %v768_v17 = vld [vmem:[%s1003_s1 + $0x18] sm:$0xff]   ;;  %v772_v24 = vld [vmem:[%s1003_s1 + $0x10] sm:$0xff]  }
   0x7   :  { %688 = vmatpush3.bf16.msra.mxu0 %v756_v5  ;;  %v765_v14 = vld [vmem:[%s1003_s1 + $0xe0] sm:$0xff]   ;;  %v769_v18 = vld [vmem:[%s1003_s1 + $0xd8] sm:$0xff]   ;;  %v773_v25 = vld [vmem:[%s1003_s1 + $0xd0] sm:$0xff]  }
   0x8   :  { %689 = vmatprep.subr.bf16.mxu0 %v759_v8  ;;  %v766_v15 = vld [vmem:[%s1003_s1 + $0xa0] sm:$0xff]   ;;  %v770_v19 = vld [vmem:[%s1003_s1 + $0x98] sm:$0xff]   ;;  %v774_v26 = vld [vmem:[%s1003_s1 + $0x90] sm:$0xff]  }
   0x9   :  { %710 = vmatpush3.bf16.msra.mxu1 %v758_v7  ;;  %v775_v27 = vld [vmem:[%s1003_s1 + $0x48] sm:$0xff]   ;;  %v779_v33 = vld [vmem:[%s1003_s1 + $0x40] sm:$0xff]   ;;  %v784_v44 = vld [vmem:[%s1003_s1 + $0x118] sm:$0xff]  }
   0xa   :  { %711 = vmatprep.subr.bf16.mxu1 %v761_v10  ;;  %v776_v30 = vld [vmem:[%s1003_s1 + $0x8] sm:$0xff]   ;;  %v780_v35 = vld [vmem:[%s1003_s1] sm:$0xff]   ;;  %v785_v47 = vld [vmem:[%s1003_s1 + $0x110] sm:$0xff]  }
   0xb   :  { %690 = vmatpush3.bf16.msra.mxu0 %v760_v9  ;;  %v777_v31 = vld [vmem:[%s1003_s1 + $0xc8] sm:$0xff]   ;;  %v781_v36 = vld [vmem:[%s1003_s1 + $0xc0] sm:$0xff]   ;;  %v790_v53 = vld [vmem:[%s1005_s3 + $0x34] ss:$8 sps:$4 sm:$0xff]  }
   0xc   :  { %691 = vmatprep.subr.bf16.mxu0 %v763_v12  ;;  %v778_v32 = vld [vmem:[%s1003_s1 + $0x88] sm:$0xff]   ;;  %v24_v37 = vld [vmem:[%s1004_s0] sm:$0x1f]  ;;  %v788_v54 = vld [vmem:[%s1005_s3 + $0x30] ss:$8 sps:$4 sm:$0xff]  }
   0xd   :  { %712 = vmatpush3.bf16.msra.mxu1 %v762_v11  ;;  %v112_v38 = vrot.slane %v24_v37, %v930_v34  ;;  %v783_v39 = vld [vmem:[%s1003_s1 + $0x80] sm:$0xff]   ;;  %v105_v48 = vcombine.high %v24_v37, %v24_v37  ;;  %v786_v49 = vld [vmem:[%s1003_s1 + $0x108] sm:$0xff]   ;;  %v796_v57 = vld [vmem:[%s1005_s3 + $0x14] ss:$8 sps:$4 sm:$0xff]  }
   0xe   :  { %713 = vmatprep.subr.bf16.mxu1 %v765_v14  ;;  %v787_v51 = vld [vmem:[%s1003_s1 + $0x100] sm:$0xff]   ;;  %v794_v58 = vld [vmem:[%s1005_s3 + $0x10] ss:$8 sps:$4 sm:$0xff]  }
   0xf   :  { %692 = vmatpush3.bf16.msra.mxu0 %v764_v13  ;;  %v120_v41 = vcombine.high %v112_v38, %v112_v38  ;;  %v127_v42 = vrot.slane %v112_v38, %v930_v34  ;;  %v119_v50 = vrot.slane %v105_v48, %v930_v34  ;;  %v791_v55 = vld [vmem:[%s1005_s3 + $0x20] ss:$8 sps:$4 sm:$0xff]   ;;  %v793_v56 = vld [vmem:[%s1005_s3 + $0x24] ss:$8 sps:$4 sm:$0xff]  }
  0x10   :  { %693 = vmatprep.subr.bf16.mxu0 %v767_v16  ;;  %v799_v59 = vld [vmem:[%s1005_s3 + $0x4] ss:$8 sps:$4 sm:$0xff]   ;;  %v797_v60 = vld [vmem:[%s1005_s3] ss:$8 sps:$4 sm:$0xff]  }
  0x11   :  { %714 = vmatpush3.bf16.msra.mxu1 %v766_v15  ;;  %v141_v43 = vrot.slane %v120_v41, %v930_v34  ;;  %v142_v45 = vcombine.high %v127_v42, %v127_v42  ;;  %v134_v52 = vrot.slane %v119_v50, %v930_v34  ;;  %v636_v6 = vld [vmem:[%s1006_s2] ss:$0 sm:$0xff] }
  0x12   :  { %715 = vmatprep.subr.bf16.mxu1 %v769_v18  ;;  %v804_v18 = vmov 1983009808   ;;  %v594_v21 = vld [vmem:[%s1007_s5] sm:$0x3] }
  0x13   :  { %694 = vmatpush3.bf16.msra.mxu0 %v768_v17  ;;  %400 = vmatprep.mubr.bf16.mxu0 %v141_v43  ;;  %v143_v46 = vcombine.high %v141_v43, %v141_v43  ;;  %v595_v23 = vunpack.c.l.bf16 %v594_v21 }
  0x14   :  { %695 = vmatprep.subr.bf16.mxu0 %v771_v20 }
  0x15   :  { %716 = vmatpush3.bf16.msra.mxu1 %v770_v19  ;;  %440 = vmatprep.mubr.bf16.mxu1 %v143_v46  ;;  %v598_v19 = vunpack.c.l.s4 %v804_v18 }
  0x16   :  { %717 = vmatprep.subr.bf16.mxu1 %v773_v25  ;;  %v498_v25 = vld [vmem:[%s1008_s4] sm:$0x3] }
  0x17   :  { %696 = vmatpush3.bf16.msra.mxu0 %v772_v24  ;;  %v599_v20 = vunpack.c.0.s8 %v598_v19 }
  0x18   :  { %697 = vmatprep.subr.bf16.mxu0 %v775_v27  ;;  %v503_v27 = vrot.slane %v498_v25, %v502_v22 }
  0x19   :  { %718 = vmatpush3.bf16.msra.mxu1 %v774_v26  ;;  %v602_v24 = vsub.s32 %v599_v20, %v915_v29  ;;  %v506_v26 = vsub.s32 1, %v915_v29 }
  0x1a   :  { %719 = vmatprep.subr.bf16.mxu1 %v777_v31 }
  0x1b   :  { %698 = vmatpush3.bf16.msra.mxu0 %v776_v30  ;;  %v603_v28 = vrot.slane %v595_v23, %v602_v24  ;;  %v507_v30 = vrot.slane %v498_v25, %v506_v26 }
  0x1c   :  { %699 = vmatprep.subr.bf16.mxu0 %v779_v33 }
  0x1d   :  { %720 = vmatpush3.bf16.msra.mxu1 %v778_v32  ;;  %v604_v33 = vcombine.high %v603_v28, %v603_v28 }
  0x1e   :  { %721 = vmatprep.subr.bf16.mxu1 %v781_v36 }
  0x1f   :  { %700 = vmatpush3.bf16.msra.mxu0 %v780_v35 }
  0x20   :  { %734 = vmatprep.subr.bf16.mxu0 %v801_v40 }
  0x21   :  { %722 = vmatpush3.bf16.msra.mxu1 %v783_v39 }
  0x22   :  { %401 = vmatmul.mubr.bf16.vlgmr.msra.gmra.mxu0 %v127_v42  ;;  %561 = vmatprep.subr.bf16.mxu1 %v790_v53 }
  0x23   :  { %735 = vmatpush3.bf16.msra.mxu0 %v784_v44  ;;  %742 = vmatprep.mubr.msk.bf16.mxu0 %vm802_vm0, %v801_v40 }
  0x24   :  { %441 = vmatmul.mubr.bf16.vlgmr.msra.gmra.mxu1 %v142_v45  ;;  %736 = vmatprep.subr.bf16.mxu0 %v801_v40 }
  0x25   :  { %562 = vmatpush1.bf16.msra.mxu1 %v788_v54  ;;  %585 = vmatprep.mubr.bf16.mxu1 %v803_v61 }
  0x26   :  { %563 = vmatprep.subr.bf16.mxu1 %v793_v56 }
  0x27   :  { %737 = vmatpush3.bf16.msra.mxu0 %v785_v47 }
  0x28   :  { %738 = vmatprep.subr.bf16.mxu0 %v801_v40 }
  0x29   :  { %564 = vmatpush1.bf16.msra.mxu1 %v791_v55 }
  0x2a   :  { %565 = vmatprep.subr.bf16.mxu1 %v796_v57 }
  0x2b   :  { %739 = vmatpush3.bf16.msra.mxu0 %v786_v49 }
  0x2c   :  { %740 = vmatprep.subr.bf16.mxu0 %v801_v40 }
  0x2d   :  { %566 = vmatpush1.bf16.msra.mxu1 %v794_v58 }
  0x2e   :  { %567 = vmatprep.subr.bf16.mxu1 %v799_v59 }
  0x2f   :  { %741 = vmatpush3.bf16.msra.mxu0 %v787_v51 }
  0x31   :  { %568 = vmatpush1.bf16.msra.mxu1 %v797_v60 }
  0x32   :  { %743 = vmatmul.mubr.msk.bf16.vlgmr.msra.gmra.mxu0 %vm364_vm1, %v134_v52 }
  0xe2   :  { %v701_v62 = vpop.f32.mrf.mxu0 }
  0xe4   :  { %v702_v63 = vpop.f32.mrf.mxu0  ;;  %v723_v0 = vpop.f32.mrf.mxu1 }
  0xe5   :  { %v703_v5 = vadd.f32 %v702_v63, %v701_v62 }
  0xe6   :  { %v704_v1 = vpop.f32.mrf.mxu0  ;;  %v724_v2 = vpop.f32.mrf.mxu1 }
  0xe7   :  { %v403_v8 = vadd.f32 %v703_v5, %v636_v6  ;;  %v725_v9 = vadd.f32 %v724_v2, %v723_v0 }
  0xe8   :  { %v705_v3 = vpop.f32.mrf.mxu0  ;;  %v726_v4 = vpop.f32.mrf.mxu1 }
  0xe9   :  { %v443_v10 = vadd.f32 %v725_v9, %v403_v8 }
  0xea   :  { %v727_v7 = vpop.f32.mrf.mxu1 }
  0xf2   :  { %v482_v11 = vpop.f32.mrf.mxu0 }
  0xf3   :  { %v483_v12 = vadd.f32 %v482_v11, %v443_v10 }
  0xf4   :  { %v744_v13 = vpop.f32.mrf.mxu0 }
  0xf5   :  { %v488_v14 = vmax.f32 %v483_v12, 0.0 }
  0xf6   :  { %v485_v15 = vpop.f32.mrf.mxu0 }
  0xf7   :  { %v489_v16 = vpack.c.bf16 %v488_v14, %v488_v14 }
  0xf8   :  { %v745_v17 = vpop.f32.mrf.mxu0 }
  0xf9   :  { %682 = vmatmul.mubr.msk.bf16.vlgmr.msra.gmra.mxu1 %vm364_vm1, %v489_v16 }
 0x1b9   :  { %v587_v31 = vpop.f32.mrf.mxu1 }
 0x1ba   :  { %v588_v32 = vadd.f32 %v587_v31, %v503_v27 }
 0x1bb   :  { %v589_v35 = vpop.f32.mrf.mxu1 }
 0x1bc   :  { %v607_v36 = vadd.f32 %v603_v28, %v588_v32  ;;  %v590_v37 = vadd.f32 %v589_v35, %v507_v30 }
 0x1bd   :  { %v591_v38 = vpop.f32.mrf.mxu1 }
 0x1be   :  { %v608_v39 = vadd.f32 %v604_v33, %v590_v37  ;;  %v609_v41 = vmax.f32 %v607_v36, 0.0 }
 0x1bf   :  { %v592_v40 = vpop.f32.mrf.mxu1 }
 0x1c0   :  { %v610_v42 = vmax.f32 %v608_v39, 0.0 }
 0x1c2   :  { %v683_v43 = vpack.c.bf16 %v610_v42, %v609_v41 }
 0x1c4   :  { %v622_v44 = vrot.slane %v683_v43, %v930_v34 }
 0x1c6   :  { %684 = vst.sshfl [vmem:[%s1009_s6] sm:$0x5 pattern:$0x73625140] %v622_v44 }

</bundles_post_ra>
